<compile_context>
chip_gen: v5e
topology: v5e:2x2
jax: 0.10.0
libtpu: 0.0.40
codegen_flags: <defaults>
</compile_context>

<pallas_src>
import functools
import numpy as np
import jax
import jax.numpy as jnp
from jax.experimental import pallas as pl
from jax.experimental.pallas import tpu as pltpu

F32 = jnp.float32
BF16 = jnp.bfloat16
DUR_MAX = 4          # synthetic duration clamp (no LengthRegulator code in spec)
LN_EPS = 1e-5


def _round_up(n, m):
    return ((n + m - 1) // m) * m


# ----------------------------- tiled linear kernels -----------------------------

def _linear_kernel(x_ref, w_ref, b_ref, o_ref, *, relu):
    y = jnp.dot(x_ref[...].astype(BF16), w_ref[...],
                preferred_element_type=jnp.float32) + b_ref[...]
    if relu:
        y = jnp.maximum(y, 0.0)
    o_ref[...] = y


def _linear_mask_kernel(x_ref, w_ref, b_ref, m_ref, o_ref, *, relu):
    y = jnp.dot(x_ref[...].astype(BF16), w_ref[...],
                preferred_element_type=jnp.float32) + b_ref[...]
    if relu:
        y = jnp.maximum(y, 0.0)
    o_ref[...] = y * m_ref[...]


def pl_linear(x2d, w, b, *, relu=False, row_mask=None, tile_rows=256):
    """y = x2d @ w + b (+ fused relu / row-mask), tiled over rows."""
    N, K = x2d.shape
    M = w.shape[1]
    TN = min(tile_rows, _round_up(N, 8))
    Np = _round_up(N, TN)
    x_p = x2d.astype(F32)
    if Np != N:
        x_p = jnp.pad(x_p, ((0, Np - N), (0, 0)))
    b2 = b.reshape(1, M).astype(F32)
    cp = pltpu.CompilerParams(dimension_semantics=("parallel",))
    grid = (Np // TN,)
    if row_mask is None:
        out = pl.pallas_call(
            functools.partial(_linear_kernel, relu=relu),
            out_shape=jax.ShapeDtypeStruct((Np, M), F32),
            grid=grid,
            in_specs=[pl.BlockSpec((TN, K), lambda i: (i, 0)),
                      pl.BlockSpec((K, M), lambda i: (0, 0)),
                      pl.BlockSpec((1, M), lambda i: (0, 0))],
            out_specs=pl.BlockSpec((TN, M), lambda i: (i, 0)),
            compiler_params=cp,
        )(x_p, w, b2)
    else:
        m_p = row_mask.reshape(N, 1).astype(F32)
        if Np != N:
            m_p = jnp.pad(m_p, ((0, Np - N), (0, 0)))
        out = pl.pallas_call(
            functools.partial(_linear_mask_kernel, relu=relu),
            out_shape=jax.ShapeDtypeStruct((Np, M), F32),
            grid=grid,
            in_specs=[pl.BlockSpec((TN, K), lambda i: (i, 0)),
                      pl.BlockSpec((K, M), lambda i: (0, 0)),
                      pl.BlockSpec((1, M), lambda i: (0, 0)),
                      pl.BlockSpec((TN, 1), lambda i: (i, 0))],
            out_specs=pl.BlockSpec((TN, M), lambda i: (i, 0)),
            compiler_params=cp,
        )(x_p, w, b2, m_p)
    return out[:N]


# ----------------------------- fused MHA block kernel -----------------------------

def _mha_block_kernel(len_ref, x_ref, wqkv_ref, bqkv_ref, wo_ref, bo_ref,
                      g_ref, beta_ref, o_ref, *, n_head, eps):
    b = pl.program_id(0)
    L = len_ref[b]
    x = x_ref[0]                                    # [T, D] f32
    T, D = x.shape
    dk = D // n_head
    scale = 1.0 / float(np.sqrt(dk))

    x_bf = x.astype(BF16)
    qkv = jnp.dot(x_bf, wqkv_ref[...], preferred_element_type=jnp.float32) + bqkv_ref[...]
    q = qkv[:, :D]
    k = qkv[:, D:2 * D]
    v = qkv[:, 2 * D:]

    # key-padding mask built in-kernel from the prefetched length (no HBM mask)
    key_idx = jax.lax.broadcasted_iota(jnp.int32, (T, T), 1)
    add_mask = jnp.where(key_idx < L, 0.0, -1e9).astype(jnp.float32)

    heads = []
    for h in range(n_head):
        qh = q[:, h * dk:(h + 1) * dk].astype(BF16)
        kh = k[:, h * dk:(h + 1) * dk].astype(BF16)
        vh = v[:, h * dk:(h + 1) * dk].astype(BF16)
        s = jax.lax.dot_general(qh, kh, (((1,), (1,)), ((), ())),
                                preferred_element_type=jnp.float32) * scale + add_mask
        s = s - jnp.max(s, axis=-1, keepdims=True)
        p = jnp.exp(s)
        p = p * pl.reciprocal(jnp.sum(p, axis=-1, keepdims=True), approx=True)
        heads.append(jnp.dot(p.astype(BF16), vh, preferred_element_type=jnp.float32))
    ctx = jnp.concatenate(heads, axis=-1) if n_head > 1 else heads[0]

    proj = jnp.dot(ctx.astype(BF16), wo_ref[...],
                   preferred_element_type=jnp.float32) + bo_ref[...]
    res = proj + x
    mu = jnp.mean(res, axis=-1, keepdims=True)
    var = jnp.mean((res - mu) ** 2, axis=-1, keepdims=True)
    y = (res - mu) * jax.lax.rsqrt(var + eps) * g_ref[...] + beta_ref[...]

    row_idx = jax.lax.broadcasted_iota(jnp.int32, (T, 1), 0)
    o_ref[0] = y * (row_idx < L).astype(jnp.float32)


def pl_mha_block(x, lengths, p, n_head, eps=LN_EPS):
    B, T, D = x.shape
    grid_spec = pltpu.PrefetchScalarGridSpec(
        num_scalar_prefetch=1, grid=(B,),
        in_specs=[pl.BlockSpec((1, T, D), lambda b, lens: (b, 0, 0)),
                  pl.BlockSpec((D, 3 * D), lambda b, lens: (0, 0)),
                  pl.BlockSpec((1, 3 * D), lambda b, lens: (0, 0)),
                  pl.BlockSpec((D, D), lambda b, lens: (0, 0)),
                  pl.BlockSpec((1, D), lambda b, lens: (0, 0)),
                  pl.BlockSpec((1, D), lambda b, lens: (0, 0)),
                  pl.BlockSpec((1, D), lambda b, lens: (0, 0))],
        out_specs=pl.BlockSpec((1, T, D), lambda b, lens: (b, 0, 0)),
    )
    return pl.pallas_call(
        functools.partial(_mha_block_kernel, n_head=n_head, eps=eps),
        out_shape=jax.ShapeDtypeStruct((B, T, D), F32),
        grid_spec=grid_spec,
        compiler_params=pltpu.CompilerParams(dimension_semantics=("parallel",)),
    )(lengths.astype(jnp.int32), x.astype(F32),
      p['w_qkv'], p['b_qkv'], p['w_o'], p['b_o'], p['ln_g'], p['ln_b'])


# ----------------------------- fused FFN (conv) block kernel -----------------------------

def _ffn_block_kernel(len_ref, xp_ref, w1_ref, b1_ref, w2_ref, b2_ref,
                      g_ref, beta_ref, o_ref, h_scr, *, k0, p0, k1, p1, T, eps):
    b = pl.program_id(0)
    L = len_ref[b]
    xp = xp_ref[0]                                   # [T + 2*p0, D] f32
    D = xp.shape[-1]
    Fh = w1_ref.shape[-1]

    # conv1 as a sum over taps of shifted-slice matmuls (no im2col)
    acc1 = jnp.zeros((T, Fh), jnp.float32)
    for tap in range(k0):
        acc1 = acc1 + jnp.dot(xp[tap:tap + T, :].astype(BF16), w1_ref[tap],
                              preferred_element_type=jnp.float32)
    h1 = jnp.maximum(acc1 + b1_ref[...], 0.0)

    # stage conv1 output (zero-padded halo) in VMEM scratch for conv2
    if p1 > 0:
        h_scr[...] = jnp.zeros_like(h_scr)
    h_scr[pl.ds(p1, T), :] = h1

    acc2 = jnp.zeros((T, D), jnp.float32)
    for tap in range(k1):
        acc2 = acc2 + jnp.dot(h_scr[pl.ds(tap, T), :].astype(BF16), w2_ref[tap],
                              preferred_element_type=jnp.float32)
    y = acc2 + b2_ref[...]

    residual = xp[p0:p0 + T, :]
    res = y + residual
    mu = jnp.mean(res, axis=-1, keepdims=True)
    var = jnp.mean((res - mu) ** 2, axis=-1, keepdims=True)
    out = (res - mu) * jax.lax.rsqrt(var + eps) * g_ref[...] + beta_ref[...]

    row_idx = jax.lax.broadcasted_iota(jnp.int32, (T, 1), 0)
    o_ref[0] = out * (row_idx < L).astype(jnp.float32)


def pl_ffn_block(x, lengths, p, kernels, paddings, eps=LN_EPS):
    B, T, D = x.shape
    k0, k1 = kernels
    p0, p1 = paddings
    Fh = p['w1'].shape[-1]
    xp = jnp.pad(x.astype(F32), ((0, 0), (p0, p0), (0, 0)))
    Tp = T + 2 * p0
    grid_spec = pltpu.PrefetchScalarGridSpec(
        num_scalar_prefetch=1, grid=(B,),
        in_specs=[pl.BlockSpec((1, Tp, D), lambda b, lens: (b, 0, 0)),
                  pl.BlockSpec((k0, D, Fh), lambda b, lens: (0, 0, 0)),
                  pl.BlockSpec((1, Fh), lambda b, lens: (0, 0)),
                  pl.BlockSpec((k1, Fh, D), lambda b, lens: (0, 0, 0)),
                  pl.BlockSpec((1, D), lambda b, lens: (0, 0)),
                  pl.BlockSpec((1, D), lambda b, lens: (0, 0)),
                  pl.BlockSpec((1, D), lambda b, lens: (0, 0))],
        out_specs=pl.BlockSpec((1, T, D), lambda b, lens: (b, 0, 0)),
        scratch_shapes=[pltpu.VMEM((T + 2 * p1, Fh), jnp.float32)],
    )
    return pl.pallas_call(
        functools.partial(_ffn_block_kernel, k0=k0, p0=p0, k1=k1, p1=p1, T=T, eps=eps),
        out_shape=jax.ShapeDtypeStruct((B, T, D), F32),
        grid_spec=grid_spec,
        compiler_params=pltpu.CompilerParams(dimension_semantics=("parallel",)),
    )(lengths.astype(jnp.int32), xp, p['w1'], p['b1'], p['w2'], p['b2'],
      p['ln_g'], p['ln_b'])


# ----------------------------- predictor conv + LN + ReLU kernel -----------------------------

def _conv_ln_relu_kernel(xp_ref, w_ref, b_ref, g_ref, beta_ref, o_ref, *, k, T, eps):
    xp = xp_ref[0]                                   # [T + 2*pad, Cin]
    Fh = w_ref.shape[-1]
    acc = jnp.zeros((T, Fh), jnp.float32)
    for tap in range(k):
        acc = acc + jnp.dot(xp[tap:tap + T, :].astype(BF16), w_ref[tap],
                            preferred_element_type=jnp.float32)
    h = acc + b_ref[...]
    mu = jnp.mean(h, axis=-1, keepdims=True)
    var = jnp.mean((h - mu) ** 2, axis=-1, keepdims=True)
    y = (h - mu) * jax.lax.rsqrt(var + eps) * g_ref[...] + beta_ref[...]
    o_ref[0] = jnp.maximum(y, 0.0)


def pl_conv_ln_relu(x, w, b, g, beta, pad, eps=LN_EPS):
    B, T, Cin = x.shape
    k = w.shape[0]
    Fh = w.shape[-1]
    xp = jnp.pad(x.astype(F32), ((0, 0), (pad, pad), (0, 0)))
    Tp = T + 2 * pad
    T_out = Tp - k + 1
    return pl.pallas_call(
        functools.partial(_conv_ln_relu_kernel, k=k, T=T_out, eps=eps),
        out_shape=jax.ShapeDtypeStruct((B, T_out, Fh), F32),
        grid=(B,),
        in_specs=[pl.BlockSpec((1, Tp, Cin), lambda i: (i, 0, 0)),
                  pl.BlockSpec((k, Cin, Fh), lambda i: (0, 0, 0)),
                  pl.BlockSpec((1, Fh), lambda i: (0, 0)),
                  pl.BlockSpec((1, Fh), lambda i: (0, 0)),
                  pl.BlockSpec((1, Fh), lambda i: (0, 0))],
        out_specs=pl.BlockSpec((1, T_out, Fh), lambda i: (i, 0, 0)),
        compiler_params=pltpu.CompilerParams(dimension_semantics=("parallel",)),
    )(xp, w, b, g, beta)


# ----------------------------- model building blocks -----------------------------

def fft_block(x, lengths, p, n_head, kernels, paddings):
    h = pl_mha_block(x, lengths, p['attn'], n_head)
    h = pl_ffn_block(h, lengths, p['ffn'], kernels, paddings)
    return h


def predictor_trunk(p, x, kernel):
    pad = (kernel - 1) // 2
    h = pl_conv_ln_relu(x, p['w1'], p['b1'], p['ln1_g'], p['ln1_b'], pad)
    h = pl_conv_ln_relu(h, p['w2'], p['b2'], p['ln2_g'], p['ln2_b'], pad)
    return h


def duration_predictor_forward(p, x, kernel):
    B, T, _ = x.shape
    h = predictor_trunk(p, x, kernel)
    out = pl_linear(h.reshape(B * T, -1), p['w_out'], p['b_out'], relu=True)
    return out.reshape(B, T)


def pitch_predictor_forward(p, x, kernel):
    B, T, _ = x.shape
    h = predictor_trunk(p, x, kernel)
    pitch = pl_linear(h.reshape(B * T, -1), p['w_out'], p['b_out']).reshape(B, T)
    pooled = jnp.mean(h, axis=1)
    mean = pl_linear(pooled, p['w_mean'], p['b_mean']).reshape(-1)
    std = pl_linear(pooled, p['w_std'], p['b_std']).reshape(-1)
    return pitch, mean, std


def energy_predictor_forward(p, x, kernel):
    B, T, _ = x.shape
    h = predictor_trunk(p, x, kernel)
    return pl_linear(h.reshape(B * T, -1), p['w_out'], p['b_out']).reshape(B, T)


# ----------------------------- parameter init -----------------------------

def _w(key, shape, scale=0.1):
    return scale * jax.random.normal(key, shape, dtype=F32)


def sinusoid_table(n_position, d_hid):
    pos = np.arange(n_position, dtype=np.float64)
    i = np.arange(d_hid)
    angle = pos[:, None] / np.power(10000.0, 2 * (i // 2) / d_hid)[None, :]
    table = np.zeros((n_position, d_hid), dtype=np.float64)
    table[:, 0::2] = np.sin(angle[:, 0::2])
    table[:, 1::2] = np.cos(angle[:, 1::2])
    table[0] = 0.0
    return jnp.asarray(table, dtype=F32)


def init_fft_layer(key, d_model, filt, kernels):
    k0, k1 = kernels
    ks = jax.random.split(key, 4)
    return {
        'attn': {
            'w_qkv': _w(ks[0], (d_model, 3 * d_model)).astype(BF16),
            'b_qkv': jnp.zeros((1, 3 * d_model), F32),
            'w_o': _w(ks[1], (d_model, d_model)).astype(BF16),
            'b_o': jnp.zeros((1, d_model), F32),
            'ln_g': jnp.ones((1, d_model), F32), 'ln_b': jnp.zeros((1, d_model), F32),
        },
        'ffn': {
            'w1': _w(ks[2], (k0, d_model, filt)).astype(BF16),
            'b1': jnp.zeros((1, filt), F32),
            'w2': _w(ks[3], (k1, filt, d_model)).astype(BF16),
            'b2': jnp.zeros((1, d_model), F32),
            'ln_g': jnp.ones((1, d_model), F32), 'ln_b': jnp.zeros((1, d_model), F32),
        },
    }


def init_predictor(key, d_in, filt, kernel, extra_heads=False):
    ks = jax.random.split(key, 5)
    p = {
        'w1': _w(ks[0], (kernel, d_in, filt)).astype(BF16), 'b1': jnp.zeros((1, filt), F32),
        'ln1_g': jnp.ones((1, filt), F32), 'ln1_b': jnp.zeros((1, filt), F32),
        'w2': _w(ks[1], (kernel, filt, filt)).astype(BF16), 'b2': jnp.zeros((1, filt), F32),
        'ln2_g': jnp.ones((1, filt), F32), 'ln2_b': jnp.zeros((1, filt), F32),
        'w_out': _w(ks[2], (filt, 1)).astype(BF16), 'b_out': jnp.zeros((1, 1), F32),
    }
    if extra_heads:
        p['w_mean'] = _w(ks[3], (filt, 1)).astype(BF16)
        p['b_mean'] = jnp.zeros((1, 1), F32)
        p['w_std'] = _w(ks[4], (filt, 1)).astype(BF16)
        p['b_std'] = jnp.ones((1, 1), F32)
    return p


def init_params(key, cfg):
    d_enc, d_dec = cfg['encoder_dim'], cfg['decoder_dim']
    keys = jax.random.split(key, 10)
    word_emb = _w(keys[0], (cfg['vocab_size'], d_enc))
    word_emb = word_emb.at[cfg['pad_id']].set(0.0)
    enc_layers = [init_fft_layer(jax.random.fold_in(keys[1], i), d_enc,
                                 cfg['encoder_conv1d_filter_size'], cfg['fft_conv1d_kernel'])
                  for i in range(cfg['encoder_n_layer'])]
    dec_layers = [init_fft_layer(jax.random.fold_in(keys[2], i), d_dec,
                                 cfg['decoder_conv1d_filter_size'], cfg['fft_conv1d_kernel'])
                  for i in range(cfg['decoder_n_layer'])]
    return {
        'encoder': {'word_emb': word_emb,
                    'pos_table': sinusoid_table(cfg['max_seq_len'] + 1, d_enc),
                    'layers': enc_layers},
        'decoder': {'pos_table': sinusoid_table(cfg['max_seq_len'] + 1, d_dec),
                    'layers': dec_layers},
        'duration_predictor': init_predictor(keys[3], d_enc,
                                             cfg['duration_predictor_filter_size'],
                                             cfg['duration_predictor_kernel_size']),
        'pitch_predictor': init_predictor(keys[4], d_enc,
                                          cfg['pitch_predictor_filter_size'],
                                          cfg['pitch_predictor_kernel_size'],
                                          extra_heads=True),
        'energy_predictor': init_predictor(keys[5], d_enc,
                                           cfg['energy_predictor_filter_size'],
                                           cfg['energy_predictor_kernel_size']),
        'pitch_embed': _w(keys[6], (cfg['pitch_n_emb'], d_enc)),
        'energy_embed': _w(keys[7], (cfg['energy_n_emb'], d_enc)),
        'pitch_boundaries': jnp.linspace(cfg['min_pitch'], cfg['max_pitch'],
                                         cfg['pitch_n_emb'] + 1).reshape(1, 1, -1).astype(F32),
        'energy_boundaries': jnp.linspace(cfg['min_energy'], cfg['max_energy'],
                                          cfg['energy_n_emb'] + 1).reshape(1, 1, -1).astype(F32),
        'mel_linear': {'w': _w(keys[8], (d_dec, cfg['num_mels'])).astype(BF16),
                       'b': jnp.zeros((1, cfg['num_mels']), F32)},
    }


# ----------------------------- FastSpeech2 forward -----------------------------

def fastspeech2_forward(params, cfg, src_seq, src_pos, mel_pos=None, mel_max_length=None,
                        target_duration=None, target_pitch=None, target_pitch_mean=None,
                        target_pitch_std=None, target_energy=None,
                        alpha=1.0, beta=1.0, gamma=1.0):
    B, T = src_seq.shape
    pad_id = cfg['pad_id']
    enc_lengths = jnp.sum((src_seq != pad_id).astype(jnp.int32), axis=-1)

    # --- Encoder ---
    enc_p = params['encoder']
    h = enc_p['word_emb'][src_seq] + enc_p['pos_table'][src_pos]
    for layer in enc_p['layers']:
        h = fft_block(h, enc_lengths, layer, cfg['encoder_head'],
                      cfg['fft_conv1d_kernel'], cfg['fft_conv1d_padding'])
    enc_output = h

    # --- Length regulator (on-device duration math + gather expansion) ---
    dur_pred = duration_predictor_forward(params['duration_predictor'], enc_output,
                                          cfg['duration_predictor_kernel_size'])   # [B,T]
    if target_duration is not None:
        dur_int = target_duration.astype(jnp.int32)
    else:
        dur_int = jnp.clip(jnp.round(dur_pred * alpha), 1.0, float(DUR_MAX)).astype(jnp.int32)
        dur_int = dur_int * (src_seq != pad_id).astype(jnp.int32)

    # TODO(synk): M is a static frame cap (T*DUR_MAX or mel_max_length); the
    # true data-dependent expanded length stays on device (no host sync).
    M = T * DUR_MAX
    if mel_max_length is not None and mel_max_length > M:
        M = mel_max_length

    cum = jnp.cumsum(dur_int, axis=-1)                         # [B,T]
    totals = jnp.minimum(cum[:, -1], M).astype(jnp.int32)      # [B]
    frames = jnp.arange(M, dtype=jnp.int32)
    src_idx = jnp.sum((cum[:, None, :] <= frames[None, :, None]).astype(jnp.int32), axis=-1)
    src_idx = jnp.minimum(src_idx, T - 1)
    lr_output = jnp.take_along_axis(enc_output, src_idx[..., None], axis=1)  # [B,M,D]
    valid = (frames[None, :] < totals[:, None]).astype(F32)
    lr_output = lr_output * valid[..., None]

    ids = jnp.arange(1, M + 1, dtype=jnp.int32)[None, :]
    new_enc_pos = jnp.where(ids <= totals[:, None], ids, 0)

    # --- Pitch ---
    pitch, mean, std = pitch_predictor_forward(params['pitch_predictor'], lr_output,
                                               cfg['pitch_predictor_kernel_size'])
    if target_pitch is not None:
        new_pitch = target_pitch * target_pitch_std.reshape(-1, 1) + target_pitch_mean.reshape(-1, 1)
    else:
        new_pitch = pitch * std.reshape(-1, 1) + mean.reshape(-1, 1)
    if beta != 1.0:
        new_pitch = new_pitch + jnp.log(jnp.ones_like(new_pitch) * beta)
    pb = params['pitch_boundaries']
    pitch_ids = jnp.sum((new_pitch[..., None] >= pb).astype(jnp.int32), axis=-1) - 1
    pitch_ids = jnp.clip(pitch_ids, 0, pb.shape[-1] - 2)
    pitch_output = params['pitch_embed'][pitch_ids] * valid[..., None]

    # --- Energy ---
    energy = energy_predictor_forward(params['energy_predictor'], lr_output,
                                      cfg['energy_predictor_kernel_size'])
    new_energy = target_energy if target_energy is not None else energy
    if gamma != 1.0:
        new_energy = new_energy * gamma
    eb = params['energy_boundaries']
    energy_ids = jnp.sum((new_energy[..., None] >= eb).astype(jnp.int32), axis=-1) - 1
    energy_ids = jnp.clip(energy_ids, 0, eb.shape[-1] - 2)
    energy_output = params['energy_embed'][energy_ids] * valid[..., None]

    output = lr_output + pitch_output + energy_output

    # --- Decoder ---
    dec_p = params['decoder']
    pos_idx = jnp.clip(new_enc_pos, 0, cfg['max_seq_len'])     # guard pos-table gather
    hdec = output + dec_p['pos_table'][pos_idx]
    dec_lengths = totals
    for layer in dec_p['layers']:
        hdec = fft_block(hdec, dec_lengths, layer, cfg['decoder_head'],
                         cfg['fft_conv1d_kernel'], cfg['fft_conv1d_padding'])

    # --- Mel projection with fused output mask ---
    if target_duration is not None and mel_pos is not None:
        mask_lengths = jnp.max(mel_pos, axis=-1).astype(jnp.int32)
    else:
        mask_lengths = dec_lengths
    keep = (frames[None, :] < mask_lengths[:, None]).astype(F32)
    Dd = hdec.shape[-1]
    mel = pl_linear(hdec.reshape(B * M, Dd), params['mel_linear']['w'],
                    params['mel_linear']['b'], row_mask=keep.reshape(B * M, 1))
    dec_output = mel.reshape(B, M, -1)

    return dec_output, dur_int, pitch, mean, std, energy


# ----------------------------- main -----------------------------

if __name__ == "__main__":
    cfg = dict(
        max_seq_len=64, vocab_size=30,
        encoder_n_layer=2, encoder_dim=32, encoder_head=2, encoder_conv1d_filter_size=64,
        decoder_n_layer=2, decoder_dim=32, decoder_head=2, decoder_conv1d_filter_size=64,
        pad_id=0, fft_conv1d_kernel=(9, 1), fft_conv1d_padding=(4, 0), dropout=0.1,
        duration_predictor_filter_size=64, duration_predictor_kernel_size=3,
        pitch_predictor_filter_size=64, pitch_predictor_kernel_size=3,
        pitch_n_emb=16, min_pitch=-4.0, max_pitch=4.0,
        energy_predictor_filter_size=64, energy_predictor_kernel_size=3,
        energy_n_emb=16, min_energy=-4.0, max_energy=4.0,
        num_mels=16,
    )
    key = jax.random.PRNGKey(0)
    pkey, dkey = jax.random.split(key)
    params = init_params(pkey, cfg)

    B, T = 2, 8
    lengths = np.array([8, 6])
    src_seq = np.array(jax.random.randint(dkey, (B, T), 1, cfg['vocab_size']), dtype=np.int32)
    src_pos = np.zeros((B, T), dtype=np.int32)
    for bi in range(B):
        src_seq[bi, lengths[bi]:] = cfg['pad_id']
        src_pos[bi, :lengths[bi]] = np.arange(1, lengths[bi] + 1)
    src_seq = jnp.asarray(src_seq)
    src_pos = jnp.asarray(src_pos)

    # whole forward is now jit-able end-to-end (no host-side duration math)
    fwd = jax.jit(lambda p, s, sp: fastspeech2_forward(p, cfg, s, sp))
    outs = fwd(params, src_seq, src_pos)
    dec_output = jax.block_until_ready(outs[0])

    assert dec_output.shape[0] == B and dec_output.shape[-1] == cfg['num_mels']
    assert np.all(np.isfinite(np.array(dec_output)))
    print("KERNEL_OK")
</pallas_src>

<mosaic_0001>
module attributes {stable_mosaic.version = 11 : i64} {
  func.func @_mha_block_kernel(%arg0: i32, %arg1: memref<2xi32, #tpu.memory_space<smem>>, %arg2: memref<1x8x32xf32, #tpu.memory_space<vmem>>, %arg3: memref<32x96xbf16, #tpu.memory_space<vmem>>, %arg4: memref<1x96xf32, #tpu.memory_space<vmem>>, %arg5: memref<32x32xbf16, #tpu.memory_space<vmem>>, %arg6: memref<1x32xf32, #tpu.memory_space<vmem>>, %arg7: memref<1x32xf32, #tpu.memory_space<vmem>>, %arg8: memref<1x32xf32, #tpu.memory_space<vmem>>, %arg9: memref<1x8x32xf32, #tpu.memory_space<vmem>>) attributes {dimension_semantics = [#tpu.dimension_semantics<parallel>], iteration_bounds = array<i64: 2>, scalar_prefetch = 1 : i64, scratch_operands = 0 : i64, tpu.core_type = #tpu.core_type<tc>, window_params = [{transform_indices = @transform_0, window_bounds = array<i64: 1, 8, 32>}, {pipeline_mode = #tpu.pipeline_mode<synchronous>, transform_indices = @transform_1, window_bounds = array<i64: 32, 96>}, {pipeline_mode = #tpu.pipeline_mode<synchronous>, transform_indices = @transform_2, window_bounds = array<i64: 1, 96>}, {pipeline_mode = #tpu.pipeline_mode<synchronous>, transform_indices = @transform_3, window_bounds = array<i64: 32, 32>}, {pipeline_mode = #tpu.pipeline_mode<synchronous>, transform_indices = @transform_4, window_bounds = array<i64: 1, 32>}, {pipeline_mode = #tpu.pipeline_mode<synchronous>, transform_indices = @transform_5, window_bounds = array<i64: 1, 32>}, {pipeline_mode = #tpu.pipeline_mode<synchronous>, transform_indices = @transform_6, window_bounds = array<i64: 1, 32>}, {transform_indices = @transform_7, window_bounds = array<i64: 1, 8, 32>}]} {
    %0 = arith.index_cast %arg0 : i32 to index
    %1 = memref.load %arg1[%0] : memref<2xi32, #tpu.memory_space<smem>>
    %c0 = arith.constant 0 : index
    %c0_0 = arith.constant 0 : index
    %c0_1 = arith.constant 0 : index
    %2 = vector.load %arg2[%c0, %c0_0, %c0_1] : memref<1x8x32xf32, #tpu.memory_space<vmem>>, vector<1x8x32xf32>
    %3 = vector.shape_cast %2 : vector<1x8x32xf32> to vector<8x32xf32>
    %4 = arith.truncf %3 : vector<8x32xf32> to vector<8x32xbf16>
    %c0_2 = arith.constant 0 : index
    %c0_3 = arith.constant 0 : index
    %5 = vector.load %arg3[%c0_2, %c0_3] : memref<32x96xbf16, #tpu.memory_space<vmem>>, vector<32x96xbf16>
    %cst = arith.constant dense<0.000000e+00> : vector<8x96xf32>
    %6 = tpu.matmul %4, %5, %cst {dimension_numbers = #tpu.dot_dimension_numbers<[1], [0], [0], [1], [0, 0, 1, 1], [], []>} : vector<8x32xbf16>, vector<32x96xbf16>, vector<8x96xf32> -> vector<8x96xf32>
    %c0_4 = arith.constant 0 : index
    %c0_5 = arith.constant 0 : index
    %7 = vector.load %arg4[%c0_4, %c0_5] : memref<1x96xf32, #tpu.memory_space<vmem>>, vector<1x96xf32>
    %8 = vector.broadcast %7 : vector<1x96xf32> to vector<8x96xf32>
    %9 = arith.addf %6, %8 : vector<8x96xf32>
    %10 = vector.extract_strided_slice %9 {offsets = [0, 0], sizes = [8, 32], strides = [1, 1]} : vector<8x96xf32> to vector<8x32xf32>
    %11 = vector.extract_strided_slice %9 {offsets = [0, 32], sizes = [8, 32], strides = [1, 1]} : vector<8x96xf32> to vector<8x32xf32>
    %12 = vector.extract_strided_slice %9 {offsets = [0, 64], sizes = [8, 32], strides = [1, 1]} : vector<8x96xf32> to vector<8x32xf32>
    %13 = tpu.iota {dimensions = array<i32: 1>} : vector<8x8xi32>
    %14 = vector.broadcast %1 : i32 to vector<8x8xi32>
    %15 = arith.cmpi slt, %13, %14 : vector<8x8xi32>
    %cst_6 = arith.constant 0.000000e+00 : f32
    %cst_7 = arith.constant -1.000000e+09 : f32
    %16 = vector.broadcast %cst_6 : f32 to vector<8x8xf32>
    %17 = vector.broadcast %cst_7 : f32 to vector<8x8xf32>
    %18 = arith.select %15, %16, %17 : vector<8x8xi1>, vector<8x8xf32>
    %19 = vector.extract_strided_slice %10 {offsets = [0, 0], sizes = [8, 16], strides = [1, 1]} : vector<8x32xf32> to vector<8x16xf32>
    %20 = arith.truncf %19 : vector<8x16xf32> to vector<8x16xbf16>
    %21 = vector.extract_strided_slice %11 {offsets = [0, 0], sizes = [8, 16], strides = [1, 1]} : vector<8x32xf32> to vector<8x16xf32>
    %22 = arith.truncf %21 : vector<8x16xf32> to vector<8x16xbf16>
    %23 = vector.extract_strided_slice %12 {offsets = [0, 0], sizes = [8, 16], strides = [1, 1]} : vector<8x32xf32> to vector<8x16xf32>
    %24 = arith.truncf %23 : vector<8x16xf32> to vector<8x16xbf16>
    %cst_8 = arith.constant dense<0.000000e+00> : vector<8x8xf32>
    %25 = tpu.matmul %20, %22, %cst_8 {dimension_numbers = #tpu.dot_dimension_numbers<[1], [1], [0], [0], [0, 0, 1, 0], [], []>} : vector<8x16xbf16>, vector<8x16xbf16>, vector<8x8xf32> -> vector<8x8xf32>
    %cst_9 = arith.constant 2.500000e-01 : f32
    %26 = vector.broadcast %cst_9 : f32 to vector<8x8xf32>
    %27 = arith.mulf %25, %26 : vector<8x8xf32>
    %28 = arith.addf %27, %18 : vector<8x8xf32>
    %cst_10 = arith.constant dense<0xFF800000> : vector<8xf32>
    %29 = vector.multi_reduction <maximumf>, %28, %cst_10 [1] : vector<8x8xf32> to vector<8xf32>
    %30 = vector.shape_cast %29 : vector<8xf32> to vector<8x1xf32>
    %31 = vector.broadcast %30 : vector<8x1xf32> to vector<8x8xf32>
    %32 = arith.subf %28, %31 : vector<8x8xf32>
    %33 = math.exp %32 : vector<8x8xf32>
    %cst_11 = arith.constant dense<0.000000e+00> : vector<8xf32>
    %34 = vector.multi_reduction <add>, %33, %cst_11 [1] : vector<8x8xf32> to vector<8xf32>
    %35 = vector.shape_cast %34 : vector<8xf32> to vector<8x1xf32>
    %36 = tpu.reciprocal %35 {approx = true} : vector<8x1xf32> -> vector<8x1xf32>
    %37 = vector.broadcast %36 : vector<8x1xf32> to vector<8x8xf32>
    %38 = arith.mulf %33, %37 : vector<8x8xf32>
    %39 = arith.truncf %38 : vector<8x8xf32> to vector<8x8xbf16>
    %cst_12 = arith.constant dense<0.000000e+00> : vector<8x16xf32>
    %40 = tpu.matmul %39, %24, %cst_12 {dimension_numbers = #tpu.dot_dimension_numbers<[1], [0], [0], [1], [0, 0, 1, 1], [], []>} : vector<8x8xbf16>, vector<8x16xbf16>, vector<8x16xf32> -> vector<8x16xf32>
    %41 = vector.extract_strided_slice %10 {offsets = [0, 16], sizes = [8, 16], strides = [1, 1]} : vector<8x32xf32> to vector<8x16xf32>
    %42 = arith.truncf %41 : vector<8x16xf32> to vector<8x16xbf16>
    %43 = vector.extract_strided_slice %11 {offsets = [0, 16], sizes = [8, 16], strides = [1, 1]} : vector<8x32xf32> to vector<8x16xf32>
    %44 = arith.truncf %43 : vector<8x16xf32> to vector<8x16xbf16>
    %45 = vector.extract_strided_slice %12 {offsets = [0, 16], sizes = [8, 16], strides = [1, 1]} : vector<8x32xf32> to vector<8x16xf32>
    %46 = arith.truncf %45 : vector<8x16xf32> to vector<8x16xbf16>
    %cst_13 = arith.constant dense<0.000000e+00> : vector<8x8xf32>
    %47 = tpu.matmul %42, %44, %cst_13 {dimension_numbers = #tpu.dot_dimension_numbers<[1], [1], [0], [0], [0, 0, 1, 0], [], []>} : vector<8x16xbf16>, vector<8x16xbf16>, vector<8x8xf32> -> vector<8x8xf32>
    %cst_14 = arith.constant 2.500000e-01 : f32
    %48 = vector.broadcast %cst_14 : f32 to vector<8x8xf32>
    %49 = arith.mulf %47, %48 : vector<8x8xf32>
    %50 = arith.addf %49, %18 : vector<8x8xf32>
    %cst_15 = arith.constant dense<0xFF800000> : vector<8xf32>
    %51 = vector.multi_reduction <maximumf>, %50, %cst_15 [1] : vector<8x8xf32> to vector<8xf32>
    %52 = vector.shape_cast %51 : vector<8xf32> to vector<8x1xf32>
    %53 = vector.broadcast %52 : vector<8x1xf32> to vector<8x8xf32>
    %54 = arith.subf %50, %53 : vector<8x8xf32>
    %55 = math.exp %54 : vector<8x8xf32>
    %cst_16 = arith.constant dense<0.000000e+00> : vector<8xf32>
    %56 = vector.multi_reduction <add>, %55, %cst_16 [1] : vector<8x8xf32> to vector<8xf32>
    %57 = vector.shape_cast %56 : vector<8xf32> to vector<8x1xf32>
    %58 = tpu.reciprocal %57 {approx = true} : vector<8x1xf32> -> vector<8x1xf32>
    %59 = vector.broadcast %58 : vector<8x1xf32> to vector<8x8xf32>
    %60 = arith.mulf %55, %59 : vector<8x8xf32>
    %61 = arith.truncf %60 : vector<8x8xf32> to vector<8x8xbf16>
    %cst_17 = arith.constant dense<0.000000e+00> : vector<8x16xf32>
    %62 = tpu.matmul %61, %46, %cst_17 {dimension_numbers = #tpu.dot_dimension_numbers<[1], [0], [0], [1], [0, 0, 1, 1], [], []>} : vector<8x8xbf16>, vector<8x16xbf16>, vector<8x16xf32> -> vector<8x16xf32>
    %63 = tpu.concatenate %40, %62 in 1 : vector<8x16xf32>, vector<8x16xf32> -> vector<8x32xf32>
    %64 = arith.truncf %63 : vector<8x32xf32> to vector<8x32xbf16>
    %c0_18 = arith.constant 0 : index
    %c0_19 = arith.constant 0 : index
    %65 = vector.load %arg5[%c0_18, %c0_19] : memref<32x32xbf16, #tpu.memory_space<vmem>>, vector<32x32xbf16>
    %cst_20 = arith.constant dense<0.000000e+00> : vector<8x32xf32>
    %66 = tpu.matmul %64, %65, %cst_20 {dimension_numbers = #tpu.dot_dimension_numbers<[1], [0], [0], [1], [0, 0, 1, 1], [], []>} : vector<8x32xbf16>, vector<32x32xbf16>, vector<8x32xf32> -> vector<8x32xf32>
    %c0_21 = arith.constant 0 : index
    %c0_22 = arith.constant 0 : index
    %67 = vector.load %arg6[%c0_21, %c0_22] : memref<1x32xf32, #tpu.memory_space<vmem>>, vector<1x32xf32>
    %68 = vector.broadcast %67 : vector<1x32xf32> to vector<8x32xf32>
    %69 = arith.addf %66, %68 : vector<8x32xf32>
    %70 = arith.addf %69, %3 : vector<8x32xf32>
    %cst_23 = arith.constant dense<0.000000e+00> : vector<8xf32>
    %71 = vector.multi_reduction <add>, %70, %cst_23 [1] : vector<8x32xf32> to vector<8xf32>
    %72 = vector.shape_cast %71 : vector<8xf32> to vector<8x1xf32>
    %cst_24 = arith.constant 3.200000e+01 : f32
    %73 = vector.broadcast %cst_24 : f32 to vector<8x1xf32>
    %74 = arith.divf %72, %73 : vector<8x1xf32>
    %75 = vector.broadcast %74 : vector<8x1xf32> to vector<8x32xf32>
    %76 = arith.subf %70, %75 : vector<8x32xf32>
    %77 = arith.mulf %76, %76 : vector<8x32xf32>
    %cst_25 = arith.constant dense<0.000000e+00> : vector<8xf32>
    %78 = vector.multi_reduction <add>, %77, %cst_25 [1] : vector<8x32xf32> to vector<8xf32>
    %79 = vector.shape_cast %78 : vector<8xf32> to vector<8x1xf32>
    %cst_26 = arith.constant 3.200000e+01 : f32
    %80 = vector.broadcast %cst_26 : f32 to vector<8x1xf32>
    %81 = arith.divf %79, %80 : vector<8x1xf32>
    %82 = vector.broadcast %74 : vector<8x1xf32> to vector<8x32xf32>
    %83 = arith.subf %70, %82 : vector<8x32xf32>
    %cst_27 = arith.constant 9.99999974E-6 : f32
    %84 = vector.broadcast %cst_27 : f32 to vector<8x1xf32>
    %85 = arith.addf %81, %84 : vector<8x1xf32>
    %86 = math.rsqrt %85 : vector<8x1xf32>
    %87 = vector.broadcast %86 : vector<8x1xf32> to vector<8x32xf32>
    %88 = arith.mulf %83, %87 : vector<8x32xf32>
    %c0_28 = arith.constant 0 : index
    %c0_29 = arith.constant 0 : index
    %89 = vector.load %arg7[%c0_28, %c0_29] : memref<1x32xf32, #tpu.memory_space<vmem>>, vector<1x32xf32>
    %90 = vector.broadcast %89 : vector<1x32xf32> to vector<8x32xf32>
    %91 = arith.mulf %88, %90 : vector<8x32xf32>
    %c0_30 = arith.constant 0 : index
    %c0_31 = arith.constant 0 : index
    %92 = vector.load %arg8[%c0_30, %c0_31] : memref<1x32xf32, #tpu.memory_space<vmem>>, vector<1x32xf32>
    %93 = vector.broadcast %92 : vector<1x32xf32> to vector<8x32xf32>
    %94 = arith.addf %91, %93 : vector<8x32xf32>
    %95 = tpu.iota {dimensions = array<i32: 0>} : vector<8x1xi32>
    %96 = vector.broadcast %1 : i32 to vector<8x1xi32>
    %97 = arith.cmpi slt, %95, %96 : vector<8x1xi32>
    %98 = arith.extui %97 : vector<8x1xi1> to vector<8x1xi32>
    %99 = arith.sitofp %98 : vector<8x1xi32> to vector<8x1xf32>
    %100 = vector.broadcast %99 : vector<8x1xf32> to vector<8x32xf32>
    %101 = arith.mulf %94, %100 : vector<8x32xf32>
    %c0_32 = arith.constant 0 : index
    %c0_33 = arith.constant 0 : index
    %c0_34 = arith.constant 0 : index
    %102 = vector.load %arg9[%c0_32, %c0_33, %c0_34] : memref<1x8x32xf32, #tpu.memory_space<vmem>>, vector<1x8x32xf32>
    %103 = vector.shape_cast %102 : vector<1x8x32xf32> to vector<8x32xf32>
    %104 = vector.shape_cast %101 : vector<8x32xf32> to vector<1x8x32xf32>
    tpu.vector_store %arg9[%c0_32, %c0_33, %c0_34], %104 {strides = array<i32>} : memref<1x8x32xf32, #tpu.memory_space<vmem>>, vector<1x8x32xf32>,
    return
  }
  func.func @transform_0(%arg0: i32, %arg1: memref<2xi32, #tpu.memory_space<smem>>) -> (i32, i32, i32) {
    %c0_i32 = arith.constant 0 : i32
    %c0_i32_0 = arith.constant 0 : i32
    %c0_i32_1 = arith.constant 0 : i32
    return %arg0, %c0_i32, %c0_i32_0 : i32, i32, i32
  }
  func.func @transform_1(%arg0: i32, %arg1: memref<2xi32, #tpu.memory_space<smem>>) -> (i32, i32) {
    %c0_i32 = arith.constant 0 : i32
    %c0_i32_0 = arith.constant 0 : i32
    %c0_i32_1 = arith.constant 0 : i32
    return %c0_i32, %c0_i32_0 : i32, i32
  }
  func.func @transform_2(%arg0: i32, %arg1: memref<2xi32, #tpu.memory_space<smem>>) -> (i32, i32) {
    %c0_i32 = arith.constant 0 : i32
    %c0_i32_0 = arith.constant 0 : i32
    %c0_i32_1 = arith.constant 0 : i32
    return %c0_i32, %c0_i32_0 : i32, i32
  }
  func.func @transform_3(%arg0: i32, %arg1: memref<2xi32, #tpu.memory_space<smem>>) -> (i32, i32) {
    %c0_i32 = arith.constant 0 : i32
    %c0_i32_0 = arith.constant 0 : i32
    %c0_i32_1 = arith.constant 0 : i32
    return %c0_i32, %c0_i32_0 : i32, i32
  }
  func.func @transform_4(%arg0: i32, %arg1: memref<2xi32, #tpu.memory_space<smem>>) -> (i32, i32) {
    %c0_i32 = arith.constant 0 : i32
    %c0_i32_0 = arith.constant 0 : i32
    %c0_i32_1 = arith.constant 0 : i32
    return %c0_i32, %c0_i32_0 : i32, i32
  }
  func.func @transform_5(%arg0: i32, %arg1: memref<2xi32, #tpu.memory_space<smem>>) -> (i32, i32) {
    %c0_i32 = arith.constant 0 : i32
    %c0_i32_0 = arith.constant 0 : i32
    %c0_i32_1 = arith.constant 0 : i32
    return %c0_i32, %c0_i32_0 : i32, i32
  }
  func.func @transform_6(%arg0: i32, %arg1: memref<2xi32, #tpu.memory_space<smem>>) -> (i32, i32) {
    %c0_i32 = arith.constant 0 : i32
    %c0_i32_0 = arith.constant 0 : i32
    %c0_i32_1 = arith.constant 0 : i32
    return %c0_i32, %c0_i32_0 : i32, i32
  }
  func.func @transform_7(%arg0: i32, %arg1: memref<2xi32, #tpu.memory_space<smem>>) -> (i32, i32, i32) {
    %c0_i32 = arith.constant 0 : i32
    %c0_i32_0 = arith.constant 0 : i32
    %c0_i32_1 = arith.constant 0 : i32
    return %arg0, %c0_i32, %c0_i32_0 : i32, i32, i32
  }
}

module attributes {stable_mosaic.version = 11 : i64} {
  func.func @_ffn_block_kernel(%arg0: i32, %arg1: memref<2xi32, #tpu.memory_space<smem>>, %arg2: memref<1x16x32xf32, #tpu.memory_space<vmem>>, %arg3: memref<9x32x64xbf16, #tpu.memory_space<vmem>>, %arg4: memref<1x64xf32, #tpu.memory_space<vmem>>, %arg5: memref<1x64x32xbf16, #tpu.memory_space<vmem>>, %arg6: memref<1x32xf32, #tpu.memory_space<vmem>>, %arg7: memref<1x32xf32, #tpu.memory_space<vmem>>, %arg8: memref<1x32xf32, #tpu.memory_space<vmem>>, %arg9: memref<1x8x32xf32, #tpu.memory_space<vmem>>, %arg10: memref<8x64xf32, #tpu.memory_space<vmem>>) attributes {dimension_semantics = [#tpu.dimension_semantics<parallel>], iteration_bounds = array<i64: 2>, scalar_prefetch = 1 : i64, scratch_operands = 1 : i64, tpu.core_type = #tpu.core_type<tc>, window_params = [{transform_indices = @transform_0, window_bounds = array<i64: 1, 16, 32>}, {pipeline_mode = #tpu.pipeline_mode<synchronous>, transform_indices = @transform_1, window_bounds = array<i64: 9, 32, 64>}, {pipeline_mode = #tpu.pipeline_mode<synchronous>, transform_indices = @transform_2, window_bounds = array<i64: 1, 64>}, {pipeline_mode = #tpu.pipeline_mode<synchronous>, transform_indices = @transform_3, window_bounds = array<i64: 1, 64, 32>}, {pipeline_mode = #tpu.pipeline_mode<synchronous>, transform_indices = @transform_4, window_bounds = array<i64: 1, 32>}, {pipeline_mode = #tpu.pipeline_mode<synchronous>, transform_indices = @transform_5, window_bounds = array<i64: 1, 32>}, {pipeline_mode = #tpu.pipeline_mode<synchronous>, transform_indices = @transform_6, window_bounds = array<i64: 1, 32>}, {transform_indices = @transform_7, window_bounds = array<i64: 1, 8, 32>}]} {
    %0 = arith.index_cast %arg0 : i32 to index
    %1 = memref.load %arg1[%0] : memref<2xi32, #tpu.memory_space<smem>>
    %c0 = arith.constant 0 : index
    %c0_0 = arith.constant 0 : index
    %c0_1 = arith.constant 0 : index
    %2 = vector.load %arg2[%c0, %c0_0, %c0_1] : memref<1x16x32xf32, #tpu.memory_space<vmem>>, vector<1x16x32xf32>
    %3 = vector.shape_cast %2 : vector<1x16x32xf32> to vector<16x32xf32>
    %cst = arith.constant 0.000000e+00 : f32
    %4 = vector.broadcast %cst : f32 to vector<8x64xf32>
    %5 = vector.extract_strided_slice %3 {offsets = [0, 0], sizes = [8, 32], strides = [1, 1]} : vector<16x32xf32> to vector<8x32xf32>
    %6 = arith.truncf %5 : vector<8x32xf32> to vector<8x32xbf16>
    %c0_2 = arith.constant 0 : index
    %c0_3 = arith.constant 0 : index
    %c0_4 = arith.constant 0 : index
    %7 = vector.load %arg3[%c0_2, %c0_3, %c0_4] : memref<9x32x64xbf16, #tpu.memory_space<vmem>>, vector<1x32x64xbf16>
    %8 = vector.shape_cast %7 : vector<1x32x64xbf16> to vector<32x64xbf16>
    %cst_5 = arith.constant dense<0.000000e+00> : vector<8x64xf32>
    %9 = tpu.matmul %6, %8, %cst_5 {dimension_numbers = #tpu.dot_dimension_numbers<[1], [0], [0], [1], [0, 0, 1, 1], [], []>} : vector<8x32xbf16>, vector<32x64xbf16>, vector<8x64xf32> -> vector<8x64xf32>
    %10 = arith.addf %4, %9 : vector<8x64xf32>
    %11 = vector.extract_strided_slice %3 {offsets = [1, 0], sizes = [8, 32], strides = [1, 1]} : vector<16x32xf32> to vector<8x32xf32>
    %12 = arith.truncf %11 : vector<8x32xf32> to vector<8x32xbf16>
    %c1 = arith.constant 1 : index
    %c0_6 = arith.constant 0 : index
    %c0_7 = arith.constant 0 : index
    %13 = vector.load %arg3[%c1, %c0_6, %c0_7] : memref<9x32x64xbf16, #tpu.memory_space<vmem>>, vector<1x32x64xbf16>
    %14 = vector.shape_cast %13 : vector<1x32x64xbf16> to vector<32x64xbf16>
    %cst_8 = arith.constant dense<0.000000e+00> : vector<8x64xf32>
    %15 = tpu.matmul %12, %14, %cst_8 {dimension_numbers = #tpu.dot_dimension_numbers<[1], [0], [0], [1], [0, 0, 1, 1], [], []>} : vector<8x32xbf16>, vector<32x64xbf16>, vector<8x64xf32> -> vector<8x64xf32>
    %16 = arith.addf %10, %15 : vector<8x64xf32>
    %17 = vector.extract_strided_slice %3 {offsets = [2, 0], sizes = [8, 32], strides = [1, 1]} : vector<16x32xf32> to vector<8x32xf32>
    %18 = arith.truncf %17 : vector<8x32xf32> to vector<8x32xbf16>
    %c2 = arith.constant 2 : index
    %c0_9 = arith.constant 0 : index
    %c0_10 = arith.constant 0 : index
    %19 = vector.load %arg3[%c2, %c0_9, %c0_10] : memref<9x32x64xbf16, #tpu.memory_space<vmem>>, vector<1x32x64xbf16>
    %20 = vector.shape_cast %19 : vector<1x32x64xbf16> to vector<32x64xbf16>
    %cst_11 = arith.constant dense<0.000000e+00> : vector<8x64xf32>
    %21 = tpu.matmul %18, %20, %cst_11 {dimension_numbers = #tpu.dot_dimension_numbers<[1], [0], [0], [1], [0, 0, 1, 1], [], []>} : vector<8x32xbf16>, vector<32x64xbf16>, vector<8x64xf32> -> vector<8x64xf32>
    %22 = arith.addf %16, %21 : vector<8x64xf32>
    %23 = vector.extract_strided_slice %3 {offsets = [3, 0], sizes = [8, 32], strides = [1, 1]} : vector<16x32xf32> to vector<8x32xf32>
    %24 = arith.truncf %23 : vector<8x32xf32> to vector<8x32xbf16>
    %c3 = arith.constant 3 : index
    %c0_12 = arith.constant 0 : index
    %c0_13 = arith.constant 0 : index
    %25 = vector.load %arg3[%c3, %c0_12, %c0_13] : memref<9x32x64xbf16, #tpu.memory_space<vmem>>, vector<1x32x64xbf16>
    %26 = vector.shape_cast %25 : vector<1x32x64xbf16> to vector<32x64xbf16>
    %cst_14 = arith.constant dense<0.000000e+00> : vector<8x64xf32>
    %27 = tpu.matmul %24, %26, %cst_14 {dimension_numbers = #tpu.dot_dimension_numbers<[1], [0], [0], [1], [0, 0, 1, 1], [], []>} : vector<8x32xbf16>, vector<32x64xbf16>, vector<8x64xf32> -> vector<8x64xf32>
    %28 = arith.addf %22, %27 : vector<8x64xf32>
    %29 = vector.extract_strided_slice %3 {offsets = [4, 0], sizes = [8, 32], strides = [1, 1]} : vector<16x32xf32> to vector<8x32xf32>
    %30 = arith.truncf %29 : vector<8x32xf32> to vector<8x32xbf16>
    %c4 = arith.constant 4 : index
    %c0_15 = arith.constant 0 : index
    %c0_16 = arith.constant 0 : index
    %31 = vector.load %arg3[%c4, %c0_15, %c0_16] : memref<9x32x64xbf16, #tpu.memory_space<vmem>>, vector<1x32x64xbf16>
    %32 = vector.shape_cast %31 : vector<1x32x64xbf16> to vector<32x64xbf16>
    %cst_17 = arith.constant dense<0.000000e+00> : vector<8x64xf32>
    %33 = tpu.matmul %30, %32, %cst_17 {dimension_numbers = #tpu.dot_dimension_numbers<[1], [0], [0], [1], [0, 0, 1, 1], [], []>} : vector<8x32xbf16>, vector<32x64xbf16>, vector<8x64xf32> -> vector<8x64xf32>
    %34 = arith.addf %28, %33 : vector<8x64xf32>
    %35 = vector.extract_strided_slice %3 {offsets = [5, 0], sizes = [8, 32], strides = [1, 1]} : vector<16x32xf32> to vector<8x32xf32>
    %36 = arith.truncf %35 : vector<8x32xf32> to vector<8x32xbf16>
    %c5 = arith.constant 5 : index
    %c0_18 = arith.constant 0 : index
    %c0_19 = arith.constant 0 : index
    %37 = vector.load %arg3[%c5, %c0_18, %c0_19] : memref<9x32x64xbf16, #tpu.memory_space<vmem>>, vector<1x32x64xbf16>
    %38 = vector.shape_cast %37 : vector<1x32x64xbf16> to vector<32x64xbf16>
    %cst_20 = arith.constant dense<0.000000e+00> : vector<8x64xf32>
    %39 = tpu.matmul %36, %38, %cst_20 {dimension_numbers = #tpu.dot_dimension_numbers<[1], [0], [0], [1], [0, 0, 1, 1], [], []>} : vector<8x32xbf16>, vector<32x64xbf16>, vector<8x64xf32> -> vector<8x64xf32>
    %40 = arith.addf %34, %39 : vector<8x64xf32>
    %41 = vector.extract_strided_slice %3 {offsets = [6, 0], sizes = [8, 32], strides = [1, 1]} : vector<16x32xf32> to vector<8x32xf32>
    %42 = arith.truncf %41 : vector<8x32xf32> to vector<8x32xbf16>
    %c6 = arith.constant 6 : index
    %c0_21 = arith.constant 0 : index
    %c0_22 = arith.constant 0 : index
    %43 = vector.load %arg3[%c6, %c0_21, %c0_22] : memref<9x32x64xbf16, #tpu.memory_space<vmem>>, vector<1x32x64xbf16>
    %44 = vector.shape_cast %43 : vector<1x32x64xbf16> to vector<32x64xbf16>
    %cst_23 = arith.constant dense<0.000000e+00> : vector<8x64xf32>
    %45 = tpu.matmul %42, %44, %cst_23 {dimension_numbers = #tpu.dot_dimension_numbers<[1], [0], [0], [1], [0, 0, 1, 1], [], []>} : vector<8x32xbf16>, vector<32x64xbf16>, vector<8x64xf32> -> vector<8x64xf32>
    %46 = arith.addf %40, %45 : vector<8x64xf32>
    %47 = vector.extract_strided_slice %3 {offsets = [7, 0], sizes = [8, 32], strides = [1, 1]} : vector<16x32xf32> to vector<8x32xf32>
    %48 = arith.truncf %47 : vector<8x32xf32> to vector<8x32xbf16>
    %c7 = arith.constant 7 : index
    %c0_24 = arith.constant 0 : index
    %c0_25 = arith.constant 0 : index
    %49 = vector.load %arg3[%c7, %c0_24, %c0_25] : memref<9x32x64xbf16, #tpu.memory_space<vmem>>, vector<1x32x64xbf16>
    %50 = vector.shape_cast %49 : vector<1x32x64xbf16> to vector<32x64xbf16>
    %cst_26 = arith.constant dense<0.000000e+00> : vector<8x64xf32>
    %51 = tpu.matmul %48, %50, %cst_26 {dimension_numbers = #tpu.dot_dimension_numbers<[1], [0], [0], [1], [0, 0, 1, 1], [], []>} : vector<8x32xbf16>, vector<32x64xbf16>, vector<8x64xf32> -> vector<8x64xf32>
    %52 = arith.addf %46, %51 : vector<8x64xf32>
    %53 = vector.extract_strided_slice %3 {offsets = [8, 0], sizes = [8, 32], strides = [1, 1]} : vector<16x32xf32> to vector<8x32xf32>
    %54 = arith.truncf %53 : vector<8x32xf32> to vector<8x32xbf16>
    %c8 = arith.constant 8 : index
    %c0_27 = arith.constant 0 : index
    %c0_28 = arith.constant 0 : index
    %55 = vector.load %arg3[%c8, %c0_27, %c0_28] : memref<9x32x64xbf16, #tpu.memory_space<vmem>>, vector<1x32x64xbf16>
    %56 = vector.shape_cast %55 : vector<1x32x64xbf16> to vector<32x64xbf16>
    %cst_29 = arith.constant dense<0.000000e+00> : vector<8x64xf32>
    %57 = tpu.matmul %54, %56, %cst_29 {dimension_numbers = #tpu.dot_dimension_numbers<[1], [0], [0], [1], [0, 0, 1, 1], [], []>} : vector<8x32xbf16>, vector<32x64xbf16>, vector<8x64xf32> -> vector<8x64xf32>
    %58 = arith.addf %52, %57 : vector<8x64xf32>
    %c0_30 = arith.constant 0 : index
    %c0_31 = arith.constant 0 : index
    %59 = vector.load %arg4[%c0_30, %c0_31] : memref<1x64xf32, #tpu.memory_space<vmem>>, vector<1x64xf32>
    %60 = vector.broadcast %59 : vector<1x64xf32> to vector<8x64xf32>
    %61 = arith.addf %58, %60 : vector<8x64xf32>
    %cst_32 = arith.constant 0.000000e+00 : f32
    %62 = vector.broadcast %cst_32 : f32 to vector<8x64xf32>
    %63 = arith.maximumf %61, %62 : vector<8x64xf32>
    %c0_33 = arith.constant 0 : index
    %c0_34 = arith.constant 0 : index
    %64 = vector.load %arg10[%c0_33, %c0_34] : memref<8x64xf32, #tpu.memory_space<vmem>>, vector<8x64xf32>
    tpu.vector_store %arg10[%c0_33, %c0_34], %63 {strides = array<i32>} : memref<8x64xf32, #tpu.memory_space<vmem>>, vector<8x64xf32>,
    %cst_35 = arith.constant 0.000000e+00 : f32
    %65 = vector.broadcast %cst_35 : f32 to vector<8x32xf32>
    %c0_36 = arith.constant 0 : index
    %c0_37 = arith.constant 0 : index
    %66 = vector.load %arg10[%c0_36, %c0_37] : memref<8x64xf32, #tpu.memory_space<vmem>>, vector<8x64xf32>
    %67 = arith.truncf %66 : vector<8x64xf32> to vector<8x64xbf16>
    %c0_38 = arith.constant 0 : index
    %c0_39 = arith.constant 0 : index
    %c0_40 = arith.constant 0 : index
    %68 = vector.load %arg5[%c0_38, %c0_39, %c0_40] : memref<1x64x32xbf16, #tpu.memory_space<vmem>>, vector<1x64x32xbf16>
    %69 = vector.shape_cast %68 : vector<1x64x32xbf16> to vector<64x32xbf16>
    %cst_41 = arith.constant dense<0.000000e+00> : vector<8x32xf32>
    %70 = tpu.matmul %67, %69, %cst_41 {dimension_numbers = #tpu.dot_dimension_numbers<[1], [0], [0], [1], [0, 0, 1, 1], [], []>} : vector<8x64xbf16>, vector<64x32xbf16>, vector<8x32xf32> -> vector<8x32xf32>
    %71 = arith.addf %65, %70 : vector<8x32xf32>
    %c0_42 = arith.constant 0 : index
    %c0_43 = arith.constant 0 : index
    %72 = vector.load %arg6[%c0_42, %c0_43] : memref<1x32xf32, #tpu.memory_space<vmem>>, vector<1x32xf32>
    %73 = vector.broadcast %72 : vector<1x32xf32> to vector<8x32xf32>
    %74 = arith.addf %71, %73 : vector<8x32xf32>
    %75 = vector.extract_strided_slice %3 {offsets = [4, 0], sizes = [8, 32], strides = [1, 1]} : vector<16x32xf32> to vector<8x32xf32>
    %76 = arith.addf %74, %75 : vector<8x32xf32>
    %cst_44 = arith.constant dense<0.000000e+00> : vector<8xf32>
    %77 = vector.multi_reduction <add>, %76, %cst_44 [1] : vector<8x32xf32> to vector<8xf32>
    %78 = vector.shape_cast %77 : vector<8xf32> to vector<8x1xf32>
    %cst_45 = arith.constant 3.200000e+01 : f32
    %79 = vector.broadcast %cst_45 : f32 to vector<8x1xf32>
    %80 = arith.divf %78, %79 : vector<8x1xf32>
    %81 = vector.broadcast %80 : vector<8x1xf32> to vector<8x32xf32>
    %82 = arith.subf %76, %81 : vector<8x32xf32>
    %83 = arith.mulf %82, %82 : vector<8x32xf32>
    %cst_46 = arith.constant dense<0.000000e+00> : vector<8xf32>
    %84 = vector.multi_reduction <add>, %83, %cst_46 [1] : vector<8x32xf32> to vector<8xf32>
    %85 = vector.shape_cast %84 : vector<8xf32> to vector<8x1xf32>
    %cst_47 = arith.constant 3.200000e+01 : f32
    %86 = vector.broadcast %cst_47 : f32 to vector<8x1xf32>
    %87 = arith.divf %85, %86 : vector<8x1xf32>
    %88 = vector.broadcast %80 : vector<8x1xf32> to vector<8x32xf32>
    %89 = arith.subf %76, %88 : vector<8x32xf32>
    %cst_48 = arith.constant 9.99999974E-6 : f32
    %90 = vector.broadcast %cst_48 : f32 to vector<8x1xf32>
    %91 = arith.addf %87, %90 : vector<8x1xf32>
    %92 = math.rsqrt %91 : vector<8x1xf32>
    %93 = vector.broadcast %92 : vector<8x1xf32> to vector<8x32xf32>
    %94 = arith.mulf %89, %93 : vector<8x32xf32>
    %c0_49 = arith.constant 0 : index
    %c0_50 = arith.constant 0 : index
    %95 = vector.load %arg7[%c0_49, %c0_50] : memref<1x32xf32, #tpu.memory_space<vmem>>, vector<1x32xf32>
    %96 = vector.broadcast %95 : vector<1x32xf32> to vector<8x32xf32>
    %97 = arith.mulf %94, %96 : vector<8x32xf32>
    %c0_51 = arith.constant 0 : index
    %c0_52 = arith.constant 0 : index
    %98 = vector.load %arg8[%c0_51, %c0_52] : memref<1x32xf32, #tpu.memory_space<vmem>>, vector<1x32xf32>
    %99 = vector.broadcast %98 : vector<1x32xf32> to vector<8x32xf32>
    %100 = arith.addf %97, %99 : vector<8x32xf32>
    %101 = tpu.iota {dimensions = array<i32: 0>} : vector<8x1xi32>
    %102 = vector.broadcast %1 : i32 to vector<8x1xi32>
    %103 = arith.cmpi slt, %101, %102 : vector<8x1xi32>
    %104 = arith.extui %103 : vector<8x1xi1> to vector<8x1xi32>
    %105 = arith.sitofp %104 : vector<8x1xi32> to vector<8x1xf32>
    %106 = vector.broadcast %105 : vector<8x1xf32> to vector<8x32xf32>
    %107 = arith.mulf %100, %106 : vector<8x32xf32>
    %c0_53 = arith.constant 0 : index
    %c0_54 = arith.constant 0 : index
    %c0_55 = arith.constant 0 : index
    %108 = vector.load %arg9[%c0_53, %c0_54, %c0_55] : memref<1x8x32xf32, #tpu.memory_space<vmem>>, vector<1x8x32xf32>
    %109 = vector.shape_cast %108 : vector<1x8x32xf32> to vector<8x32xf32>
    %110 = vector.shape_cast %107 : vector<8x32xf32> to vector<1x8x32xf32>
    tpu.vector_store %arg9[%c0_53, %c0_54, %c0_55], %110 {strides = array<i32>} : memref<1x8x32xf32, #tpu.memory_space<vmem>>, vector<1x8x32xf32>,
    return
  }
  func.func @transform_0(%arg0: i32, %arg1: memref<2xi32, #tpu.memory_space<smem>>) -> (i32, i32, i32) {
    %c0_i32 = arith.constant 0 : i32
    %c0_i32_0 = arith.constant 0 : i32
    %c0_i32_1 = arith.constant 0 : i32
    return %arg0, %c0_i32, %c0_i32_0 : i32, i32, i32
  }
  func.func @transform_1(%arg0: i32, %arg1: memref<2xi32, #tpu.memory_space<smem>>) -> (i32, i32, i32) {
    %c0_i32 = arith.constant 0 : i32
    %c0_i32_0 = arith.constant 0 : i32
    %c0_i32_1 = arith.constant 0 : i32
    %c0_i32_2 = arith.constant 0 : i32
    return %c0_i32, %c0_i32_0, %c0_i32_1 : i32, i32, i32
  }
  func.func @transform_2(%arg0: i32, %arg1: memref<2xi32, #tpu.memory_space<smem>>) -> (i32, i32) {
    %c0_i32 = arith.constant 0 : i32
    %c0_i32_0 = arith.constant 0 : i32
    %c0_i32_1 = arith.constant 0 : i32
    return %c0_i32, %c0_i32_0 : i32, i32
  }
  func.func @transform_3(%arg0: i32, %arg1: memref<2xi32, #tpu.memory_space<smem>>) -> (i32, i32, i32) {
    %c0_i32 = arith.constant 0 : i32
    %c0_i32_0 = arith.constant 0 : i32
    %c0_i32_1 = arith.constant 0 : i32
    %c0_i32_2 = arith.constant 0 : i32
    return %c0_i32, %c0_i32_0, %c0_i32_1 : i32, i32, i32
  }
  func.func @transform_4(%arg0: i32, %arg1: memref<2xi32, #tpu.memory_space<smem>>) -> (i32, i32) {
    %c0_i32 = arith.constant 0 : i32
    %c0_i32_0 = arith.constant 0 : i32
    %c0_i32_1 = arith.constant 0 : i32
    return %c0_i32, %c0_i32_0 : i32, i32
  }
  func.func @transform_5(%arg0: i32, %arg1: memref<2xi32, #tpu.memory_space<smem>>) -> (i32, i32) {
    %c0_i32 = arith.constant 0 : i32
    %c0_i32_0 = arith.constant 0 : i32
    %c0_i32_1 = arith.constant 0 : i32
    return %c0_i32, %c0_i32_0 : i32, i32
  }
  func.func @transform_6(%arg0: i32, %arg1: memref<2xi32, #tpu.memory_space<smem>>) -> (i32, i32) {
    %c0_i32 = arith.constant 0 : i32
    %c0_i32_0 = arith.constant 0 : i32
    %c0_i32_1 = arith.constant 0 : i32
    return %c0_i32, %c0_i32_0 : i32, i32
  }
  func.func @transform_7(%arg0: i32, %arg1: memref<2xi32, #tpu.memory_space<smem>>) -> (i32, i32, i32) {
    %c0_i32 = arith.constant 0 : i32
    %c0_i32_0 = arith.constant 0 : i32
    %c0_i32_1 = arith.constant 0 : i32
    return %arg0, %c0_i32, %c0_i32_0 : i32, i32, i32
  }
}

module attributes {stable_mosaic.version = 11 : i64} {
  func.func @_conv_ln_relu_kernel(%arg0: i32, %arg1: memref<1x10x32xf32, #tpu.memory_space<vmem>>, %arg2: memref<3x32x64xbf16, #tpu.memory_space<vmem>>, %arg3: memref<1x64xf32, #tpu.memory_space<vmem>>, %arg4: memref<1x64xf32, #tpu.memory_space<vmem>>, %arg5: memref<1x64xf32, #tpu.memory_space<vmem>>, %arg6: memref<1x8x64xf32, #tpu.memory_space<vmem>>) attributes {dimension_semantics = [#tpu.dimension_semantics<parallel>], iteration_bounds = array<i64: 2>, scalar_prefetch = 0 : i64, scratch_operands = 0 : i64, tpu.core_type = #tpu.core_type<tc>, window_params = [{transform_indices = @transform_0, window_bounds = array<i64: 1, 10, 32>}, {pipeline_mode = #tpu.pipeline_mode<synchronous>, transform_indices = @transform_1, window_bounds = array<i64: 3, 32, 64>}, {pipeline_mode = #tpu.pipeline_mode<synchronous>, transform_indices = @transform_2, window_bounds = array<i64: 1, 64>}, {pipeline_mode = #tpu.pipeline_mode<synchronous>, transform_indices = @transform_3, window_bounds = array<i64: 1, 64>}, {pipeline_mode = #tpu.pipeline_mode<synchronous>, transform_indices = @transform_4, window_bounds = array<i64: 1, 64>}, {transform_indices = @transform_5, window_bounds = array<i64: 1, 8, 64>}]} {
    %c0 = arith.constant 0 : index
    %c0_0 = arith.constant 0 : index
    %c0_1 = arith.constant 0 : index
    %0 = vector.load %arg1[%c0, %c0_0, %c0_1] : memref<1x10x32xf32, #tpu.memory_space<vmem>>, vector<1x10x32xf32>
    %1 = vector.shape_cast %0 : vector<1x10x32xf32> to vector<10x32xf32>
    %cst = arith.constant 0.000000e+00 : f32
    %2 = vector.broadcast %cst : f32 to vector<8x64xf32>
    %3 = vector.extract_strided_slice %1 {offsets = [0, 0], sizes = [8, 32], strides = [1, 1]} : vector<10x32xf32> to vector<8x32xf32>
    %4 = arith.truncf %3 : vector<8x32xf32> to vector<8x32xbf16>
    %c0_2 = arith.constant 0 : index
    %c0_3 = arith.constant 0 : index
    %c0_4 = arith.constant 0 : index
    %5 = vector.load %arg2[%c0_2, %c0_3, %c0_4] : memref<3x32x64xbf16, #tpu.memory_space<vmem>>, vector<1x32x64xbf16>
    %6 = vector.shape_cast %5 : vector<1x32x64xbf16> to vector<32x64xbf16>
    %cst_5 = arith.constant dense<0.000000e+00> : vector<8x64xf32>
    %7 = tpu.matmul %4, %6, %cst_5 {dimension_numbers = #tpu.dot_dimension_numbers<[1], [0], [0], [1], [0, 0, 1, 1], [], []>} : vector<8x32xbf16>, vector<32x64xbf16>, vector<8x64xf32> -> vector<8x64xf32>
    %8 = arith.addf %2, %7 : vector<8x64xf32>
    %9 = vector.extract_strided_slice %1 {offsets = [1, 0], sizes = [8, 32], strides = [1, 1]} : vector<10x32xf32> to vector<8x32xf32>
    %10 = arith.truncf %9 : vector<8x32xf32> to vector<8x32xbf16>
    %c1 = arith.constant 1 : index
    %c0_6 = arith.constant 0 : index
    %c0_7 = arith.constant 0 : index
    %11 = vector.load %arg2[%c1, %c0_6, %c0_7] : memref<3x32x64xbf16, #tpu.memory_space<vmem>>, vector<1x32x64xbf16>
    %12 = vector.shape_cast %11 : vector<1x32x64xbf16> to vector<32x64xbf16>
    %cst_8 = arith.constant dense<0.000000e+00> : vector<8x64xf32>
    %13 = tpu.matmul %10, %12, %cst_8 {dimension_numbers = #tpu.dot_dimension_numbers<[1], [0], [0], [1], [0, 0, 1, 1], [], []>} : vector<8x32xbf16>, vector<32x64xbf16>, vector<8x64xf32> -> vector<8x64xf32>
    %14 = arith.addf %8, %13 : vector<8x64xf32>
    %15 = vector.extract_strided_slice %1 {offsets = [2, 0], sizes = [8, 32], strides = [1, 1]} : vector<10x32xf32> to vector<8x32xf32>
    %16 = arith.truncf %15 : vector<8x32xf32> to vector<8x32xbf16>
    %c2 = arith.constant 2 : index
    %c0_9 = arith.constant 0 : index
    %c0_10 = arith.constant 0 : index
    %17 = vector.load %arg2[%c2, %c0_9, %c0_10] : memref<3x32x64xbf16, #tpu.memory_space<vmem>>, vector<1x32x64xbf16>
    %18 = vector.shape_cast %17 : vector<1x32x64xbf16> to vector<32x64xbf16>
    %cst_11 = arith.constant dense<0.000000e+00> : vector<8x64xf32>
    %19 = tpu.matmul %16, %18, %cst_11 {dimension_numbers = #tpu.dot_dimension_numbers<[1], [0], [0], [1], [0, 0, 1, 1], [], []>} : vector<8x32xbf16>, vector<32x64xbf16>, vector<8x64xf32> -> vector<8x64xf32>
    %20 = arith.addf %14, %19 : vector<8x64xf32>
    %c0_12 = arith.constant 0 : index
    %c0_13 = arith.constant 0 : index
    %21 = vector.load %arg3[%c0_12, %c0_13] : memref<1x64xf32, #tpu.memory_space<vmem>>, vector<1x64xf32>
    %22 = vector.broadcast %21 : vector<1x64xf32> to vector<8x64xf32>
    %23 = arith.addf %20, %22 : vector<8x64xf32>
    %cst_14 = arith.constant dense<0.000000e+00> : vector<8xf32>
    %24 = vector.multi_reduction <add>, %23, %cst_14 [1] : vector<8x64xf32> to vector<8xf32>
    %25 = vector.shape_cast %24 : vector<8xf32> to vector<8x1xf32>
    %cst_15 = arith.constant 6.400000e+01 : f32
    %26 = vector.broadcast %cst_15 : f32 to vector<8x1xf32>
    %27 = arith.divf %25, %26 : vector<8x1xf32>
    %28 = vector.broadcast %27 : vector<8x1xf32> to vector<8x64xf32>
    %29 = arith.subf %23, %28 : vector<8x64xf32>
    %30 = arith.mulf %29, %29 : vector<8x64xf32>
    %cst_16 = arith.constant dense<0.000000e+00> : vector<8xf32>
    %31 = vector.multi_reduction <add>, %30, %cst_16 [1] : vector<8x64xf32> to vector<8xf32>
    %32 = vector.shape_cast %31 : vector<8xf32> to vector<8x1xf32>
    %cst_17 = arith.constant 6.400000e+01 : f32
    %33 = vector.broadcast %cst_17 : f32 to vector<8x1xf32>
    %34 = arith.divf %32, %33 : vector<8x1xf32>
    %35 = vector.broadcast %27 : vector<8x1xf32> to vector<8x64xf32>
    %36 = arith.subf %23, %35 : vector<8x64xf32>
    %cst_18 = arith.constant 9.99999974E-6 : f32
    %37 = vector.broadcast %cst_18 : f32 to vector<8x1xf32>
    %38 = arith.addf %34, %37 : vector<8x1xf32>
    %39 = math.rsqrt %38 : vector<8x1xf32>
    %40 = vector.broadcast %39 : vector<8x1xf32> to vector<8x64xf32>
    %41 = arith.mulf %36, %40 : vector<8x64xf32>
    %c0_19 = arith.constant 0 : index
    %c0_20 = arith.constant 0 : index
    %42 = vector.load %arg4[%c0_19, %c0_20] : memref<1x64xf32, #tpu.memory_space<vmem>>, vector<1x64xf32>
    %43 = vector.broadcast %42 : vector<1x64xf32> to vector<8x64xf32>
    %44 = arith.mulf %41, %43 : vector<8x64xf32>
    %c0_21 = arith.constant 0 : index
    %c0_22 = arith.constant 0 : index
    %45 = vector.load %arg5[%c0_21, %c0_22] : memref<1x64xf32, #tpu.memory_space<vmem>>, vector<1x64xf32>
    %46 = vector.broadcast %45 : vector<1x64xf32> to vector<8x64xf32>
    %47 = arith.addf %44, %46 : vector<8x64xf32>
    %cst_23 = arith.constant 0.000000e+00 : f32
    %48 = vector.broadcast %cst_23 : f32 to vector<8x64xf32>
    %49 = arith.maximumf %47, %48 : vector<8x64xf32>
    %c0_24 = arith.constant 0 : index
    %c0_25 = arith.constant 0 : index
    %c0_26 = arith.constant 0 : index
    %50 = vector.load %arg6[%c0_24, %c0_25, %c0_26] : memref<1x8x64xf32, #tpu.memory_space<vmem>>, vector<1x8x64xf32>
    %51 = vector.shape_cast %50 : vector<1x8x64xf32> to vector<8x64xf32>
    %52 = vector.shape_cast %49 : vector<8x64xf32> to vector<1x8x64xf32>
    tpu.vector_store %arg6[%c0_24, %c0_25, %c0_26], %52 {strides = array<i32>} : memref<1x8x64xf32, #tpu.memory_space<vmem>>, vector<1x8x64xf32>,
    return
  }
  func.func @transform_0(%arg0: i32) -> (i32, i32, i32) {
    %c0_i32 = arith.constant 0 : i32
    %c0_i32_0 = arith.constant 0 : i32
    %c0_i32_1 = arith.constant 0 : i32
    return %arg0, %c0_i32, %c0_i32_0 : i32, i32, i32
  }
  func.func @transform_1(%arg0: i32) -> (i32, i32, i32) {
    %c0_i32 = arith.constant 0 : i32
    %c0_i32_0 = arith.constant 0 : i32
    %c0_i32_1 = arith.constant 0 : i32
    %c0_i32_2 = arith.constant 0 : i32
    return %c0_i32, %c0_i32_0, %c0_i32_1 : i32, i32, i32
  }
  func.func @transform_2(%arg0: i32) -> (i32, i32) {
    %c0_i32 = arith.constant 0 : i32
    %c0_i32_0 = arith.constant 0 : i32
    %c0_i32_1 = arith.constant 0 : i32
    return %c0_i32, %c0_i32_0 : i32, i32
  }
  func.func @transform_3(%arg0: i32) -> (i32, i32) {
    %c0_i32 = arith.constant 0 : i32
    %c0_i32_0 = arith.constant 0 : i32
    %c0_i32_1 = arith.constant 0 : i32
    return %c0_i32, %c0_i32_0 : i32, i32
  }
  func.func @transform_4(%arg0: i32) -> (i32, i32) {
    %c0_i32 = arith.constant 0 : i32
    %c0_i32_0 = arith.constant 0 : i32
    %c0_i32_1 = arith.constant 0 : i32
    return %c0_i32, %c0_i32_0 : i32, i32
  }
  func.func @transform_5(%arg0: i32) -> (i32, i32, i32) {
    %c0_i32 = arith.constant 0 : i32
    %c0_i32_0 = arith.constant 0 : i32
    %c0_i32_1 = arith.constant 0 : i32
    return %arg0, %c0_i32, %c0_i32_0 : i32, i32, i32
  }
}

module attributes {stable_mosaic.version = 11 : i64} {
  func.func @_conv_ln_relu_kernel(%arg0: i32, %arg1: memref<1x10x64xf32, #tpu.memory_space<vmem>>, %arg2: memref<3x64x64xbf16, #tpu.memory_space<vmem>>, %arg3: memref<1x64xf32, #tpu.memory_space<vmem>>, %arg4: memref<1x64xf32, #tpu.memory_space<vmem>>, %arg5: memref<1x64xf32, #tpu.memory_space<vmem>>, %arg6: memref<1x8x64xf32, #tpu.memory_space<vmem>>) attributes {dimension_semantics = [#tpu.dimension_semantics<parallel>], iteration_bounds = array<i64: 2>, scalar_prefetch = 0 : i64, scratch_operands = 0 : i64, tpu.core_type = #tpu.core_type<tc>, window_params = [{transform_indices = @transform_0, window_bounds = array<i64: 1, 10, 64>}, {pipeline_mode = #tpu.pipeline_mode<synchronous>, transform_indices = @transform_1, window_bounds = array<i64: 3, 64, 64>}, {pipeline_mode = #tpu.pipeline_mode<synchronous>, transform_indices = @transform_2, window_bounds = array<i64: 1, 64>}, {pipeline_mode = #tpu.pipeline_mode<synchronous>, transform_indices = @transform_3, window_bounds = array<i64: 1, 64>}, {pipeline_mode = #tpu.pipeline_mode<synchronous>, transform_indices = @transform_4, window_bounds = array<i64: 1, 64>}, {transform_indices = @transform_5, window_bounds = array<i64: 1, 8, 64>}]} {
    %c0 = arith.constant 0 : index
    %c0_0 = arith.constant 0 : index
    %c0_1 = arith.constant 0 : index
    %0 = vector.load %arg1[%c0, %c0_0, %c0_1] : memref<1x10x64xf32, #tpu.memory_space<vmem>>, vector<1x10x64xf32>
    %1 = vector.shape_cast %0 : vector<1x10x64xf32> to vector<10x64xf32>
    %cst = arith.constant 0.000000e+00 : f32
    %2 = vector.broadcast %cst : f32 to vector<8x64xf32>
    %3 = vector.extract_strided_slice %1 {offsets = [0, 0], sizes = [8, 64], strides = [1, 1]} : vector<10x64xf32> to vector<8x64xf32>
    %4 = arith.truncf %3 : vector<8x64xf32> to vector<8x64xbf16>
    %c0_2 = arith.constant 0 : index
    %c0_3 = arith.constant 0 : index
    %c0_4 = arith.constant 0 : index
    %5 = vector.load %arg2[%c0_2, %c0_3, %c0_4] : memref<3x64x64xbf16, #tpu.memory_space<vmem>>, vector<1x64x64xbf16>
    %6 = vector.shape_cast %5 : vector<1x64x64xbf16> to vector<64x64xbf16>
    %cst_5 = arith.constant dense<0.000000e+00> : vector<8x64xf32>
    %7 = tpu.matmul %4, %6, %cst_5 {dimension_numbers = #tpu.dot_dimension_numbers<[1], [0], [0], [1], [0, 0, 1, 1], [], []>} : vector<8x64xbf16>, vector<64x64xbf16>, vector<8x64xf32> -> vector<8x64xf32>
    %8 = arith.addf %2, %7 : vector<8x64xf32>
    %9 = vector.extract_strided_slice %1 {offsets = [1, 0], sizes = [8, 64], strides = [1, 1]} : vector<10x64xf32> to vector<8x64xf32>
    %10 = arith.truncf %9 : vector<8x64xf32> to vector<8x64xbf16>
    %c1 = arith.constant 1 : index
    %c0_6 = arith.constant 0 : index
    %c0_7 = arith.constant 0 : index
    %11 = vector.load %arg2[%c1, %c0_6, %c0_7] : memref<3x64x64xbf16, #tpu.memory_space<vmem>>, vector<1x64x64xbf16>
    %12 = vector.shape_cast %11 : vector<1x64x64xbf16> to vector<64x64xbf16>
    %cst_8 = arith.constant dense<0.000000e+00> : vector<8x64xf32>
    %13 = tpu.matmul %10, %12, %cst_8 {dimension_numbers = #tpu.dot_dimension_numbers<[1], [0], [0], [1], [0, 0, 1, 1], [], []>} : vector<8x64xbf16>, vector<64x64xbf16>, vector<8x64xf32> -> vector<8x64xf32>
    %14 = arith.addf %8, %13 : vector<8x64xf32>
    %15 = vector.extract_strided_slice %1 {offsets = [2, 0], sizes = [8, 64], strides = [1, 1]} : vector<10x64xf32> to vector<8x64xf32>
    %16 = arith.truncf %15 : vector<8x64xf32> to vector<8x64xbf16>
    %c2 = arith.constant 2 : index
    %c0_9 = arith.constant 0 : index
    %c0_10 = arith.constant 0 : index
    %17 = vector.load %arg2[%c2, %c0_9, %c0_10] : memref<3x64x64xbf16, #tpu.memory_space<vmem>>, vector<1x64x64xbf16>
    %18 = vector.shape_cast %17 : vector<1x64x64xbf16> to vector<64x64xbf16>
    %cst_11 = arith.constant dense<0.000000e+00> : vector<8x64xf32>
    %19 = tpu.matmul %16, %18, %cst_11 {dimension_numbers = #tpu.dot_dimension_numbers<[1], [0], [0], [1], [0, 0, 1, 1], [], []>} : vector<8x64xbf16>, vector<64x64xbf16>, vector<8x64xf32> -> vector<8x64xf32>
    %20 = arith.addf %14, %19 : vector<8x64xf32>
    %c0_12 = arith.constant 0 : index
    %c0_13 = arith.constant 0 : index
    %21 = vector.load %arg3[%c0_12, %c0_13] : memref<1x64xf32, #tpu.memory_space<vmem>>, vector<1x64xf32>
    %22 = vector.broadcast %21 : vector<1x64xf32> to vector<8x64xf32>
    %23 = arith.addf %20, %22 : vector<8x64xf32>
    %cst_14 = arith.constant dense<0.000000e+00> : vector<8xf32>
    %24 = vector.multi_reduction <add>, %23, %cst_14 [1] : vector<8x64xf32> to vector<8xf32>
    %25 = vector.shape_cast %24 : vector<8xf32> to vector<8x1xf32>
    %cst_15 = arith.constant 6.400000e+01 : f32
    %26 = vector.broadcast %cst_15 : f32 to vector<8x1xf32>
    %27 = arith.divf %25, %26 : vector<8x1xf32>
    %28 = vector.broadcast %27 : vector<8x1xf32> to vector<8x64xf32>
    %29 = arith.subf %23, %28 : vector<8x64xf32>
    %30 = arith.mulf %29, %29 : vector<8x64xf32>
    %cst_16 = arith.constant dense<0.000000e+00> : vector<8xf32>
    %31 = vector.multi_reduction <add>, %30, %cst_16 [1] : vector<8x64xf32> to vector<8xf32>
    %32 = vector.shape_cast %31 : vector<8xf32> to vector<8x1xf32>
    %cst_17 = arith.constant 6.400000e+01 : f32
    %33 = vector.broadcast %cst_17 : f32 to vector<8x1xf32>
    %34 = arith.divf %32, %33 : vector<8x1xf32>
    %35 = vector.broadcast %27 : vector<8x1xf32> to vector<8x64xf32>
    %36 = arith.subf %23, %35 : vector<8x64xf32>
    %cst_18 = arith.constant 9.99999974E-6 : f32
    %37 = vector.broadcast %cst_18 : f32 to vector<8x1xf32>
    %38 = arith.addf %34, %37 : vector<8x1xf32>
    %39 = math.rsqrt %38 : vector<8x1xf32>
    %40 = vector.broadcast %39 : vector<8x1xf32> to vector<8x64xf32>
    %41 = arith.mulf %36, %40 : vector<8x64xf32>
    %c0_19 = arith.constant 0 : index
    %c0_20 = arith.constant 0 : index
    %42 = vector.load %arg4[%c0_19, %c0_20] : memref<1x64xf32, #tpu.memory_space<vmem>>, vector<1x64xf32>
    %43 = vector.broadcast %42 : vector<1x64xf32> to vector<8x64xf32>
    %44 = arith.mulf %41, %43 : vector<8x64xf32>
    %c0_21 = arith.constant 0 : index
    %c0_22 = arith.constant 0 : index
    %45 = vector.load %arg5[%c0_21, %c0_22] : memref<1x64xf32, #tpu.memory_space<vmem>>, vector<1x64xf32>
    %46 = vector.broadcast %45 : vector<1x64xf32> to vector<8x64xf32>
    %47 = arith.addf %44, %46 : vector<8x64xf32>
    %cst_23 = arith.constant 0.000000e+00 : f32
    %48 = vector.broadcast %cst_23 : f32 to vector<8x64xf32>
    %49 = arith.maximumf %47, %48 : vector<8x64xf32>
    %c0_24 = arith.constant 0 : index
    %c0_25 = arith.constant 0 : index
    %c0_26 = arith.constant 0 : index
    %50 = vector.load %arg6[%c0_24, %c0_25, %c0_26] : memref<1x8x64xf32, #tpu.memory_space<vmem>>, vector<1x8x64xf32>
    %51 = vector.shape_cast %50 : vector<1x8x64xf32> to vector<8x64xf32>
    %52 = vector.shape_cast %49 : vector<8x64xf32> to vector<1x8x64xf32>
    tpu.vector_store %arg6[%c0_24, %c0_25, %c0_26], %52 {strides = array<i32>} : memref<1x8x64xf32, #tpu.memory_space<vmem>>, vector<1x8x64xf32>,
    return
  }
  func.func @transform_0(%arg0: i32) -> (i32, i32, i32) {
    %c0_i32 = arith.constant 0 : i32
    %c0_i32_0 = arith.constant 0 : i32
    %c0_i32_1 = arith.constant 0 : i32
    return %arg0, %c0_i32, %c0_i32_0 : i32, i32, i32
  }
  func.func @transform_1(%arg0: i32) -> (i32, i32, i32) {
    %c0_i32 = arith.constant 0 : i32
    %c0_i32_0 = arith.constant 0 : i32
    %c0_i32_1 = arith.constant 0 : i32
    %c0_i32_2 = arith.constant 0 : i32
    return %c0_i32, %c0_i32_0, %c0_i32_1 : i32, i32, i32
  }
  func.func @transform_2(%arg0: i32) -> (i32, i32) {
    %c0_i32 = arith.constant 0 : i32
    %c0_i32_0 = arith.constant 0 : i32
    %c0_i32_1 = arith.constant 0 : i32
    return %c0_i32, %c0_i32_0 : i32, i32
  }
  func.func @transform_3(%arg0: i32) -> (i32, i32) {
    %c0_i32 = arith.constant 0 : i32
    %c0_i32_0 = arith.constant 0 : i32
    %c0_i32_1 = arith.constant 0 : i32
    return %c0_i32, %c0_i32_0 : i32, i32
  }
  func.func @transform_4(%arg0: i32) -> (i32, i32) {
    %c0_i32 = arith.constant 0 : i32
    %c0_i32_0 = arith.constant 0 : i32
    %c0_i32_1 = arith.constant 0 : i32
    return %c0_i32, %c0_i32_0 : i32, i32
  }
  func.func @transform_5(%arg0: i32) -> (i32, i32, i32) {
    %c0_i32 = arith.constant 0 : i32
    %c0_i32_0 = arith.constant 0 : i32
    %c0_i32_1 = arith.constant 0 : i32
    return %arg0, %c0_i32, %c0_i32_0 : i32, i32, i32
  }
}

module attributes {stable_mosaic.version = 11 : i64} {
  func.func @_linear_kernel(%arg0: i32, %arg1: memref<16x64xf32, #tpu.memory_space<vmem>>, %arg2: memref<64x1xbf16, #tpu.memory_space<vmem>>, %arg3: memref<1x1xf32, #tpu.memory_space<vmem>>, %arg4: memref<16x1xf32, #tpu.memory_space<vmem>>) attributes {dimension_semantics = [#tpu.dimension_semantics<parallel>], iteration_bounds = array<i64: 1>, scalar_prefetch = 0 : i64, scratch_operands = 0 : i64, tpu.core_type = #tpu.core_type<tc>, window_params = [{transform_indices = @transform_0, window_bounds = array<i64: 16, 64>}, {pipeline_mode = #tpu.pipeline_mode<synchronous>, transform_indices = @transform_1, window_bounds = array<i64: 64, 1>}, {pipeline_mode = #tpu.pipeline_mode<synchronous>, transform_indices = @transform_2, window_bounds = array<i64: 1, 1>}, {transform_indices = @transform_3, window_bounds = array<i64: 16, 1>}]} {
    %c0 = arith.constant 0 : index
    %c0_0 = arith.constant 0 : index
    %0 = vector.load %arg1[%c0, %c0_0] : memref<16x64xf32, #tpu.memory_space<vmem>>, vector<16x64xf32>
    %1 = arith.truncf %0 : vector<16x64xf32> to vector<16x64xbf16>
    %c0_1 = arith.constant 0 : index
    %c0_2 = arith.constant 0 : index
    %2 = vector.load %arg2[%c0_1, %c0_2] : memref<64x1xbf16, #tpu.memory_space<vmem>>, vector<64x1xbf16>
    %cst = arith.constant dense<0.000000e+00> : vector<16x1xf32>
    %3 = tpu.matmul %1, %2, %cst {dimension_numbers = #tpu.dot_dimension_numbers<[1], [0], [0], [1], [0, 0, 1, 1], [], []>} : vector<16x64xbf16>, vector<64x1xbf16>, vector<16x1xf32> -> vector<16x1xf32>
    %c0_3 = arith.constant 0 : index
    %c0_4 = arith.constant 0 : index
    %4 = vector.load %arg3[%c0_3, %c0_4] : memref<1x1xf32, #tpu.memory_space<vmem>>, vector<1x1xf32>
    %5 = vector.broadcast %4 : vector<1x1xf32> to vector<16x1xf32>
    %6 = arith.addf %3, %5 : vector<16x1xf32>
    %cst_5 = arith.constant 0.000000e+00 : f32
    %7 = vector.broadcast %cst_5 : f32 to vector<16x1xf32>
    %8 = arith.maximumf %6, %7 : vector<16x1xf32>
    %c0_6 = arith.constant 0 : index
    %c0_7 = arith.constant 0 : index
    %9 = vector.load %arg4[%c0_6, %c0_7] : memref<16x1xf32, #tpu.memory_space<vmem>>, vector<16x1xf32>
    tpu.vector_store %arg4[%c0_6, %c0_7], %8 {strides = array<i32>} : memref<16x1xf32, #tpu.memory_space<vmem>>, vector<16x1xf32>,
    return
  }
  func.func @transform_0(%arg0: i32) -> (i32, i32) {
    %c0_i32 = arith.constant 0 : i32
    %c0_i32_0 = arith.constant 0 : i32
    return %arg0, %c0_i32 : i32, i32
  }
  func.func @transform_1(%arg0: i32) -> (i32, i32) {
    %c0_i32 = arith.constant 0 : i32
    %c0_i32_0 = arith.constant 0 : i32
    %c0_i32_1 = arith.constant 0 : i32
    return %c0_i32, %c0_i32_0 : i32, i32
  }
  func.func @transform_2(%arg0: i32) -> (i32, i32) {
    %c0_i32 = arith.constant 0 : i32
    %c0_i32_0 = arith.constant 0 : i32
    %c0_i32_1 = arith.constant 0 : i32
    return %c0_i32, %c0_i32_0 : i32, i32
  }
  func.func @transform_3(%arg0: i32) -> (i32, i32) {
    %c0_i32 = arith.constant 0 : i32
    %c0_i32_0 = arith.constant 0 : i32
    return %arg0, %c0_i32 : i32, i32
  }
}

module attributes {stable_mosaic.version = 11 : i64} {
  func.func @_conv_ln_relu_kernel(%arg0: i32, %arg1: memref<1x34x32xf32, #tpu.memory_space<vmem>>, %arg2: memref<3x32x64xbf16, #tpu.memory_space<vmem>>, %arg3: memref<1x64xf32, #tpu.memory_space<vmem>>, %arg4: memref<1x64xf32, #tpu.memory_space<vmem>>, %arg5: memref<1x64xf32, #tpu.memory_space<vmem>>, %arg6: memref<1x32x64xf32, #tpu.memory_space<vmem>>) attributes {dimension_semantics = [#tpu.dimension_semantics<parallel>], iteration_bounds = array<i64: 2>, scalar_prefetch = 0 : i64, scratch_operands = 0 : i64, tpu.core_type = #tpu.core_type<tc>, window_params = [{transform_indices = @transform_0, window_bounds = array<i64: 1, 34, 32>}, {pipeline_mode = #tpu.pipeline_mode<synchronous>, transform_indices = @transform_1, window_bounds = array<i64: 3, 32, 64>}, {pipeline_mode = #tpu.pipeline_mode<synchronous>, transform_indices = @transform_2, window_bounds = array<i64: 1, 64>}, {pipeline_mode = #tpu.pipeline_mode<synchronous>, transform_indices = @transform_3, window_bounds = array<i64: 1, 64>}, {pipeline_mode = #tpu.pipeline_mode<synchronous>, transform_indices = @transform_4, window_bounds = array<i64: 1, 64>}, {transform_indices = @transform_5, window_bounds = array<i64: 1, 32, 64>}]} {
    %c0 = arith.constant 0 : index
    %c0_0 = arith.constant 0 : index
    %c0_1 = arith.constant 0 : index
    %0 = vector.load %arg1[%c0, %c0_0, %c0_1] : memref<1x34x32xf32, #tpu.memory_space<vmem>>, vector<1x34x32xf32>
    %1 = vector.shape_cast %0 : vector<1x34x32xf32> to vector<34x32xf32>
    %cst = arith.constant 0.000000e+00 : f32
    %2 = vector.broadcast %cst : f32 to vector<32x64xf32>
    %3 = vector.extract_strided_slice %1 {offsets = [0, 0], sizes = [32, 32], strides = [1, 1]} : vector<34x32xf32> to vector<32x32xf32>
    %4 = arith.truncf %3 : vector<32x32xf32> to vector<32x32xbf16>
    %c0_2 = arith.constant 0 : index
    %c0_3 = arith.constant 0 : index
    %c0_4 = arith.constant 0 : index
    %5 = vector.load %arg2[%c0_2, %c0_3, %c0_4] : memref<3x32x64xbf16, #tpu.memory_space<vmem>>, vector<1x32x64xbf16>
    %6 = vector.shape_cast %5 : vector<1x32x64xbf16> to vector<32x64xbf16>
    %cst_5 = arith.constant dense<0.000000e+00> : vector<32x64xf32>
    %7 = tpu.matmul %4, %6, %cst_5 {dimension_numbers = #tpu.dot_dimension_numbers<[1], [0], [0], [1], [0, 0, 1, 1], [], []>} : vector<32x32xbf16>, vector<32x64xbf16>, vector<32x64xf32> -> vector<32x64xf32>
    %8 = arith.addf %2, %7 : vector<32x64xf32>
    %9 = vector.extract_strided_slice %1 {offsets = [1, 0], sizes = [32, 32], strides = [1, 1]} : vector<34x32xf32> to vector<32x32xf32>
    %10 = arith.truncf %9 : vector<32x32xf32> to vector<32x32xbf16>
    %c1 = arith.constant 1 : index
    %c0_6 = arith.constant 0 : index
    %c0_7 = arith.constant 0 : index
    %11 = vector.load %arg2[%c1, %c0_6, %c0_7] : memref<3x32x64xbf16, #tpu.memory_space<vmem>>, vector<1x32x64xbf16>
    %12 = vector.shape_cast %11 : vector<1x32x64xbf16> to vector<32x64xbf16>
    %cst_8 = arith.constant dense<0.000000e+00> : vector<32x64xf32>
    %13 = tpu.matmul %10, %12, %cst_8 {dimension_numbers = #tpu.dot_dimension_numbers<[1], [0], [0], [1], [0, 0, 1, 1], [], []>} : vector<32x32xbf16>, vector<32x64xbf16>, vector<32x64xf32> -> vector<32x64xf32>
    %14 = arith.addf %8, %13 : vector<32x64xf32>
    %15 = vector.extract_strided_slice %1 {offsets = [2, 0], sizes = [32, 32], strides = [1, 1]} : vector<34x32xf32> to vector<32x32xf32>
    %16 = arith.truncf %15 : vector<32x32xf32> to vector<32x32xbf16>
    %c2 = arith.constant 2 : index
    %c0_9 = arith.constant 0 : index
    %c0_10 = arith.constant 0 : index
    %17 = vector.load %arg2[%c2, %c0_9, %c0_10] : memref<3x32x64xbf16, #tpu.memory_space<vmem>>, vector<1x32x64xbf16>
    %18 = vector.shape_cast %17 : vector<1x32x64xbf16> to vector<32x64xbf16>
    %cst_11 = arith.constant dense<0.000000e+00> : vector<32x64xf32>
    %19 = tpu.matmul %16, %18, %cst_11 {dimension_numbers = #tpu.dot_dimension_numbers<[1], [0], [0], [1], [0, 0, 1, 1], [], []>} : vector<32x32xbf16>, vector<32x64xbf16>, vector<32x64xf32> -> vector<32x64xf32>
    %20 = arith.addf %14, %19 : vector<32x64xf32>
    %c0_12 = arith.constant 0 : index
    %c0_13 = arith.constant 0 : index
    %21 = vector.load %arg3[%c0_12, %c0_13] : memref<1x64xf32, #tpu.memory_space<vmem>>, vector<1x64xf32>
    %22 = vector.broadcast %21 : vector<1x64xf32> to vector<32x64xf32>
    %23 = arith.addf %20, %22 : vector<32x64xf32>
    %cst_14 = arith.constant dense<0.000000e+00> : vector<32xf32>
    %24 = vector.multi_reduction <add>, %23, %cst_14 [1] : vector<32x64xf32> to vector<32xf32>
    %25 = vector.shape_cast %24 : vector<32xf32> to vector<32x1xf32>
    %cst_15 = arith.constant 6.400000e+01 : f32
    %26 = vector.broadcast %cst_15 : f32 to vector<32x1xf32>
    %27 = arith.divf %25, %26 : vector<32x1xf32>
    %28 = vector.broadcast %27 : vector<32x1xf32> to vector<32x64xf32>
    %29 = arith.subf %23, %28 : vector<32x64xf32>
    %30 = arith.mulf %29, %29 : vector<32x64xf32>
    %cst_16 = arith.constant dense<0.000000e+00> : vector<32xf32>
    %31 = vector.multi_reduction <add>, %30, %cst_16 [1] : vector<32x64xf32> to vector<32xf32>
    %32 = vector.shape_cast %31 : vector<32xf32> to vector<32x1xf32>
    %cst_17 = arith.constant 6.400000e+01 : f32
    %33 = vector.broadcast %cst_17 : f32 to vector<32x1xf32>
    %34 = arith.divf %32, %33 : vector<32x1xf32>
    %35 = vector.broadcast %27 : vector<32x1xf32> to vector<32x64xf32>
    %36 = arith.subf %23, %35 : vector<32x64xf32>
    %cst_18 = arith.constant 9.99999974E-6 : f32
    %37 = vector.broadcast %cst_18 : f32 to vector<32x1xf32>
    %38 = arith.addf %34, %37 : vector<32x1xf32>
    %39 = math.rsqrt %38 : vector<32x1xf32>
    %40 = vector.broadcast %39 : vector<32x1xf32> to vector<32x64xf32>
    %41 = arith.mulf %36, %40 : vector<32x64xf32>
    %c0_19 = arith.constant 0 : index
    %c0_20 = arith.constant 0 : index
    %42 = vector.load %arg4[%c0_19, %c0_20] : memref<1x64xf32, #tpu.memory_space<vmem>>, vector<1x64xf32>
    %43 = vector.broadcast %42 : vector<1x64xf32> to vector<32x64xf32>
    %44 = arith.mulf %41, %43 : vector<32x64xf32>
    %c0_21 = arith.constant 0 : index
    %c0_22 = arith.constant 0 : index
    %45 = vector.load %arg5[%c0_21, %c0_22] : memref<1x64xf32, #tpu.memory_space<vmem>>, vector<1x64xf32>
    %46 = vector.broadcast %45 : vector<1x64xf32> to vector<32x64xf32>
    %47 = arith.addf %44, %46 : vector<32x64xf32>
    %cst_23 = arith.constant 0.000000e+00 : f32
    %48 = vector.broadcast %cst_23 : f32 to vector<32x64xf32>
    %49 = arith.maximumf %47, %48 : vector<32x64xf32>
    %c0_24 = arith.constant 0 : index
    %c0_25 = arith.constant 0 : index
    %c0_26 = arith.constant 0 : index
    %50 = vector.load %arg6[%c0_24, %c0_25, %c0_26] : memref<1x32x64xf32, #tpu.memory_space<vmem>>, vector<1x32x64xf32>
    %51 = vector.shape_cast %50 : vector<1x32x64xf32> to vector<32x64xf32>
    %52 = vector.shape_cast %49 : vector<32x64xf32> to vector<1x32x64xf32>
    tpu.vector_store %arg6[%c0_24, %c0_25, %c0_26], %52 {strides = array<i32>} : memref<1x32x64xf32, #tpu.memory_space<vmem>>, vector<1x32x64xf32>,
    return
  }
  func.func @transform_0(%arg0: i32) -> (i32, i32, i32) {
    %c0_i32 = arith.constant 0 : i32
    %c0_i32_0 = arith.constant 0 : i32
    %c0_i32_1 = arith.constant 0 : i32
    return %arg0, %c0_i32, %c0_i32_0 : i32, i32, i32
  }
  func.func @transform_1(%arg0: i32) -> (i32, i32, i32) {
    %c0_i32 = arith.constant 0 : i32
    %c0_i32_0 = arith.constant 0 : i32
    %c0_i32_1 = arith.constant 0 : i32
    %c0_i32_2 = arith.constant 0 : i32
    return %c0_i32, %c0_i32_0, %c0_i32_1 : i32, i32, i32
  }
  func.func @transform_2(%arg0: i32) -> (i32, i32) {
    %c0_i32 = arith.constant 0 : i32
    %c0_i32_0 = arith.constant 0 : i32
    %c0_i32_1 = arith.constant 0 : i32
    return %c0_i32, %c0_i32_0 : i32, i32
  }
  func.func @transform_3(%arg0: i32) -> (i32, i32) {
    %c0_i32 = arith.constant 0 : i32
    %c0_i32_0 = arith.constant 0 : i32
    %c0_i32_1 = arith.constant 0 : i32
    return %c0_i32, %c0_i32_0 : i32, i32
  }
  func.func @transform_4(%arg0: i32) -> (i32, i32) {
    %c0_i32 = arith.constant 0 : i32
    %c0_i32_0 = arith.constant 0 : i32
    %c0_i32_1 = arith.constant 0 : i32
    return %c0_i32, %c0_i32_0 : i32, i32
  }
  func.func @transform_5(%arg0: i32) -> (i32, i32, i32) {
    %c0_i32 = arith.constant 0 : i32
    %c0_i32_0 = arith.constant 0 : i32
    %c0_i32_1 = arith.constant 0 : i32
    return %arg0, %c0_i32, %c0_i32_0 : i32, i32, i32
  }
}

module attributes {stable_mosaic.version = 11 : i64} {
  func.func @_conv_ln_relu_kernel(%arg0: i32, %arg1: memref<1x34x64xf32, #tpu.memory_space<vmem>>, %arg2: memref<3x64x64xbf16, #tpu.memory_space<vmem>>, %arg3: memref<1x64xf32, #tpu.memory_space<vmem>>, %arg4: memref<1x64xf32, #tpu.memory_space<vmem>>, %arg5: memref<1x64xf32, #tpu.memory_space<vmem>>, %arg6: memref<1x32x64xf32, #tpu.memory_space<vmem>>) attributes {dimension_semantics = [#tpu.dimension_semantics<parallel>], iteration_bounds = array<i64: 2>, scalar_prefetch = 0 : i64, scratch_operands = 0 : i64, tpu.core_type = #tpu.core_type<tc>, window_params = [{transform_indices = @transform_0, window_bounds = array<i64: 1, 34, 64>}, {pipeline_mode = #tpu.pipeline_mode<synchronous>, transform_indices = @transform_1, window_bounds = array<i64: 3, 64, 64>}, {pipeline_mode = #tpu.pipeline_mode<synchronous>, transform_indices = @transform_2, window_bounds = array<i64: 1, 64>}, {pipeline_mode = #tpu.pipeline_mode<synchronous>, transform_indices = @transform_3, window_bounds = array<i64: 1, 64>}, {pipeline_mode = #tpu.pipeline_mode<synchronous>, transform_indices = @transform_4, window_bounds = array<i64: 1, 64>}, {transform_indices = @transform_5, window_bounds = array<i64: 1, 32, 64>}]} {
    %c0 = arith.constant 0 : index
    %c0_0 = arith.constant 0 : index
    %c0_1 = arith.constant 0 : index
    %0 = vector.load %arg1[%c0, %c0_0, %c0_1] : memref<1x34x64xf32, #tpu.memory_space<vmem>>, vector<1x34x64xf32>
    %1 = vector.shape_cast %0 : vector<1x34x64xf32> to vector<34x64xf32>
    %cst = arith.constant 0.000000e+00 : f32
    %2 = vector.broadcast %cst : f32 to vector<32x64xf32>
    %3 = vector.extract_strided_slice %1 {offsets = [0, 0], sizes = [32, 64], strides = [1, 1]} : vector<34x64xf32> to vector<32x64xf32>
    %4 = arith.truncf %3 : vector<32x64xf32> to vector<32x64xbf16>
    %c0_2 = arith.constant 0 : index
    %c0_3 = arith.constant 0 : index
    %c0_4 = arith.constant 0 : index
    %5 = vector.load %arg2[%c0_2, %c0_3, %c0_4] : memref<3x64x64xbf16, #tpu.memory_space<vmem>>, vector<1x64x64xbf16>
    %6 = vector.shape_cast %5 : vector<1x64x64xbf16> to vector<64x64xbf16>
    %cst_5 = arith.constant dense<0.000000e+00> : vector<32x64xf32>
    %7 = tpu.matmul %4, %6, %cst_5 {dimension_numbers = #tpu.dot_dimension_numbers<[1], [0], [0], [1], [0, 0, 1, 1], [], []>} : vector<32x64xbf16>, vector<64x64xbf16>, vector<32x64xf32> -> vector<32x64xf32>
    %8 = arith.addf %2, %7 : vector<32x64xf32>
    %9 = vector.extract_strided_slice %1 {offsets = [1, 0], sizes = [32, 64], strides = [1, 1]} : vector<34x64xf32> to vector<32x64xf32>
    %10 = arith.truncf %9 : vector<32x64xf32> to vector<32x64xbf16>
    %c1 = arith.constant 1 : index
    %c0_6 = arith.constant 0 : index
    %c0_7 = arith.constant 0 : index
    %11 = vector.load %arg2[%c1, %c0_6, %c0_7] : memref<3x64x64xbf16, #tpu.memory_space<vmem>>, vector<1x64x64xbf16>
    %12 = vector.shape_cast %11 : vector<1x64x64xbf16> to vector<64x64xbf16>
    %cst_8 = arith.constant dense<0.000000e+00> : vector<32x64xf32>
    %13 = tpu.matmul %10, %12, %cst_8 {dimension_numbers = #tpu.dot_dimension_numbers<[1], [0], [0], [1], [0, 0, 1, 1], [], []>} : vector<32x64xbf16>, vector<64x64xbf16>, vector<32x64xf32> -> vector<32x64xf32>
    %14 = arith.addf %8, %13 : vector<32x64xf32>
    %15 = vector.extract_strided_slice %1 {offsets = [2, 0], sizes = [32, 64], strides = [1, 1]} : vector<34x64xf32> to vector<32x64xf32>
    %16 = arith.truncf %15 : vector<32x64xf32> to vector<32x64xbf16>
    %c2 = arith.constant 2 : index
    %c0_9 = arith.constant 0 : index
    %c0_10 = arith.constant 0 : index
    %17 = vector.load %arg2[%c2, %c0_9, %c0_10] : memref<3x64x64xbf16, #tpu.memory_space<vmem>>, vector<1x64x64xbf16>
    %18 = vector.shape_cast %17 : vector<1x64x64xbf16> to vector<64x64xbf16>
    %cst_11 = arith.constant dense<0.000000e+00> : vector<32x64xf32>
    %19 = tpu.matmul %16, %18, %cst_11 {dimension_numbers = #tpu.dot_dimension_numbers<[1], [0], [0], [1], [0, 0, 1, 1], [], []>} : vector<32x64xbf16>, vector<64x64xbf16>, vector<32x64xf32> -> vector<32x64xf32>
    %20 = arith.addf %14, %19 : vector<32x64xf32>
    %c0_12 = arith.constant 0 : index
    %c0_13 = arith.constant 0 : index
    %21 = vector.load %arg3[%c0_12, %c0_13] : memref<1x64xf32, #tpu.memory_space<vmem>>, vector<1x64xf32>
    %22 = vector.broadcast %21 : vector<1x64xf32> to vector<32x64xf32>
    %23 = arith.addf %20, %22 : vector<32x64xf32>
    %cst_14 = arith.constant dense<0.000000e+00> : vector<32xf32>
    %24 = vector.multi_reduction <add>, %23, %cst_14 [1] : vector<32x64xf32> to vector<32xf32>
    %25 = vector.shape_cast %24 : vector<32xf32> to vector<32x1xf32>
    %cst_15 = arith.constant 6.400000e+01 : f32
    %26 = vector.broadcast %cst_15 : f32 to vector<32x1xf32>
    %27 = arith.divf %25, %26 : vector<32x1xf32>
    %28 = vector.broadcast %27 : vector<32x1xf32> to vector<32x64xf32>
    %29 = arith.subf %23, %28 : vector<32x64xf32>
    %30 = arith.mulf %29, %29 : vector<32x64xf32>
    %cst_16 = arith.constant dense<0.000000e+00> : vector<32xf32>
    %31 = vector.multi_reduction <add>, %30, %cst_16 [1] : vector<32x64xf32> to vector<32xf32>
    %32 = vector.shape_cast %31 : vector<32xf32> to vector<32x1xf32>
    %cst_17 = arith.constant 6.400000e+01 : f32
    %33 = vector.broadcast %cst_17 : f32 to vector<32x1xf32>
    %34 = arith.divf %32, %33 : vector<32x1xf32>
    %35 = vector.broadcast %27 : vector<32x1xf32> to vector<32x64xf32>
    %36 = arith.subf %23, %35 : vector<32x64xf32>
    %cst_18 = arith.constant 9.99999974E-6 : f32
    %37 = vector.broadcast %cst_18 : f32 to vector<32x1xf32>
    %38 = arith.addf %34, %37 : vector<32x1xf32>
    %39 = math.rsqrt %38 : vector<32x1xf32>
    %40 = vector.broadcast %39 : vector<32x1xf32> to vector<32x64xf32>
    %41 = arith.mulf %36, %40 : vector<32x64xf32>
    %c0_19 = arith.constant 0 : index
    %c0_20 = arith.constant 0 : index
    %42 = vector.load %arg4[%c0_19, %c0_20] : memref<1x64xf32, #tpu.memory_space<vmem>>, vector<1x64xf32>
    %43 = vector.broadcast %42 : vector<1x64xf32> to vector<32x64xf32>
    %44 = arith.mulf %41, %43 : vector<32x64xf32>
    %c0_21 = arith.constant 0 : index
    %c0_22 = arith.constant 0 : index
    %45 = vector.load %arg5[%c0_21, %c0_22] : memref<1x64xf32, #tpu.memory_space<vmem>>, vector<1x64xf32>
    %46 = vector.broadcast %45 : vector<1x64xf32> to vector<32x64xf32>
    %47 = arith.addf %44, %46 : vector<32x64xf32>
    %cst_23 = arith.constant 0.000000e+00 : f32
    %48 = vector.broadcast %cst_23 : f32 to vector<32x64xf32>
    %49 = arith.maximumf %47, %48 : vector<32x64xf32>
    %c0_24 = arith.constant 0 : index
    %c0_25 = arith.constant 0 : index
    %c0_26 = arith.constant 0 : index
    %50 = vector.load %arg6[%c0_24, %c0_25, %c0_26] : memref<1x32x64xf32, #tpu.memory_space<vmem>>, vector<1x32x64xf32>
    %51 = vector.shape_cast %50 : vector<1x32x64xf32> to vector<32x64xf32>
    %52 = vector.shape_cast %49 : vector<32x64xf32> to vector<1x32x64xf32>
    tpu.vector_store %arg6[%c0_24, %c0_25, %c0_26], %52 {strides = array<i32>} : memref<1x32x64xf32, #tpu.memory_space<vmem>>, vector<1x32x64xf32>,
    return
  }
  func.func @transform_0(%arg0: i32) -> (i32, i32, i32) {
    %c0_i32 = arith.constant 0 : i32
    %c0_i32_0 = arith.constant 0 : i32
    %c0_i32_1 = arith.constant 0 : i32
    return %arg0, %c0_i32, %c0_i32_0 : i32, i32, i32
  }
  func.func @transform_1(%arg0: i32) -> (i32, i32, i32) {
    %c0_i32 = arith.constant 0 : i32
    %c0_i32_0 = arith.constant 0 : i32
    %c0_i32_1 = arith.constant 0 : i32
    %c0_i32_2 = arith.constant 0 : i32
    return %c0_i32, %c0_i32_0, %c0_i32_1 : i32, i32, i32
  }
  func.func @transform_2(%arg0: i32) -> (i32, i32) {
    %c0_i32 = arith.constant 0 : i32
    %c0_i32_0 = arith.constant 0 : i32
    %c0_i32_1 = arith.constant 0 : i32
    return %c0_i32, %c0_i32_0 : i32, i32
  }
  func.func @transform_3(%arg0: i32) -> (i32, i32) {
    %c0_i32 = arith.constant 0 : i32
    %c0_i32_0 = arith.constant 0 : i32
    %c0_i32_1 = arith.constant 0 : i32
    return %c0_i32, %c0_i32_0 : i32, i32
  }
  func.func @transform_4(%arg0: i32) -> (i32, i32) {
    %c0_i32 = arith.constant 0 : i32
    %c0_i32_0 = arith.constant 0 : i32
    %c0_i32_1 = arith.constant 0 : i32
    return %c0_i32, %c0_i32_0 : i32, i32
  }
  func.func @transform_5(%arg0: i32) -> (i32, i32, i32) {
    %c0_i32 = arith.constant 0 : i32
    %c0_i32_0 = arith.constant 0 : i32
    %c0_i32_1 = arith.constant 0 : i32
    return %arg0, %c0_i32, %c0_i32_0 : i32, i32, i32
  }
}

module attributes {stable_mosaic.version = 11 : i64} {
  func.func @_linear_kernel(%arg0: i32, %arg1: memref<8x64xf32, #tpu.memory_space<vmem>>, %arg2: memref<64x1xbf16, #tpu.memory_space<vmem>>, %arg3: memref<1x1xf32, #tpu.memory_space<vmem>>, %arg4: memref<8x1xf32, #tpu.memory_space<vmem>>) attributes {dimension_semantics = [#tpu.dimension_semantics<parallel>], iteration_bounds = array<i64: 1>, scalar_prefetch = 0 : i64, scratch_operands = 0 : i64, tpu.core_type = #tpu.core_type<tc>, window_params = [{transform_indices = @transform_0, window_bounds = array<i64: 8, 64>}, {pipeline_mode = #tpu.pipeline_mode<synchronous>, transform_indices = @transform_1, window_bounds = array<i64: 64, 1>}, {pipeline_mode = #tpu.pipeline_mode<synchronous>, transform_indices = @transform_2, window_bounds = array<i64: 1, 1>}, {transform_indices = @transform_3, window_bounds = array<i64: 8, 1>}]} {
    %c0 = arith.constant 0 : index
    %c0_0 = arith.constant 0 : index
    %0 = vector.load %arg1[%c0, %c0_0] : memref<8x64xf32, #tpu.memory_space<vmem>>, vector<8x64xf32>
    %1 = arith.truncf %0 : vector<8x64xf32> to vector<8x64xbf16>
    %c0_1 = arith.constant 0 : index
    %c0_2 = arith.constant 0 : index
    %2 = vector.load %arg2[%c0_1, %c0_2] : memref<64x1xbf16, #tpu.memory_space<vmem>>, vector<64x1xbf16>
    %cst = arith.constant dense<0.000000e+00> : vector<8x1xf32>
    %3 = tpu.matmul %1, %2, %cst {dimension_numbers = #tpu.dot_dimension_numbers<[1], [0], [0], [1], [0, 0, 1, 1], [], []>} : vector<8x64xbf16>, vector<64x1xbf16>, vector<8x1xf32> -> vector<8x1xf32>
    %c0_3 = arith.constant 0 : index
    %c0_4 = arith.constant 0 : index
    %4 = vector.load %arg3[%c0_3, %c0_4] : memref<1x1xf32, #tpu.memory_space<vmem>>, vector<1x1xf32>
    %5 = vector.broadcast %4 : vector<1x1xf32> to vector<8x1xf32>
    %6 = arith.addf %3, %5 : vector<8x1xf32>
    %c0_5 = arith.constant 0 : index
    %c0_6 = arith.constant 0 : index
    %7 = vector.load %arg4[%c0_5, %c0_6] : memref<8x1xf32, #tpu.memory_space<vmem>>, vector<8x1xf32>
    tpu.vector_store %arg4[%c0_5, %c0_6], %6 {strides = array<i32>} : memref<8x1xf32, #tpu.memory_space<vmem>>, vector<8x1xf32>,
    return
  }
  func.func @transform_0(%arg0: i32) -> (i32, i32) {
    %c0_i32 = arith.constant 0 : i32
    %c0_i32_0 = arith.constant 0 : i32
    return %arg0, %c0_i32 : i32, i32
  }
  func.func @transform_1(%arg0: i32) -> (i32, i32) {
    %c0_i32 = arith.constant 0 : i32
    %c0_i32_0 = arith.constant 0 : i32
    %c0_i32_1 = arith.constant 0 : i32
    return %c0_i32, %c0_i32_0 : i32, i32
  }
  func.func @transform_2(%arg0: i32) -> (i32, i32) {
    %c0_i32 = arith.constant 0 : i32
    %c0_i32_0 = arith.constant 0 : i32
    %c0_i32_1 = arith.constant 0 : i32
    return %c0_i32, %c0_i32_0 : i32, i32
  }
  func.func @transform_3(%arg0: i32) -> (i32, i32) {
    %c0_i32 = arith.constant 0 : i32
    %c0_i32_0 = arith.constant 0 : i32
    return %arg0, %c0_i32 : i32, i32
  }
}

module attributes {stable_mosaic.version = 11 : i64} {
  func.func @_linear_kernel(%arg0: i32, %arg1: memref<64x64xf32, #tpu.memory_space<vmem>>, %arg2: memref<64x1xbf16, #tpu.memory_space<vmem>>, %arg3: memref<1x1xf32, #tpu.memory_space<vmem>>, %arg4: memref<64x1xf32, #tpu.memory_space<vmem>>) attributes {dimension_semantics = [#tpu.dimension_semantics<parallel>], iteration_bounds = array<i64: 1>, scalar_prefetch = 0 : i64, scratch_operands = 0 : i64, tpu.core_type = #tpu.core_type<tc>, window_params = [{transform_indices = @transform_0, window_bounds = array<i64: 64, 64>}, {pipeline_mode = #tpu.pipeline_mode<synchronous>, transform_indices = @transform_1, window_bounds = array<i64: 64, 1>}, {pipeline_mode = #tpu.pipeline_mode<synchronous>, transform_indices = @transform_2, window_bounds = array<i64: 1, 1>}, {transform_indices = @transform_3, window_bounds = array<i64: 64, 1>}]} {
    %c0 = arith.constant 0 : index
    %c0_0 = arith.constant 0 : index
    %0 = vector.load %arg1[%c0, %c0_0] : memref<64x64xf32, #tpu.memory_space<vmem>>, vector<64x64xf32>
    %1 = arith.truncf %0 : vector<64x64xf32> to vector<64x64xbf16>
    %c0_1 = arith.constant 0 : index
    %c0_2 = arith.constant 0 : index
    %2 = vector.load %arg2[%c0_1, %c0_2] : memref<64x1xbf16, #tpu.memory_space<vmem>>, vector<64x1xbf16>
    %cst = arith.constant dense<0.000000e+00> : vector<64x1xf32>
    %3 = tpu.matmul %1, %2, %cst {dimension_numbers = #tpu.dot_dimension_numbers<[1], [0], [0], [1], [0, 0, 1, 1], [], []>} : vector<64x64xbf16>, vector<64x1xbf16>, vector<64x1xf32> -> vector<64x1xf32>
    %c0_3 = arith.constant 0 : index
    %c0_4 = arith.constant 0 : index
    %4 = vector.load %arg3[%c0_3, %c0_4] : memref<1x1xf32, #tpu.memory_space<vmem>>, vector<1x1xf32>
    %5 = vector.broadcast %4 : vector<1x1xf32> to vector<64x1xf32>
    %6 = arith.addf %3, %5 : vector<64x1xf32>
    %c0_5 = arith.constant 0 : index
    %c0_6 = arith.constant 0 : index
    %7 = vector.load %arg4[%c0_5, %c0_6] : memref<64x1xf32, #tpu.memory_space<vmem>>, vector<64x1xf32>
    tpu.vector_store %arg4[%c0_5, %c0_6], %6 {strides = array<i32>} : memref<64x1xf32, #tpu.memory_space<vmem>>, vector<64x1xf32>,
    return
  }
  func.func @transform_0(%arg0: i32) -> (i32, i32) {
    %c0_i32 = arith.constant 0 : i32
    %c0_i32_0 = arith.constant 0 : i32
    return %arg0, %c0_i32 : i32, i32
  }
  func.func @transform_1(%arg0: i32) -> (i32, i32) {
    %c0_i32 = arith.constant 0 : i32
    %c0_i32_0 = arith.constant 0 : i32
    %c0_i32_1 = arith.constant 0 : i32
    return %c0_i32, %c0_i32_0 : i32, i32
  }
  func.func @transform_2(%arg0: i32) -> (i32, i32) {
    %c0_i32 = arith.constant 0 : i32
    %c0_i32_0 = arith.constant 0 : i32
    %c0_i32_1 = arith.constant 0 : i32
    return %c0_i32, %c0_i32_0 : i32, i32
  }
  func.func @transform_3(%arg0: i32) -> (i32, i32) {
    %c0_i32 = arith.constant 0 : i32
    %c0_i32_0 = arith.constant 0 : i32
    return %arg0, %c0_i32 : i32, i32
  }
}

module attributes {stable_mosaic.version = 11 : i64} {
  func.func @_mha_block_kernel(%arg0: i32, %arg1: memref<2xi32, #tpu.memory_space<smem>>, %arg2: memref<1x32x32xf32, #tpu.memory_space<vmem>>, %arg3: memref<32x96xbf16, #tpu.memory_space<vmem>>, %arg4: memref<1x96xf32, #tpu.memory_space<vmem>>, %arg5: memref<32x32xbf16, #tpu.memory_space<vmem>>, %arg6: memref<1x32xf32, #tpu.memory_space<vmem>>, %arg7: memref<1x32xf32, #tpu.memory_space<vmem>>, %arg8: memref<1x32xf32, #tpu.memory_space<vmem>>, %arg9: memref<1x32x32xf32, #tpu.memory_space<vmem>>) attributes {dimension_semantics = [#tpu.dimension_semantics<parallel>], iteration_bounds = array<i64: 2>, scalar_prefetch = 1 : i64, scratch_operands = 0 : i64, tpu.core_type = #tpu.core_type<tc>, window_params = [{transform_indices = @transform_0, window_bounds = array<i64: 1, 32, 32>}, {pipeline_mode = #tpu.pipeline_mode<synchronous>, transform_indices = @transform_1, window_bounds = array<i64: 32, 96>}, {pipeline_mode = #tpu.pipeline_mode<synchronous>, transform_indices = @transform_2, window_bounds = array<i64: 1, 96>}, {pipeline_mode = #tpu.pipeline_mode<synchronous>, transform_indices = @transform_3, window_bounds = array<i64: 32, 32>}, {pipeline_mode = #tpu.pipeline_mode<synchronous>, transform_indices = @transform_4, window_bounds = array<i64: 1, 32>}, {pipeline_mode = #tpu.pipeline_mode<synchronous>, transform_indices = @transform_5, window_bounds = array<i64: 1, 32>}, {pipeline_mode = #tpu.pipeline_mode<synchronous>, transform_indices = @transform_6, window_bounds = array<i64: 1, 32>}, {transform_indices = @transform_7, window_bounds = array<i64: 1, 32, 32>}]} {
    %0 = arith.index_cast %arg0 : i32 to index
    %1 = memref.load %arg1[%0] : memref<2xi32, #tpu.memory_space<smem>>
    %c0 = arith.constant 0 : index
    %c0_0 = arith.constant 0 : index
    %c0_1 = arith.constant 0 : index
    %2 = vector.load %arg2[%c0, %c0_0, %c0_1] : memref<1x32x32xf32, #tpu.memory_space<vmem>>, vector<1x32x32xf32>
    %3 = vector.shape_cast %2 : vector<1x32x32xf32> to vector<32x32xf32>
    %4 = arith.truncf %3 : vector<32x32xf32> to vector<32x32xbf16>
    %c0_2 = arith.constant 0 : index
    %c0_3 = arith.constant 0 : index
    %5 = vector.load %arg3[%c0_2, %c0_3] : memref<32x96xbf16, #tpu.memory_space<vmem>>, vector<32x96xbf16>
    %cst = arith.constant dense<0.000000e+00> : vector<32x96xf32>
    %6 = tpu.matmul %4, %5, %cst {dimension_numbers = #tpu.dot_dimension_numbers<[1], [0], [0], [1], [0, 0, 1, 1], [], []>} : vector<32x32xbf16>, vector<32x96xbf16>, vector<32x96xf32> -> vector<32x96xf32>
    %c0_4 = arith.constant 0 : index
    %c0_5 = arith.constant 0 : index
    %7 = vector.load %arg4[%c0_4, %c0_5] : memref<1x96xf32, #tpu.memory_space<vmem>>, vector<1x96xf32>
    %8 = vector.broadcast %7 : vector<1x96xf32> to vector<32x96xf32>
    %9 = arith.addf %6, %8 : vector<32x96xf32>
    %10 = vector.extract_strided_slice %9 {offsets = [0, 0], sizes = [32, 32], strides = [1, 1]} : vector<32x96xf32> to vector<32x32xf32>
    %11 = vector.extract_strided_slice %9 {offsets = [0, 32], sizes = [32, 32], strides = [1, 1]} : vector<32x96xf32> to vector<32x32xf32>
    %12 = vector.extract_strided_slice %9 {offsets = [0, 64], sizes = [32, 32], strides = [1, 1]} : vector<32x96xf32> to vector<32x32xf32>
    %13 = tpu.iota {dimensions = array<i32: 1>} : vector<32x32xi32>
    %14 = vector.broadcast %1 : i32 to vector<32x32xi32>
    %15 = arith.cmpi slt, %13, %14 : vector<32x32xi32>
    %cst_6 = arith.constant 0.000000e+00 : f32
    %cst_7 = arith.constant -1.000000e+09 : f32
    %16 = vector.broadcast %cst_6 : f32 to vector<32x32xf32>
    %17 = vector.broadcast %cst_7 : f32 to vector<32x32xf32>
    %18 = arith.select %15, %16, %17 : vector<32x32xi1>, vector<32x32xf32>
    %19 = vector.extract_strided_slice %10 {offsets = [0, 0], sizes = [32, 16], strides = [1, 1]} : vector<32x32xf32> to vector<32x16xf32>
    %20 = arith.truncf %19 : vector<32x16xf32> to vector<32x16xbf16>
    %21 = vector.extract_strided_slice %11 {offsets = [0, 0], sizes = [32, 16], strides = [1, 1]} : vector<32x32xf32> to vector<32x16xf32>
    %22 = arith.truncf %21 : vector<32x16xf32> to vector<32x16xbf16>
    %23 = vector.extract_strided_slice %12 {offsets = [0, 0], sizes = [32, 16], strides = [1, 1]} : vector<32x32xf32> to vector<32x16xf32>
    %24 = arith.truncf %23 : vector<32x16xf32> to vector<32x16xbf16>
    %cst_8 = arith.constant dense<0.000000e+00> : vector<32x32xf32>
    %25 = tpu.matmul %20, %22, %cst_8 {dimension_numbers = #tpu.dot_dimension_numbers<[1], [1], [0], [0], [0, 0, 1, 0], [], []>} : vector<32x16xbf16>, vector<32x16xbf16>, vector<32x32xf32> -> vector<32x32xf32>
    %cst_9 = arith.constant 2.500000e-01 : f32
    %26 = vector.broadcast %cst_9 : f32 to vector<32x32xf32>
    %27 = arith.mulf %25, %26 : vector<32x32xf32>
    %28 = arith.addf %27, %18 : vector<32x32xf32>
    %cst_10 = arith.constant dense<0xFF800000> : vector<32xf32>
    %29 = vector.multi_reduction <maximumf>, %28, %cst_10 [1] : vector<32x32xf32> to vector<32xf32>
    %30 = vector.shape_cast %29 : vector<32xf32> to vector<32x1xf32>
    %31 = vector.broadcast %30 : vector<32x1xf32> to vector<32x32xf32>
    %32 = arith.subf %28, %31 : vector<32x32xf32>
    %33 = math.exp %32 : vector<32x32xf32>
    %cst_11 = arith.constant dense<0.000000e+00> : vector<32xf32>
    %34 = vector.multi_reduction <add>, %33, %cst_11 [1] : vector<32x32xf32> to vector<32xf32>
    %35 = vector.shape_cast %34 : vector<32xf32> to vector<32x1xf32>
    %36 = tpu.reciprocal %35 {approx = true} : vector<32x1xf32> -> vector<32x1xf32>
    %37 = vector.broadcast %36 : vector<32x1xf32> to vector<32x32xf32>
    %38 = arith.mulf %33, %37 : vector<32x32xf32>
    %39 = arith.truncf %38 : vector<32x32xf32> to vector<32x32xbf16>
    %cst_12 = arith.constant dense<0.000000e+00> : vector<32x16xf32>
    %40 = tpu.matmul %39, %24, %cst_12 {dimension_numbers = #tpu.dot_dimension_numbers<[1], [0], [0], [1], [0, 0, 1, 1], [], []>} : vector<32x32xbf16>, vector<32x16xbf16>, vector<32x16xf32> -> vector<32x16xf32>
    %41 = vector.extract_strided_slice %10 {offsets = [0, 16], sizes = [32, 16], strides = [1, 1]} : vector<32x32xf32> to vector<32x16xf32>
    %42 = arith.truncf %41 : vector<32x16xf32> to vector<32x16xbf16>
    %43 = vector.extract_strided_slice %11 {offsets = [0, 16], sizes = [32, 16], strides = [1, 1]} : vector<32x32xf32> to vector<32x16xf32>
    %44 = arith.truncf %43 : vector<32x16xf32> to vector<32x16xbf16>
    %45 = vector.extract_strided_slice %12 {offsets = [0, 16], sizes = [32, 16], strides = [1, 1]} : vector<32x32xf32> to vector<32x16xf32>
    %46 = arith.truncf %45 : vector<32x16xf32> to vector<32x16xbf16>
    %cst_13 = arith.constant dense<0.000000e+00> : vector<32x32xf32>
    %47 = tpu.matmul %42, %44, %cst_13 {dimension_numbers = #tpu.dot_dimension_numbers<[1], [1], [0], [0], [0, 0, 1, 0], [], []>} : vector<32x16xbf16>, vector<32x16xbf16>, vector<32x32xf32> -> vector<32x32xf32>
    %cst_14 = arith.constant 2.500000e-01 : f32
    %48 = vector.broadcast %cst_14 : f32 to vector<32x32xf32>
    %49 = arith.mulf %47, %48 : vector<32x32xf32>
    %50 = arith.addf %49, %18 : vector<32x32xf32>
    %cst_15 = arith.constant dense<0xFF800000> : vector<32xf32>
    %51 = vector.multi_reduction <maximumf>, %50, %cst_15 [1] : vector<32x32xf32> to vector<32xf32>
    %52 = vector.shape_cast %51 : vector<32xf32> to vector<32x1xf32>
    %53 = vector.broadcast %52 : vector<32x1xf32> to vector<32x32xf32>
    %54 = arith.subf %50, %53 : vector<32x32xf32>
    %55 = math.exp %54 : vector<32x32xf32>
    %cst_16 = arith.constant dense<0.000000e+00> : vector<32xf32>
    %56 = vector.multi_reduction <add>, %55, %cst_16 [1] : vector<32x32xf32> to vector<32xf32>
    %57 = vector.shape_cast %56 : vector<32xf32> to vector<32x1xf32>
    %58 = tpu.reciprocal %57 {approx = true} : vector<32x1xf32> -> vector<32x1xf32>
    %59 = vector.broadcast %58 : vector<32x1xf32> to vector<32x32xf32>
    %60 = arith.mulf %55, %59 : vector<32x32xf32>
    %61 = arith.truncf %60 : vector<32x32xf32> to vector<32x32xbf16>
    %cst_17 = arith.constant dense<0.000000e+00> : vector<32x16xf32>
    %62 = tpu.matmul %61, %46, %cst_17 {dimension_numbers = #tpu.dot_dimension_numbers<[1], [0], [0], [1], [0, 0, 1, 1], [], []>} : vector<32x32xbf16>, vector<32x16xbf16>, vector<32x16xf32> -> vector<32x16xf32>
    %63 = tpu.concatenate %40, %62 in 1 : vector<32x16xf32>, vector<32x16xf32> -> vector<32x32xf32>
    %64 = arith.truncf %63 : vector<32x32xf32> to vector<32x32xbf16>
    %c0_18 = arith.constant 0 : index
    %c0_19 = arith.constant 0 : index
    %65 = vector.load %arg5[%c0_18, %c0_19] : memref<32x32xbf16, #tpu.memory_space<vmem>>, vector<32x32xbf16>
    %cst_20 = arith.constant dense<0.000000e+00> : vector<32x32xf32>
    %66 = tpu.matmul %64, %65, %cst_20 {dimension_numbers = #tpu.dot_dimension_numbers<[1], [0], [0], [1], [0, 0, 1, 1], [], []>} : vector<32x32xbf16>, vector<32x32xbf16>, vector<32x32xf32> -> vector<32x32xf32>
    %c0_21 = arith.constant 0 : index
    %c0_22 = arith.constant 0 : index
    %67 = vector.load %arg6[%c0_21, %c0_22] : memref<1x32xf32, #tpu.memory_space<vmem>>, vector<1x32xf32>
    %68 = vector.broadcast %67 : vector<1x32xf32> to vector<32x32xf32>
    %69 = arith.addf %66, %68 : vector<32x32xf32>
    %70 = arith.addf %69, %3 : vector<32x32xf32>
    %cst_23 = arith.constant dense<0.000000e+00> : vector<32xf32>
    %71 = vector.multi_reduction <add>, %70, %cst_23 [1] : vector<32x32xf32> to vector<32xf32>
    %72 = vector.shape_cast %71 : vector<32xf32> to vector<32x1xf32>
    %cst_24 = arith.constant 3.200000e+01 : f32
    %73 = vector.broadcast %cst_24 : f32 to vector<32x1xf32>
    %74 = arith.divf %72, %73 : vector<32x1xf32>
    %75 = vector.broadcast %74 : vector<32x1xf32> to vector<32x32xf32>
    %76 = arith.subf %70, %75 : vector<32x32xf32>
    %77 = arith.mulf %76, %76 : vector<32x32xf32>
    %cst_25 = arith.constant dense<0.000000e+00> : vector<32xf32>
    %78 = vector.multi_reduction <add>, %77, %cst_25 [1] : vector<32x32xf32> to vector<32xf32>
    %79 = vector.shape_cast %78 : vector<32xf32> to vector<32x1xf32>
    %cst_26 = arith.constant 3.200000e+01 : f32
    %80 = vector.broadcast %cst_26 : f32 to vector<32x1xf32>
    %81 = arith.divf %79, %80 : vector<32x1xf32>
    %82 = vector.broadcast %74 : vector<32x1xf32> to vector<32x32xf32>
    %83 = arith.subf %70, %82 : vector<32x32xf32>
    %cst_27 = arith.constant 9.99999974E-6 : f32
    %84 = vector.broadcast %cst_27 : f32 to vector<32x1xf32>
    %85 = arith.addf %81, %84 : vector<32x1xf32>
    %86 = math.rsqrt %85 : vector<32x1xf32>
    %87 = vector.broadcast %86 : vector<32x1xf32> to vector<32x32xf32>
    %88 = arith.mulf %83, %87 : vector<32x32xf32>
    %c0_28 = arith.constant 0 : index
    %c0_29 = arith.constant 0 : index
    %89 = vector.load %arg7[%c0_28, %c0_29] : memref<1x32xf32, #tpu.memory_space<vmem>>, vector<1x32xf32>
    %90 = vector.broadcast %89 : vector<1x32xf32> to vector<32x32xf32>
    %91 = arith.mulf %88, %90 : vector<32x32xf32>
    %c0_30 = arith.constant 0 : index
    %c0_31 = arith.constant 0 : index
    %92 = vector.load %arg8[%c0_30, %c0_31] : memref<1x32xf32, #tpu.memory_space<vmem>>, vector<1x32xf32>
    %93 = vector.broadcast %92 : vector<1x32xf32> to vector<32x32xf32>
    %94 = arith.addf %91, %93 : vector<32x32xf32>
    %95 = tpu.iota {dimensions = array<i32: 0>} : vector<32x1xi32>
    %96 = vector.broadcast %1 : i32 to vector<32x1xi32>
    %97 = arith.cmpi slt, %95, %96 : vector<32x1xi32>
    %98 = arith.extui %97 : vector<32x1xi1> to vector<32x1xi32>
    %99 = arith.sitofp %98 : vector<32x1xi32> to vector<32x1xf32>
    %100 = vector.broadcast %99 : vector<32x1xf32> to vector<32x32xf32>
    %101 = arith.mulf %94, %100 : vector<32x32xf32>
    %c0_32 = arith.constant 0 : index
    %c0_33 = arith.constant 0 : index
    %c0_34 = arith.constant 0 : index
    %102 = vector.load %arg9[%c0_32, %c0_33, %c0_34] : memref<1x32x32xf32, #tpu.memory_space<vmem>>, vector<1x32x32xf32>
    %103 = vector.shape_cast %102 : vector<1x32x32xf32> to vector<32x32xf32>
    %104 = vector.shape_cast %101 : vector<32x32xf32> to vector<1x32x32xf32>
    tpu.vector_store %arg9[%c0_32, %c0_33, %c0_34], %104 {strides = array<i32>} : memref<1x32x32xf32, #tpu.memory_space<vmem>>, vector<1x32x32xf32>,
    return
  }
  func.func @transform_0(%arg0: i32, %arg1: memref<2xi32, #tpu.memory_space<smem>>) -> (i32, i32, i32) {
    %c0_i32 = arith.constant 0 : i32
    %c0_i32_0 = arith.constant 0 : i32
    %c0_i32_1 = arith.constant 0 : i32
    return %arg0, %c0_i32, %c0_i32_0 : i32, i32, i32
  }
  func.func @transform_1(%arg0: i32, %arg1: memref<2xi32, #tpu.memory_space<smem>>) -> (i32, i32) {
    %c0_i32 = arith.constant 0 : i32
    %c0_i32_0 = arith.constant 0 : i32
    %c0_i32_1 = arith.constant 0 : i32
    return %c0_i32, %c0_i32_0 : i32, i32
  }
  func.func @transform_2(%arg0: i32, %arg1: memref<2xi32, #tpu.memory_space<smem>>) -> (i32, i32) {
    %c0_i32 = arith.constant 0 : i32
    %c0_i32_0 = arith.constant 0 : i32
    %c0_i32_1 = arith.constant 0 : i32
    return %c0_i32, %c0_i32_0 : i32, i32
  }
  func.func @transform_3(%arg0: i32, %arg1: memref<2xi32, #tpu.memory_space<smem>>) -> (i32, i32) {
    %c0_i32 = arith.constant 0 : i32
    %c0_i32_0 = arith.constant 0 : i32
    %c0_i32_1 = arith.constant 0 : i32
    return %c0_i32, %c0_i32_0 : i32, i32
  }
  func.func @transform_4(%arg0: i32, %arg1: memref<2xi32, #tpu.memory_space<smem>>) -> (i32, i32) {
    %c0_i32 = arith.constant 0 : i32
    %c0_i32_0 = arith.constant 0 : i32
    %c0_i32_1 = arith.constant 0 : i32
    return %c0_i32, %c0_i32_0 : i32, i32
  }
  func.func @transform_5(%arg0: i32, %arg1: memref<2xi32, #tpu.memory_space<smem>>) -> (i32, i32) {
    %c0_i32 = arith.constant 0 : i32
    %c0_i32_0 = arith.constant 0 : i32
    %c0_i32_1 = arith.constant 0 : i32
    return %c0_i32, %c0_i32_0 : i32, i32
  }
  func.func @transform_6(%arg0: i32, %arg1: memref<2xi32, #tpu.memory_space<smem>>) -> (i32, i32) {
    %c0_i32 = arith.constant 0 : i32
    %c0_i32_0 = arith.constant 0 : i32
    %c0_i32_1 = arith.constant 0 : i32
    return %c0_i32, %c0_i32_0 : i32, i32
  }
  func.func @transform_7(%arg0: i32, %arg1: memref<2xi32, #tpu.memory_space<smem>>) -> (i32, i32, i32) {
    %c0_i32 = arith.constant 0 : i32
    %c0_i32_0 = arith.constant 0 : i32
    %c0_i32_1 = arith.constant 0 : i32
    return %arg0, %c0_i32, %c0_i32_0 : i32, i32, i32
  }
}

module attributes {stable_mosaic.version = 11 : i64} {
  func.func @_ffn_block_kernel(%arg0: i32, %arg1: memref<2xi32, #tpu.memory_space<smem>>, %arg2: memref<1x40x32xf32, #tpu.memory_space<vmem>>, %arg3: memref<9x32x64xbf16, #tpu.memory_space<vmem>>, %arg4: memref<1x64xf32, #tpu.memory_space<vmem>>, %arg5: memref<1x64x32xbf16, #tpu.memory_space<vmem>>, %arg6: memref<1x32xf32, #tpu.memory_space<vmem>>, %arg7: memref<1x32xf32, #tpu.memory_space<vmem>>, %arg8: memref<1x32xf32, #tpu.memory_space<vmem>>, %arg9: memref<1x32x32xf32, #tpu.memory_space<vmem>>, %arg10: memref<32x64xf32, #tpu.memory_space<vmem>>) attributes {dimension_semantics = [#tpu.dimension_semantics<parallel>], iteration_bounds = array<i64: 2>, scalar_prefetch = 1 : i64, scratch_operands = 1 : i64, tpu.core_type = #tpu.core_type<tc>, window_params = [{transform_indices = @transform_0, window_bounds = array<i64: 1, 40, 32>}, {pipeline_mode = #tpu.pipeline_mode<synchronous>, transform_indices = @transform_1, window_bounds = array<i64: 9, 32, 64>}, {pipeline_mode = #tpu.pipeline_mode<synchronous>, transform_indices = @transform_2, window_bounds = array<i64: 1, 64>}, {pipeline_mode = #tpu.pipeline_mode<synchronous>, transform_indices = @transform_3, window_bounds = array<i64: 1, 64, 32>}, {pipeline_mode = #tpu.pipeline_mode<synchronous>, transform_indices = @transform_4, window_bounds = array<i64: 1, 32>}, {pipeline_mode = #tpu.pipeline_mode<synchronous>, transform_indices = @transform_5, window_bounds = array<i64: 1, 32>}, {pipeline_mode = #tpu.pipeline_mode<synchronous>, transform_indices = @transform_6, window_bounds = array<i64: 1, 32>}, {transform_indices = @transform_7, window_bounds = array<i64: 1, 32, 32>}]} {
    %0 = arith.index_cast %arg0 : i32 to index
    %1 = memref.load %arg1[%0] : memref<2xi32, #tpu.memory_space<smem>>
    %c0 = arith.constant 0 : index
    %c0_0 = arith.constant 0 : index
    %c0_1 = arith.constant 0 : index
    %2 = vector.load %arg2[%c0, %c0_0, %c0_1] : memref<1x40x32xf32, #tpu.memory_space<vmem>>, vector<1x40x32xf32>
    %3 = vector.shape_cast %2 : vector<1x40x32xf32> to vector<40x32xf32>
    %cst = arith.constant 0.000000e+00 : f32
    %4 = vector.broadcast %cst : f32 to vector<32x64xf32>
    %5 = vector.extract_strided_slice %3 {offsets = [0, 0], sizes = [32, 32], strides = [1, 1]} : vector<40x32xf32> to vector<32x32xf32>
    %6 = arith.truncf %5 : vector<32x32xf32> to vector<32x32xbf16>
    %c0_2 = arith.constant 0 : index
    %c0_3 = arith.constant 0 : index
    %c0_4 = arith.constant 0 : index
    %7 = vector.load %arg3[%c0_2, %c0_3, %c0_4] : memref<9x32x64xbf16, #tpu.memory_space<vmem>>, vector<1x32x64xbf16>
    %8 = vector.shape_cast %7 : vector<1x32x64xbf16> to vector<32x64xbf16>
    %cst_5 = arith.constant dense<0.000000e+00> : vector<32x64xf32>
    %9 = tpu.matmul %6, %8, %cst_5 {dimension_numbers = #tpu.dot_dimension_numbers<[1], [0], [0], [1], [0, 0, 1, 1], [], []>} : vector<32x32xbf16>, vector<32x64xbf16>, vector<32x64xf32> -> vector<32x64xf32>
    %10 = arith.addf %4, %9 : vector<32x64xf32>
    %11 = vector.extract_strided_slice %3 {offsets = [1, 0], sizes = [32, 32], strides = [1, 1]} : vector<40x32xf32> to vector<32x32xf32>
    %12 = arith.truncf %11 : vector<32x32xf32> to vector<32x32xbf16>
    %c1 = arith.constant 1 : index
    %c0_6 = arith.constant 0 : index
    %c0_7 = arith.constant 0 : index
    %13 = vector.load %arg3[%c1, %c0_6, %c0_7] : memref<9x32x64xbf16, #tpu.memory_space<vmem>>, vector<1x32x64xbf16>
    %14 = vector.shape_cast %13 : vector<1x32x64xbf16> to vector<32x64xbf16>
    %cst_8 = arith.constant dense<0.000000e+00> : vector<32x64xf32>
    %15 = tpu.matmul %12, %14, %cst_8 {dimension_numbers = #tpu.dot_dimension_numbers<[1], [0], [0], [1], [0, 0, 1, 1], [], []>} : vector<32x32xbf16>, vector<32x64xbf16>, vector<32x64xf32> -> vector<32x64xf32>
    %16 = arith.addf %10, %15 : vector<32x64xf32>
    %17 = vector.extract_strided_slice %3 {offsets = [2, 0], sizes = [32, 32], strides = [1, 1]} : vector<40x32xf32> to vector<32x32xf32>
    %18 = arith.truncf %17 : vector<32x32xf32> to vector<32x32xbf16>
    %c2 = arith.constant 2 : index
    %c0_9 = arith.constant 0 : index
    %c0_10 = arith.constant 0 : index
    %19 = vector.load %arg3[%c2, %c0_9, %c0_10] : memref<9x32x64xbf16, #tpu.memory_space<vmem>>, vector<1x32x64xbf16>
    %20 = vector.shape_cast %19 : vector<1x32x64xbf16> to vector<32x64xbf16>
    %cst_11 = arith.constant dense<0.000000e+00> : vector<32x64xf32>
    %21 = tpu.matmul %18, %20, %cst_11 {dimension_numbers = #tpu.dot_dimension_numbers<[1], [0], [0], [1], [0, 0, 1, 1], [], []>} : vector<32x32xbf16>, vector<32x64xbf16>, vector<32x64xf32> -> vector<32x64xf32>
    %22 = arith.addf %16, %21 : vector<32x64xf32>
    %23 = vector.extract_strided_slice %3 {offsets = [3, 0], sizes = [32, 32], strides = [1, 1]} : vector<40x32xf32> to vector<32x32xf32>
    %24 = arith.truncf %23 : vector<32x32xf32> to vector<32x32xbf16>
    %c3 = arith.constant 3 : index
    %c0_12 = arith.constant 0 : index
    %c0_13 = arith.constant 0 : index
    %25 = vector.load %arg3[%c3, %c0_12, %c0_13] : memref<9x32x64xbf16, #tpu.memory_space<vmem>>, vector<1x32x64xbf16>
    %26 = vector.shape_cast %25 : vector<1x32x64xbf16> to vector<32x64xbf16>
    %cst_14 = arith.constant dense<0.000000e+00> : vector<32x64xf32>
    %27 = tpu.matmul %24, %26, %cst_14 {dimension_numbers = #tpu.dot_dimension_numbers<[1], [0], [0], [1], [0, 0, 1, 1], [], []>} : vector<32x32xbf16>, vector<32x64xbf16>, vector<32x64xf32> -> vector<32x64xf32>
    %28 = arith.addf %22, %27 : vector<32x64xf32>
    %29 = vector.extract_strided_slice %3 {offsets = [4, 0], sizes = [32, 32], strides = [1, 1]} : vector<40x32xf32> to vector<32x32xf32>
    %30 = arith.truncf %29 : vector<32x32xf32> to vector<32x32xbf16>
    %c4 = arith.constant 4 : index
    %c0_15 = arith.constant 0 : index
    %c0_16 = arith.constant 0 : index
    %31 = vector.load %arg3[%c4, %c0_15, %c0_16] : memref<9x32x64xbf16, #tpu.memory_space<vmem>>, vector<1x32x64xbf16>
    %32 = vector.shape_cast %31 : vector<1x32x64xbf16> to vector<32x64xbf16>
    %cst_17 = arith.constant dense<0.000000e+00> : vector<32x64xf32>
    %33 = tpu.matmul %30, %32, %cst_17 {dimension_numbers = #tpu.dot_dimension_numbers<[1], [0], [0], [1], [0, 0, 1, 1], [], []>} : vector<32x32xbf16>, vector<32x64xbf16>, vector<32x64xf32> -> vector<32x64xf32>
    %34 = arith.addf %28, %33 : vector<32x64xf32>
    %35 = vector.extract_strided_slice %3 {offsets = [5, 0], sizes = [32, 32], strides = [1, 1]} : vector<40x32xf32> to vector<32x32xf32>
    %36 = arith.truncf %35 : vector<32x32xf32> to vector<32x32xbf16>
    %c5 = arith.constant 5 : index
    %c0_18 = arith.constant 0 : index
    %c0_19 = arith.constant 0 : index
    %37 = vector.load %arg3[%c5, %c0_18, %c0_19] : memref<9x32x64xbf16, #tpu.memory_space<vmem>>, vector<1x32x64xbf16>
    %38 = vector.shape_cast %37 : vector<1x32x64xbf16> to vector<32x64xbf16>
    %cst_20 = arith.constant dense<0.000000e+00> : vector<32x64xf32>
    %39 = tpu.matmul %36, %38, %cst_20 {dimension_numbers = #tpu.dot_dimension_numbers<[1], [0], [0], [1], [0, 0, 1, 1], [], []>} : vector<32x32xbf16>, vector<32x64xbf16>, vector<32x64xf32> -> vector<32x64xf32>
    %40 = arith.addf %34, %39 : vector<32x64xf32>
    %41 = vector.extract_strided_slice %3 {offsets = [6, 0], sizes = [32, 32], strides = [1, 1]} : vector<40x32xf32> to vector<32x32xf32>
    %42 = arith.truncf %41 : vector<32x32xf32> to vector<32x32xbf16>
    %c6 = arith.constant 6 : index
    %c0_21 = arith.constant 0 : index
    %c0_22 = arith.constant 0 : index
    %43 = vector.load %arg3[%c6, %c0_21, %c0_22] : memref<9x32x64xbf16, #tpu.memory_space<vmem>>, vector<1x32x64xbf16>
    %44 = vector.shape_cast %43 : vector<1x32x64xbf16> to vector<32x64xbf16>
    %cst_23 = arith.constant dense<0.000000e+00> : vector<32x64xf32>
    %45 = tpu.matmul %42, %44, %cst_23 {dimension_numbers = #tpu.dot_dimension_numbers<[1], [0], [0], [1], [0, 0, 1, 1], [], []>} : vector<32x32xbf16>, vector<32x64xbf16>, vector<32x64xf32> -> vector<32x64xf32>
    %46 = arith.addf %40, %45 : vector<32x64xf32>
    %47 = vector.extract_strided_slice %3 {offsets = [7, 0], sizes = [32, 32], strides = [1, 1]} : vector<40x32xf32> to vector<32x32xf32>
    %48 = arith.truncf %47 : vector<32x32xf32> to vector<32x32xbf16>
    %c7 = arith.constant 7 : index
    %c0_24 = arith.constant 0 : index
    %c0_25 = arith.constant 0 : index
    %49 = vector.load %arg3[%c7, %c0_24, %c0_25] : memref<9x32x64xbf16, #tpu.memory_space<vmem>>, vector<1x32x64xbf16>
    %50 = vector.shape_cast %49 : vector<1x32x64xbf16> to vector<32x64xbf16>
    %cst_26 = arith.constant dense<0.000000e+00> : vector<32x64xf32>
    %51 = tpu.matmul %48, %50, %cst_26 {dimension_numbers = #tpu.dot_dimension_numbers<[1], [0], [0], [1], [0, 0, 1, 1], [], []>} : vector<32x32xbf16>, vector<32x64xbf16>, vector<32x64xf32> -> vector<32x64xf32>
    %52 = arith.addf %46, %51 : vector<32x64xf32>
    %53 = vector.extract_strided_slice %3 {offsets = [8, 0], sizes = [32, 32], strides = [1, 1]} : vector<40x32xf32> to vector<32x32xf32>
    %54 = arith.truncf %53 : vector<32x32xf32> to vector<32x32xbf16>
    %c8 = arith.constant 8 : index
    %c0_27 = arith.constant 0 : index
    %c0_28 = arith.constant 0 : index
    %55 = vector.load %arg3[%c8, %c0_27, %c0_28] : memref<9x32x64xbf16, #tpu.memory_space<vmem>>, vector<1x32x64xbf16>
    %56 = vector.shape_cast %55 : vector<1x32x64xbf16> to vector<32x64xbf16>
    %cst_29 = arith.constant dense<0.000000e+00> : vector<32x64xf32>
    %57 = tpu.matmul %54, %56, %cst_29 {dimension_numbers = #tpu.dot_dimension_numbers<[1], [0], [0], [1], [0, 0, 1, 1], [], []>} : vector<32x32xbf16>, vector<32x64xbf16>, vector<32x64xf32> -> vector<32x64xf32>
    %58 = arith.addf %52, %57 : vector<32x64xf32>
    %c0_30 = arith.constant 0 : index
    %c0_31 = arith.constant 0 : index
    %59 = vector.load %arg4[%c0_30, %c0_31] : memref<1x64xf32, #tpu.memory_space<vmem>>, vector<1x64xf32>
    %60 = vector.broadcast %59 : vector<1x64xf32> to vector<32x64xf32>
    %61 = arith.addf %58, %60 : vector<32x64xf32>
    %cst_32 = arith.constant 0.000000e+00 : f32
    %62 = vector.broadcast %cst_32 : f32 to vector<32x64xf32>
    %63 = arith.maximumf %61, %62 : vector<32x64xf32>
    %c0_33 = arith.constant 0 : index
    %c0_34 = arith.constant 0 : index
    %64 = vector.load %arg10[%c0_33, %c0_34] : memref<32x64xf32, #tpu.memory_space<vmem>>, vector<32x64xf32>
    tpu.vector_store %arg10[%c0_33, %c0_34], %63 {strides = array<i32>} : memref<32x64xf32, #tpu.memory_space<vmem>>, vector<32x64xf32>,
    %cst_35 = arith.constant 0.000000e+00 : f32
    %65 = vector.broadcast %cst_35 : f32 to vector<32x32xf32>
    %c0_36 = arith.constant 0 : index
    %c0_37 = arith.constant 0 : index
    %66 = vector.load %arg10[%c0_36, %c0_37] : memref<32x64xf32, #tpu.memory_space<vmem>>, vector<32x64xf32>
    %67 = arith.truncf %66 : vector<32x64xf32> to vector<32x64xbf16>
    %c0_38 = arith.constant 0 : index
    %c0_39 = arith.constant 0 : index
    %c0_40 = arith.constant 0 : index
    %68 = vector.load %arg5[%c0_38, %c0_39, %c0_40] : memref<1x64x32xbf16, #tpu.memory_space<vmem>>, vector<1x64x32xbf16>
    %69 = vector.shape_cast %68 : vector<1x64x32xbf16> to vector<64x32xbf16>
    %cst_41 = arith.constant dense<0.000000e+00> : vector<32x32xf32>
    %70 = tpu.matmul %67, %69, %cst_41 {dimension_numbers = #tpu.dot_dimension_numbers<[1], [0], [0], [1], [0, 0, 1, 1], [], []>} : vector<32x64xbf16>, vector<64x32xbf16>, vector<32x32xf32> -> vector<32x32xf32>
    %71 = arith.addf %65, %70 : vector<32x32xf32>
    %c0_42 = arith.constant 0 : index
    %c0_43 = arith.constant 0 : index
    %72 = vector.load %arg6[%c0_42, %c0_43] : memref<1x32xf32, #tpu.memory_space<vmem>>, vector<1x32xf32>
    %73 = vector.broadcast %72 : vector<1x32xf32> to vector<32x32xf32>
    %74 = arith.addf %71, %73 : vector<32x32xf32>
    %75 = vector.extract_strided_slice %3 {offsets = [4, 0], sizes = [32, 32], strides = [1, 1]} : vector<40x32xf32> to vector<32x32xf32>
    %76 = arith.addf %74, %75 : vector<32x32xf32>
    %cst_44 = arith.constant dense<0.000000e+00> : vector<32xf32>
    %77 = vector.multi_reduction <add>, %76, %cst_44 [1] : vector<32x32xf32> to vector<32xf32>
    %78 = vector.shape_cast %77 : vector<32xf32> to vector<32x1xf32>
    %cst_45 = arith.constant 3.200000e+01 : f32
    %79 = vector.broadcast %cst_45 : f32 to vector<32x1xf32>
    %80 = arith.divf %78, %79 : vector<32x1xf32>
    %81 = vector.broadcast %80 : vector<32x1xf32> to vector<32x32xf32>
    %82 = arith.subf %76, %81 : vector<32x32xf32>
    %83 = arith.mulf %82, %82 : vector<32x32xf32>
    %cst_46 = arith.constant dense<0.000000e+00> : vector<32xf32>
    %84 = vector.multi_reduction <add>, %83, %cst_46 [1] : vector<32x32xf32> to vector<32xf32>
    %85 = vector.shape_cast %84 : vector<32xf32> to vector<32x1xf32>
    %cst_47 = arith.constant 3.200000e+01 : f32
    %86 = vector.broadcast %cst_47 : f32 to vector<32x1xf32>
    %87 = arith.divf %85, %86 : vector<32x1xf32>
    %88 = vector.broadcast %80 : vector<32x1xf32> to vector<32x32xf32>
    %89 = arith.subf %76, %88 : vector<32x32xf32>
    %cst_48 = arith.constant 9.99999974E-6 : f32
    %90 = vector.broadcast %cst_48 : f32 to vector<32x1xf32>
    %91 = arith.addf %87, %90 : vector<32x1xf32>
    %92 = math.rsqrt %91 : vector<32x1xf32>
    %93 = vector.broadcast %92 : vector<32x1xf32> to vector<32x32xf32>
    %94 = arith.mulf %89, %93 : vector<32x32xf32>
    %c0_49 = arith.constant 0 : index
    %c0_50 = arith.constant 0 : index
    %95 = vector.load %arg7[%c0_49, %c0_50] : memref<1x32xf32, #tpu.memory_space<vmem>>, vector<1x32xf32>
    %96 = vector.broadcast %95 : vector<1x32xf32> to vector<32x32xf32>
    %97 = arith.mulf %94, %96 : vector<32x32xf32>
    %c0_51 = arith.constant 0 : index
    %c0_52 = arith.constant 0 : index
    %98 = vector.load %arg8[%c0_51, %c0_52] : memref<1x32xf32, #tpu.memory_space<vmem>>, vector<1x32xf32>
    %99 = vector.broadcast %98 : vector<1x32xf32> to vector<32x32xf32>
    %100 = arith.addf %97, %99 : vector<32x32xf32>
    %101 = tpu.iota {dimensions = array<i32: 0>} : vector<32x1xi32>
    %102 = vector.broadcast %1 : i32 to vector<32x1xi32>
    %103 = arith.cmpi slt, %101, %102 : vector<32x1xi32>
    %104 = arith.extui %103 : vector<32x1xi1> to vector<32x1xi32>
    %105 = arith.sitofp %104 : vector<32x1xi32> to vector<32x1xf32>
    %106 = vector.broadcast %105 : vector<32x1xf32> to vector<32x32xf32>
    %107 = arith.mulf %100, %106 : vector<32x32xf32>
    %c0_53 = arith.constant 0 : index
    %c0_54 = arith.constant 0 : index
    %c0_55 = arith.constant 0 : index
    %108 = vector.load %arg9[%c0_53, %c0_54, %c0_55] : memref<1x32x32xf32, #tpu.memory_space<vmem>>, vector<1x32x32xf32>
    %109 = vector.shape_cast %108 : vector<1x32x32xf32> to vector<32x32xf32>
    %110 = vector.shape_cast %107 : vector<32x32xf32> to vector<1x32x32xf32>
    tpu.vector_store %arg9[%c0_53, %c0_54, %c0_55], %110 {strides = array<i32>} : memref<1x32x32xf32, #tpu.memory_space<vmem>>, vector<1x32x32xf32>,
    return
  }
  func.func @transform_0(%arg0: i32, %arg1: memref<2xi32, #tpu.memory_space<smem>>) -> (i32, i32, i32) {
    %c0_i32 = arith.constant 0 : i32
    %c0_i32_0 = arith.constant 0 : i32
    %c0_i32_1 = arith.constant 0 : i32
    return %arg0, %c0_i32, %c0_i32_0 : i32, i32, i32
  }
  func.func @transform_1(%arg0: i32, %arg1: memref<2xi32, #tpu.memory_space<smem>>) -> (i32, i32, i32) {
    %c0_i32 = arith.constant 0 : i32
    %c0_i32_0 = arith.constant 0 : i32
    %c0_i32_1 = arith.constant 0 : i32
    %c0_i32_2 = arith.constant 0 : i32
    return %c0_i32, %c0_i32_0, %c0_i32_1 : i32, i32, i32
  }
  func.func @transform_2(%arg0: i32, %arg1: memref<2xi32, #tpu.memory_space<smem>>) -> (i32, i32) {
    %c0_i32 = arith.constant 0 : i32
    %c0_i32_0 = arith.constant 0 : i32
    %c0_i32_1 = arith.constant 0 : i32
    return %c0_i32, %c0_i32_0 : i32, i32
  }
  func.func @transform_3(%arg0: i32, %arg1: memref<2xi32, #tpu.memory_space<smem>>) -> (i32, i32, i32) {
    %c0_i32 = arith.constant 0 : i32
    %c0_i32_0 = arith.constant 0 : i32
    %c0_i32_1 = arith.constant 0 : i32
    %c0_i32_2 = arith.constant 0 : i32
    return %c0_i32, %c0_i32_0, %c0_i32_1 : i32, i32, i32
  }
  func.func @transform_4(%arg0: i32, %arg1: memref<2xi32, #tpu.memory_space<smem>>) -> (i32, i32) {
    %c0_i32 = arith.constant 0 : i32
    %c0_i32_0 = arith.constant 0 : i32
    %c0_i32_1 = arith.constant 0 : i32
    return %c0_i32, %c0_i32_0 : i32, i32
  }
  func.func @transform_5(%arg0: i32, %arg1: memref<2xi32, #tpu.memory_space<smem>>) -> (i32, i32) {
    %c0_i32 = arith.constant 0 : i32
    %c0_i32_0 = arith.constant 0 : i32
    %c0_i32_1 = arith.constant 0 : i32
    return %c0_i32, %c0_i32_0 : i32, i32
  }
  func.func @transform_6(%arg0: i32, %arg1: memref<2xi32, #tpu.memory_space<smem>>) -> (i32, i32) {
    %c0_i32 = arith.constant 0 : i32
    %c0_i32_0 = arith.constant 0 : i32
    %c0_i32_1 = arith.constant 0 : i32
    return %c0_i32, %c0_i32_0 : i32, i32
  }
  func.func @transform_7(%arg0: i32, %arg1: memref<2xi32, #tpu.memory_space<smem>>) -> (i32, i32, i32) {
    %c0_i32 = arith.constant 0 : i32
    %c0_i32_0 = arith.constant 0 : i32
    %c0_i32_1 = arith.constant 0 : i32
    return %arg0, %c0_i32, %c0_i32_0 : i32, i32, i32
  }
}

module attributes {stable_mosaic.version = 11 : i64} {
  func.func @_linear_mask_kernel(%arg0: i32, %arg1: memref<64x32xf32, #tpu.memory_space<vmem>>, %arg2: memref<32x16xbf16, #tpu.memory_space<vmem>>, %arg3: memref<1x16xf32, #tpu.memory_space<vmem>>, %arg4: memref<64x1xf32, #tpu.memory_space<vmem>>, %arg5: memref<64x16xf32, #tpu.memory_space<vmem>>) attributes {dimension_semantics = [#tpu.dimension_semantics<parallel>], iteration_bounds = array<i64: 1>, scalar_prefetch = 0 : i64, scratch_operands = 0 : i64, tpu.core_type = #tpu.core_type<tc>, window_params = [{transform_indices = @transform_0, window_bounds = array<i64: 64, 32>}, {pipeline_mode = #tpu.pipeline_mode<synchronous>, transform_indices = @transform_1, window_bounds = array<i64: 32, 16>}, {pipeline_mode = #tpu.pipeline_mode<synchronous>, transform_indices = @transform_2, window_bounds = array<i64: 1, 16>}, {transform_indices = @transform_3, window_bounds = array<i64: 64, 1>}, {transform_indices = @transform_4, window_bounds = array<i64: 64, 16>}]} {
    %c0 = arith.constant 0 : index
    %c0_0 = arith.constant 0 : index
    %0 = vector.load %arg1[%c0, %c0_0] : memref<64x32xf32, #tpu.memory_space<vmem>>, vector<64x32xf32>
    %1 = arith.truncf %0 : vector<64x32xf32> to vector<64x32xbf16>
    %c0_1 = arith.constant 0 : index
    %c0_2 = arith.constant 0 : index
    %2 = vector.load %arg2[%c0_1, %c0_2] : memref<32x16xbf16, #tpu.memory_space<vmem>>, vector<32x16xbf16>
    %cst = arith.constant dense<0.000000e+00> : vector<64x16xf32>
    %3 = tpu.matmul %1, %2, %cst {dimension_numbers = #tpu.dot_dimension_numbers<[1], [0], [0], [1], [0, 0, 1, 1], [], []>} : vector<64x32xbf16>, vector<32x16xbf16>, vector<64x16xf32> -> vector<64x16xf32>
    %c0_3 = arith.constant 0 : index
    %c0_4 = arith.constant 0 : index
    %4 = vector.load %arg3[%c0_3, %c0_4] : memref<1x16xf32, #tpu.memory_space<vmem>>, vector<1x16xf32>
    %5 = vector.broadcast %4 : vector<1x16xf32> to vector<64x16xf32>
    %6 = arith.addf %3, %5 : vector<64x16xf32>
    %c0_5 = arith.constant 0 : index
    %c0_6 = arith.constant 0 : index
    %7 = vector.load %arg4[%c0_5, %c0_6] : memref<64x1xf32, #tpu.memory_space<vmem>>, vector<64x1xf32>
    %8 = vector.broadcast %7 : vector<64x1xf32> to vector<64x16xf32>
    %9 = arith.mulf %6, %8 : vector<64x16xf32>
    %c0_7 = arith.constant 0 : index
    %c0_8 = arith.constant 0 : index
    %10 = vector.load %arg5[%c0_7, %c0_8] : memref<64x16xf32, #tpu.memory_space<vmem>>, vector<64x16xf32>
    tpu.vector_store %arg5[%c0_7, %c0_8], %9 {strides = array<i32>} : memref<64x16xf32, #tpu.memory_space<vmem>>, vector<64x16xf32>,
    return
  }
  func.func @transform_0(%arg0: i32) -> (i32, i32) {
    %c0_i32 = arith.constant 0 : i32
    %c0_i32_0 = arith.constant 0 : i32
    return %arg0, %c0_i32 : i32, i32
  }
  func.func @transform_1(%arg0: i32) -> (i32, i32) {
    %c0_i32 = arith.constant 0 : i32
    %c0_i32_0 = arith.constant 0 : i32
    %c0_i32_1 = arith.constant 0 : i32
    return %c0_i32, %c0_i32_0 : i32, i32
  }
  func.func @transform_2(%arg0: i32) -> (i32, i32) {
    %c0_i32 = arith.constant 0 : i32
    %c0_i32_0 = arith.constant 0 : i32
    %c0_i32_1 = arith.constant 0 : i32
    return %c0_i32, %c0_i32_0 : i32, i32
  }
  func.func @transform_3(%arg0: i32) -> (i32, i32) {
    %c0_i32 = arith.constant 0 : i32
    %c0_i32_0 = arith.constant 0 : i32
    return %arg0, %c0_i32 : i32, i32
  }
  func.func @transform_4(%arg0: i32) -> (i32, i32) {
    %c0_i32 = arith.constant 0 : i32
    %c0_i32_0 = arith.constant 0 : i32
    return %arg0, %c0_i32 : i32, i32
  }
}

</mosaic_0001>

<bundles_post_ra>
// kernel: _lambda_.24
= control target key start
LH: loop header
LB: loop body
LE: loop exit
PB: predicated region body
PF: predicated region fallthrough
CT: control target
= control target key end

     0   :  { %s544_s18 = smov 0   ;;  %s595_s0 = inlined_call_operand.vmem [shape: f32[2,10,32], index: 0, kind: input, shape index: {}]   ;;  %s596_s1 = inlined_call_operand.vmem [shape: bf16[3,32,64], index: 1, kind: input, shape index: {}]   ;;  %s597_s2 = inlined_call_operand.vmem [shape: f32[1,64], index: 2, kind: input, shape index: {}]   ;;  %s598_s3 = inlined_call_operand.vmem [shape: f32[1,64], index: 3, kind: input, shape index: {}]   ;;  %s599_s4 = inlined_call_operand.vmem [shape: f32[1,64], index: 4, kind: input, shape index: {}]   ;;  %s600_s5 = inlined_call_operand.vmem [shape: f32[2,8,64], index: 5, kind: output, shape index: {}]  }
   0x1 LB: > { %s437_s19 = sadd.s32 4294967295, %s511_s18   ;;  %p441_p0 = scmp.ge.s32.totalorder %s511_s18, 1  ;;  %s511_s18 = sphi %s544_s18, %s15_s18  }
   0x2   : > { %p187_p1 = scmp.lt.s32.totalorder %s511_s18, 3 }
   0x4   : > { %p188_p2 = pnand %p441_p0, %p187_p1 }
   0x5   : > { %p214_p3 = scmp.lt.s32.totalorder (!%p188_p2), %s437_s19, 1 }
   0x6   : > { %191 = sbr.rel (%p188_p2) target bundleno = 427 (0x1ab), region = 40 }
   0xb   : > { %v484_v0 = vld [vmem:[%s596_s1 + $0x8] sm:$0xff]  ;;  %v483_v2 = vld [vmem:[%s596_s1] sm:$0xff]  ;;  %v486_v3 = vld [vmem:[%s596_s1 + $0x18] sm:$0xff]  ;;  %s602_s19 = smov (!%p214_p3, %s437_s19), 1  ;;  %vm256_vm0 = vcmask 261120   ;;  %vm342_vm1 = vcmask 523264  }
   0xc   : > { %v488_v1 = vld [vmem:[%s596_s1 + $0x28] sm:$0xff]  ;;  %294 = vmatpush.bf16.msra.mxu1 %v484_v0  ;;  %v487_v4 = vld [vmem:[%s596_s1 + $0x20] sm:$0xff]  ;;  %266 = vmatpush.bf16.msra.mxu0 %v486_v3  ;;  %v485_v5 = vld [vmem:[%s596_s1 + $0x10] sm:$0xff]  ;;  %s482_s7 = sshll.u32 %s602_s19, 4  ;;  %v513_v26 = vmov 64.0   ;;  %s444_s17 = sshll.u32 %s602_s19, 3 }
   0xd   : > { %329 = vmatpush.bf16.msra.mxu2 %v488_v1  ;;  %s218_s10 = scalar_lea.vmem %s595_s0, %s482_s7  ;;  %v498_v18 = vld [vmem:[%s597_s2] ss:$0 sm:$0xff]  ;;  %501 = vrcp.f32 %v513_v26  ;;  %s222_s22 = scalar_lea.vmem %s600_s5, %s444_s17 }
   0xe   : > { %v224_v6 = vld [vmem:[%s218_s10] sm:$0xff]  ;;  %v225_v7 = vld [vmem:[%s218_s10 + $0x8] sm:$0x3] }
   0xf   : > { %v226_v8 = vpack.c.bf16 %v224_v6, %v224_v6  ;;  %v231_v9 = vpack.c.bf16 %v225_v7, %v224_v6  ;;  %v499_v47 = vld [vmem:[%s598_s3] ss:$0 sm:$0xff] }
  0x10   : > { %295 = vmatpush.bf16.msra.mxu1 %v483_v2  ;;  %267 = vmatpush.bf16.msra.mxu0 %v485_v5  ;;  %v500_v49 = vld [vmem:[%s599_s4] ss:$0 sm:$0xff] }
  0x11   : > { %330 = vmatpush.bf16.msra.mxu2 %v487_v4  ;;  %v307_v10 = vrot.slane %v231_v9, 1  ;;  %v238_v11 = vshrl.u32 %v231_v9, 16  ;;  %v240_v12 = vshll.u32 %v231_v9, 16 }
  0x13   : > { %466 = vmatmul.msk.bf16.vlgmr.msra.gmra.mxu1 %vm256_vm0, %v226_v8  ;;  %v242_v13 = vrot.slane %v240_v12, 1  ;;  %v502_v27 = vpop.eup %501 }
  0x14   : > { %479 = vmatmul.msk.bf16.vlgmr.msra.gmra.mxu2 %vm256_vm0, %v307_v10  ;;  %v347_v28 = vmul.f32 64.0, %v502_v27  ;;  %vm351_vm2 = vweird.f32 %v502_v27 }
  0x15   : > { %v243_v14 = vor.u32 %v242_v13, %v238_v11 }
  0x16   : > { %v348_v29 = vsub.f32 1.0, %v347_v28 }
  0x17   : > { %457 = vmatmul.msk.bf16.vlgmr.msra.gmra.mxu0 %vm256_vm0, %v243_v14 }
  0x18   : > { %v349_v30 = vmul.f32 %v502_v27, %v348_v29 }
  0x1a   : > { %v350_v31 = vadd.f32 %v502_v27, %v349_v30 }
  0x1c   : > { %v352_v32 = vsel %vm351_vm2, %v502_v27, %v350_v31 }
  0x90   : > { %v297_v15 = vpop.f32.mrf.mxu1 }
  0x94   : > { %v269_v16 = vpop.f32.mrf.mxu0 }
  0x95   : > { %v298_v17 = vadd.f32 %v297_v15, %v269_v16 }
  0x97   : > { %v332_v19 = vpop.f32.mrf.mxu2 }
  0x98   : > { %v299_v20 = vpop.f32.mrf.mxu1  ;;  %v336_v21 = vadd.f32 %v332_v19, %v298_v17 }
  0x9a   : > { %v341_v22 = vadd.f32 %v498_v18, %v336_v21 }
  0x9c   : > { %v343_v23 = vsel %vm342_vm1, %v341_v22, 0.0  ;;  %v271_v24 = vpop.f32.mrf.mxu0 }
  0x9d   : > { %344 = vadd.xlane.f32.xlu0 %v343_v23 }
  0x9f   : > { %v334_v25 = vpop.f32.mrf.mxu2 }
 0x110   : > { %v345_v33 = vpop.xlane.xlu0 %344 }
 0x111   : > { %v353_v34 = vmul.f32 %v352_v32, %v345_v33 }
 0x113   : > { %v354_v35 = vsub.f32 %v341_v22, %v353_v34 }
 0x115   : > { %v355_v36 = vmul.f32 %v354_v35, %v354_v35 }
 0x117   : > { %v356_v37 = vsel %vm342_vm1, %v355_v36, 0.0 }
 0x118   : > { %357 = vadd.xlane.f32.xlu0 %v356_v37 }
 0x18b   : > { %v358_v38 = vpop.xlane.xlu0 %357 }
 0x18c   : > { %v359_v39 = vmul.f32 %v358_v38, %v352_v32 }
 0x18e   : > { %v360_v40 = vadd.f32 1e-05, %v359_v39 }
 0x190   : > { %503 = vrsqrt.f32 %v360_v40  ;;  %vm367_vm4 = vweird.f32 %v360_v40 }
 0x196   : > { %v504_v41 = vpop.eup %503 }
 0x197   : > { %v362_v42 = vmul.f32 %v504_v41, %v360_v40  ;;  %vm368_vm3 = vweird.f32 %v504_v41 }
 0x198   : > { %vm369_vm5 = vmor %vm367_vm4, %vm368_vm3 }
 0x199   : > { %v363_v43 = vmul.f32 %v504_v41, %v362_v42 }
 0x19b   : > { %v364_v44 = vmul.f32 0.5, %v363_v43 }
 0x19d   : > { %v365_v45 = vsub.f32 1.5, %v364_v44 }
 0x19f   : > { %v366_v46 = vmul.f32 %v504_v41, %v365_v45 }
 0x1a1   : > { %v370_v48 = vsel %vm369_vm5, %v504_v41, %v366_v46 }
 0x1a2   : > { %v371_v50 = vmul.f32 %v370_v48, %v354_v35 }
 0x1a4   : > { %v376_v51 = vmul.f32 %v499_v47, %v371_v50 }
 0x1a6   : > { %v381_v52 = vadd.f32 %v500_v49, %v376_v51 }
 0x1a8   : > { %v382_v53 = vmax.f32 %v381_v52, 0.0 }
 0x1aa   : > { %383 = vst.msk [vmem:[%s222_s22] sm:$0xff] %vm342_vm1, %v382_v53 }
 0x1ab PF: > { %s15_s18 = sadd.s32 1, %s511_s18  }
 0x1ac   : > { %p12_p4 = scmp.ge.s32.totalorder %s15_s18, 4  }
 0x1ae   :  { %14 = sbr.rel (!%p12_p4) target bundleno = 1 (0x1), region = 72 }

// kernel: _lambda_.25
= control target key start
LH: loop header
LB: loop body
LE: loop exit
PB: predicated region body
PF: predicated region fallthrough
CT: control target
= control target key end

     0   :  { %s629_s18 = smov 0   ;;  %s701_s0 = inlined_call_operand.vmem [shape: f32[2,10,64], index: 0, kind: input, shape index: {}]   ;;  %s702_s1 = inlined_call_operand.vmem [shape: bf16[3,64,64], index: 1, kind: input, shape index: {}]   ;;  %s703_s2 = inlined_call_operand.vmem [shape: f32[1,64], index: 2, kind: input, shape index: {}]   ;;  %s704_s3 = inlined_call_operand.vmem [shape: f32[1,64], index: 3, kind: input, shape index: {}]   ;;  %s705_s4 = inlined_call_operand.vmem [shape: f32[1,64], index: 4, kind: input, shape index: {}]   ;;  %s706_s5 = inlined_call_operand.vmem [shape: f32[2,8,64], index: 5, kind: output, shape index: {}]  }
   0x1 LB: > { %s484_s19 = sadd.s32 4294967295, %s596_s18   ;;  %p488_p0 = scmp.ge.s32.totalorder %s596_s18, 1  ;;  %s596_s18 = sphi %s629_s18, %s15_s18  }
   0x2   : > { %p187_p1 = scmp.lt.s32.totalorder %s596_s18, 3 }
   0x4   : > { %p188_p2 = pnand %p488_p0, %p187_p1 }
   0x5   : > { %p214_p3 = scmp.lt.s32.totalorder (!%p188_p2), %s484_s19, 1 }
   0x6   : > { %191 = sbr.rel (%p188_p2) target bundleno = 436 (0x1b4), region = 40 }
   0xb   : > { %v569_v0 = vld [vmem:[%s702_s1 + $0x38] sm:$0xff]  ;;  %v568_v3 = vld [vmem:[%s702_s1 + $0x30] sm:$0xff]  ;;  %s708_s19 = smov (!%p214_p3, %s484_s19), 1  ;;  %v567_v6 = vld [vmem:[%s702_s1 + $0x28] sm:$0xff]  ;;  %vm276_vm0 = vcmask 523264   ;;  %v598_v32 = vmov 64.0  }
   0xc   : > { %v565_v1 = vld [vmem:[%s702_s1 + $0x18] sm:$0xff]  ;;  %284 = vmatpush.bf16.msra.mxu0 %v569_v0  ;;  %v564_v4 = vld [vmem:[%s702_s1 + $0x10] sm:$0xff]  ;;  %s561_s7 = sshll.u32 %s708_s19, 4  ;;  %v563_v7 = vld [vmem:[%s702_s1 + $0x8] sm:$0xff]  ;;  %586 = vrcp.f32 %v598_v32  ;;  %s491_s6 = sshll.u32 %s708_s19, 3 }
   0xd   : > { %v573_v2 = vld [vmem:[%s702_s1 + $0x58] sm:$0xff]  ;;  %324 = vmatpush.bf16.msra.mxu1 %v565_v1  ;;  %v572_v5 = vld [vmem:[%s702_s1 + $0x50] sm:$0xff]  ;;  %s218_s12 = scalar_lea.vmem %s701_s0, %s561_s7  ;;  %v571_v10 = vld [vmem:[%s702_s1 + $0x48] sm:$0xff]  ;;  %s222_s9 = scalar_lea.vmem %s706_s5, %s491_s6 }
   0xe   : > { %375 = vmatpush.bf16.msra.mxu2 %v573_v2  ;;  %v224_v8 = vld [vmem:[%s218_s12] sm:$0xff]  ;;  %v225_v9 = vld [vmem:[%s218_s12 + $0x8] sm:$0x3] }
   0xf   : > { %v235_v11 = vpack.c.bf16 %v225_v9, %v224_v8  ;;  %v566_v14 = vld [vmem:[%s702_s1 + $0x20] sm:$0xff]  ;;  %v226_v19 = vpack.c.bf16 %v224_v8, %v224_v8 }
  0x10   : > { %285 = vmatpush.bf16.msra.mxu0 %v568_v3  ;;  %v562_v15 = vld [vmem:[%s702_s1] sm:$0xff] }
  0x11   : > { %325 = vmatpush.bf16.msra.mxu1 %v564_v4  ;;  %v246_v12 = vshrl.u32 %v235_v11, 16  ;;  %v248_v13 = vshll.u32 %v235_v11, 16  ;;  %v570_v16 = vld [vmem:[%s702_s1 + $0x40] sm:$0xff]  ;;  %v343_v20 = vrot.slane %v235_v11, 1 }
  0x12   : > { %376 = vmatpush.bf16.msra.mxu2 %v572_v5  ;;  %v583_v24 = vld [vmem:[%s703_s2] ss:$0 sm:$0xff]  ;;  %v587_v33 = vpop.eup %586 }
  0x13   : > { %v250_v17 = vrot.slane %v248_v13, 1  ;;  %v394_v34 = vmul.f32 64.0, %v587_v33  ;;  %vm398_vm1 = vweird.f32 %v587_v33  ;;  %v584_v53 = vld [vmem:[%s704_s3] ss:$0 sm:$0xff] }
  0x14   : > { %286 = vmatpush.bf16.msra.mxu0 %v567_v6  ;;  %v585_v55 = vld [vmem:[%s705_s4] ss:$0 sm:$0xff] }
  0x15   : > { %326 = vmatpush.bf16.msra.mxu1 %v563_v7  ;;  %v251_v18 = vor.u32 %v250_v17, %v246_v12  ;;  %v395_v35 = vsub.f32 1.0, %v394_v34 }
  0x16   : > { %377 = vmatpush.bf16.msra.mxu2 %v571_v10 }
  0x17   : > { %v396_v36 = vmul.f32 %v587_v33, %v395_v35 }
  0x18   : > { %287 = vmatpush.bf16.msra.mxu0 %v566_v14 }
  0x19   : > { %327 = vmatpush.bf16.msra.mxu1 %v562_v15  ;;  %v397_v37 = vadd.f32 %v587_v33, %v396_v36 }
  0x1a   : > { %378 = vmatpush.bf16.msra.mxu2 %v570_v16 }
  0x1b   : > { %516 = vmatmul.msk.bf16.vlgmr.msra.gmra.mxu0 %vm276_vm0, %v251_v18  ;;  %v399_v38 = vsel %vm398_vm1, %v587_v33, %v397_v37 }
  0x1c   : > { %533 = vmatmul.msk.bf16.vlgmr.msra.gmra.mxu1 %vm276_vm0, %v226_v19 }
  0x1d   : > { %558 = vmatmul.msk.bf16.vlgmr.msra.gmra.mxu2 %vm276_vm0, %v343_v20 }
  0x98   : > { %v289_v21 = vpop.f32.mrf.mxu0 }
  0x99   : > { %v329_v22 = vpop.f32.mrf.mxu1 }
  0x9a   : > { %v330_v23 = vadd.f32 %v329_v22, %v289_v21 }
  0xa0   : > { %v380_v25 = vpop.f32.mrf.mxu2  ;;  %v291_v27 = vpop.f32.mrf.mxu0 }
  0xa1   : > { %v384_v26 = vadd.f32 %v380_v25, %v330_v23  ;;  %v331_v28 = vpop.f32.mrf.mxu1 }
  0xa3   : > { %v389_v29 = vadd.f32 %v583_v24, %v384_v26 }
  0xa5   : > { %v390_v30 = vsel %vm276_vm0, %v389_v29, 0.0 }
  0xa6   : > { %391 = vadd.xlane.f32.xlu0 %v390_v30 }
  0xa8   : > { %v382_v31 = vpop.f32.mrf.mxu2 }
 0x119   : > { %v392_v39 = vpop.xlane.xlu0 %391 }
 0x11a   : > { %v400_v40 = vmul.f32 %v399_v38, %v392_v39 }
 0x11c   : > { %v401_v41 = vsub.f32 %v389_v29, %v400_v40 }
 0x11e   : > { %v402_v42 = vmul.f32 %v401_v41, %v401_v41 }
 0x120   : > { %v403_v43 = vsel %vm276_vm0, %v402_v42, 0.0 }
 0x121   : > { %404 = vadd.xlane.f32.xlu0 %v403_v43 }
 0x194   : > { %v405_v44 = vpop.xlane.xlu0 %404 }
 0x195   : > { %v406_v45 = vmul.f32 %v405_v44, %v399_v38 }
 0x197   : > { %v407_v46 = vadd.f32 1e-05, %v406_v45 }
 0x199   : > { %588 = vrsqrt.f32 %v407_v46  ;;  %vm414_vm3 = vweird.f32 %v407_v46 }
 0x19f   : > { %v589_v47 = vpop.eup %588 }
 0x1a0   : > { %v409_v48 = vmul.f32 %v589_v47, %v407_v46  ;;  %vm415_vm2 = vweird.f32 %v589_v47 }
 0x1a1   : > { %vm416_vm4 = vmor %vm414_vm3, %vm415_vm2 }
 0x1a2   : > { %v410_v49 = vmul.f32 %v589_v47, %v409_v48 }
 0x1a4   : > { %v411_v50 = vmul.f32 0.5, %v410_v49 }
 0x1a6   : > { %v412_v51 = vsub.f32 1.5, %v411_v50 }
 0x1a8   : > { %v413_v52 = vmul.f32 %v589_v47, %v412_v51 }
 0x1aa   : > { %v417_v54 = vsel %vm416_vm4, %v589_v47, %v413_v52 }
 0x1ab   : > { %v418_v56 = vmul.f32 %v417_v54, %v401_v41 }
 0x1ad   : > { %v423_v57 = vmul.f32 %v584_v53, %v418_v56 }
 0x1af   : > { %v428_v58 = vadd.f32 %v585_v55, %v423_v57 }
 0x1b1   : > { %v429_v59 = vmax.f32 %v428_v58, 0.0 }
 0x1b3   : > { %430 = vst.msk [vmem:[%s222_s9] sm:$0xff] %vm276_vm0, %v429_v59 }
 0x1b4 PF: > { %s15_s18 = sadd.s32 1, %s596_s18  }
 0x1b5   : > { %p12_p4 = scmp.ge.s32.totalorder %s15_s18, 4  }
 0x1b7   :  { %14 = sbr.rel (!%p12_p4) target bundleno = 1 (0x1), region = 72 }

// kernel: _lambda_.20
= control target key start
LH: loop header
LB: loop body
LE: loop exit
PB: predicated region body
PF: predicated region fallthrough
CT: control target
= control target key end

     0   :  { %s682_s30 = smov [#allocation3]   ;;  %s820_s0 = inlined_call_operand.vmem [shape: s32[2], index: 0, kind: input, shape index: {}]   ;;  %s821_s1 = inlined_call_operand.vmem [shape: f32[2,8,32], index: 1, kind: input, shape index: {}]   ;;  %s822_s2 = inlined_call_operand.vmem [shape: bf16[32,96], index: 2, kind: input, shape index: {}]   ;;  %s823_s3 = inlined_call_operand.vmem [shape: f32[1,96], index: 3, kind: input, shape index: {}]   ;;  %s824_s4 = inlined_call_operand.vmem [shape: bf16[32,32], index: 4, kind: input, shape index: {}]   ;;  %s825_s5 = inlined_call_operand.vmem [shape: f32[1,32], index: 5, kind: input, shape index: {}]   ;;  %s826_s6 = inlined_call_operand.vmem [shape: f32[1,32], index: 6, kind: input, shape index: {}]   ;;  %s827_s7 = inlined_call_operand.vmem [shape: f32[1,32], index: 7, kind: input, shape index: {}]   ;;  %s828_s8 = inlined_call_operand.vmem [shape: f32[2,8,32], index: 8, kind: output, shape index: {}]  }
   0x1   :  { %s14_s29 = sshll.u32 %s820_s0, 4  ;;  %s15_s29 = int_to_ptr.vmem [resolvable:$true] %s14_s29 }
   0x2   :  { %17 = dma.vmem_to_smem %s15_s29, 16, %s682_s30, [#allocation2] }
   0x3   :  { %676 = dma.done.wait [#allocation2], 16 }
   0x4   :  { %677 = vsyncadd [#allocation2], 4294967280 }
   0x5   :  { %20 = sfence }
   0x6   :  { %s740_s9 = smov 0  }
   0x7 LB: > { %s746_s10 = sadd.s32 4294967295, %s680_s9   ;;  %p594_p0 = scmp.ge.s32.totalorder %s680_s9, 1  ;;  %s680_s9 = sphi %s740_s9, %s26_s9  }
   0x8   : > { %p245_p1 = scmp.lt.s32.totalorder %s680_s9, 3 }
   0xa   : > { %p246_p2 = pnand %p594_p0, %p245_p1 }
   0xb   : > { %p275_p3 = scmp.lt.s32.totalorder (!%p246_p2), %s746_s10, 1  ;;  %s683_s21 = smov (!%p246_p2), 112  }
   0xc   : > { %249 = sbr.rel (%p246_p2) target bundleno = 1307 (0x51b), region = 48  ;;  %s684_s22 = smov (!%p246_p2), 96  }
   0xd   : > { %s685_s23 = smov (!%p246_p2), 80   ;;  %s686_s24 = smov (!%p246_p2), 64  }
   0xe   : > { %s687_s25 = smov (!%p246_p2), 48   ;;  %s284_s26 = sld [smem:[#allocation3 + %s746_s10]] (!%p246_p2) }
  0x11   : > { %v623_v0 = vld [vmem:[%s822_s2 + $0x8] sm:$0xff]  ;;  %v622_v1 = vld [vmem:[%s822_s2] sm:$0xff]  ;;  %s758_s14 = scalar_select %p275_p3, %s746_s10, 1  ;;  %vm307_vm0 = vcmask 261120   ;;  %vm333_vm1 = vcmask 130048   ;;  %vm373_vm2 = vcmask 1043456   ;;  %v324_v18 = vlaneseq }
  0x12   : > { %317 = vmatpush.bf16.msra.mxu0 %v623_v0  ;;  %v644_v4 = vld [vmem:[%s823_s3] ss:$0 sm:$0xff]  ;;  %v688_v24 = vmov -1e+09   ;;  %vm355_vm5 = vcmask 64512   ;;  %v625_v53 = vld [vmem:[%s824_s4 + $0x8] sm:$0xff] }
  0x13   : > { %s595_s15 = sshll.u32 %s758_s14, 3  ;;  %v531_v19 = vshrl.u32 %v324_v18, 7  ;;  %v325_v22 = vand.u32 127, %v324_v18  ;;  %v624_v54 = vld [vmem:[%s824_s4] sm:$0xff]  ;;  %s689_s10 = smov 16  }
  0x14   : > { %s278_s18 = scalar_lea.vmem %s821_s1, %s595_s15  ;;  %v326_v20 = vstv %s284_s26  ;;  %v645_v62 = vld [vmem:[%s825_s5] ss:$0 sm:$0xff]  ;;  %s282_s20 = scalar_lea.vmem %s828_s8, %s595_s15 }
  0x15   : > { %v766_v2 = vld [vmem:[%s278_s18] sm:$0xff]  ;;  %vm779_vm3 = vcmp.lt.s32.totalorder %v531_v19, %v326_v20  ;;  %vm327_vm4 = vcmp.lt.s32.totalorder %v325_v22, %v326_v20 }
  0x16   : > { %318 = vmatpush.bf16.msra.mxu0 %v622_v1  ;;  %v286_v3 = vpack.c.bf16 %v766_v2, %v766_v2  ;;  %v328_v25 = vsel %vm327_vm4, 0.0, %v688_v24 }
  0x19   : > { %605 = vmatmul.msk.bf16.vlgmr.msra.gmra.mxu0 %vm307_vm0, %v286_v3 }
  0x1a   : > { %483 = vmatpush.bf16.msrb.mxu0 %v625_v53 }
  0x1e   : > { %484 = vmatpush.bf16.msrb.mxu0 %v624_v54 }
  0x96   : > { %v320_v5 = vpop.f32.mrf.mxu0 }
  0x97   : > { %v321_v6 = vadd.f32 %v644_v4, %v320_v5  ;;  %v690_v5 = vmov 32.0  }
  0x99   : > { %v329_v7 = vpack.c.bf16 %v321_v6, %v321_v6 }
  0x9b   : > { %390 = vrot.lane.b32.xlu1 %v329_v7, %s683_s21  ;;  %331 = vrot.lane.b32.xlu0 %v329_v7, %s684_s22 }
  0x9e   : > { %v322_v8 = vpop.f32.mrf.mxu0 }
  0xa3   : > { %392 = vrot.lane.b32.xlu0 %v329_v7, %s685_s23 }
  0xab   : > { %368 = vrot.lane.b32.xlu0 %v329_v7, %s686_s24 }
  0xb3   : > { %427 = vrot.lane.b32.xlu0 %v329_v7, %s687_s25 }
 0x10d   : > { %v332_v9 = vpop.permute.xlu0 %331  ;;  %v391_v13 = vpop.permute.xlu1 %390 }
 0x10e   : > { %v338_v10 = vsel %vm333_vm1, %v332_v9, 0 }
 0x10f   : > { %347 = vmatpush.bf16.xpose.msra.mxu1 %v338_v10 }
 0x115   : > { %v393_v11 = vpop.permute.xlu0 %392 }
 0x116   : > { %606 = vmatmul.msk.bf16.vlgmr.msra.gmra.mxu1 %vm333_vm1, %v329_v7  ;;  %v398_v12 = vsel %vm333_vm1, %v393_v11, 0 }
 0x117   : > { %407 = vmatpush.bf16.xpose.msra.mxu3 %v398_v12 }
 0x11d   : > { %v369_v14 = vpop.permute.xlu0 %368 }
 0x11e   : > { %608 = vmatmul.msk.bf16.vlgmr.msra.gmra.mxu3 %vm333_vm1, %v391_v13  ;;  %v375_v15 = vsel %vm373_vm2, %v369_v14, 0 }
 0x11f   : > { %384 = vmatpush.bf16.msra.mxu2 %v375_v15 }
 0x125   : > { %v428_v16 = vpop.permute.xlu0 %427 }
 0x126   : > { %v433_v17 = vsel %vm373_vm2, %v428_v16, 0 }
 0x127   : > { %442 = vmatpush.bf16.msrb.mxu2 %v433_v17 }
 0x193   : > { %v349_v23 = vpop.f32.mrf.mxu1 }
 0x194   : > { %v353_v26 = vmul.f32 0.25, %v349_v23 }
 0x196   : > { %v354_v27 = vadd.f32 %v353_v26, %v328_v25  ;;  %v646_v26 = vld [vmem:[%s826_s6] ss:$0 sm:$0xff] }
 0x198   : > { %v356_v28 = vsel %vm355_vm5, %v354_v27, -inf }
 0x199   : > { %357 = vmax.xlane.f32.xlu1 %v356_v28  ;;  %v647_v28 = vld [vmem:[%s827_s7] ss:$0 sm:$0xff] }
 0x19b   : > { %v351_v29 = vpop.f32.mrf.mxu1 }
 0x1a1   : > { %v409_v30 = vpop.f32.mrf.mxu3 }
 0x1a2   : > { %v413_v31 = vmul.f32 0.25, %v409_v30 }
 0x1a4   : > { %v414_v32 = vadd.f32 %v413_v31, %v328_v25  ;;  %v691_v31 = vmov 0.0  }
 0x1a6   : > { %v415_v33 = vsel %vm355_vm5, %v414_v32, -inf }
 0x1a7   : > { %416 = vmax.xlane.f32.xlu2 %v415_v33 }
 0x1a9   : > { %v411_v34 = vpop.f32.mrf.mxu3 }
 0x20c   : > { %v358_v35 = vpop.xlane.xlu1 %357 }
 0x20d   : > { %v359_v36 = vsub.f32 %v354_v27, %v358_v35 }
 0x20f   : > { %v360_v37 = vmul.f32 1.442695, %v359_v36 }
 0x211   : > { %648 = vpow2.f32 %v360_v37 }
 0x217   : > { %v649_v38 = vpop.eup %648 }
 0x218   : > { %v362_v39 = vsel %vm355_vm5, %v649_v38, 0.0 }
 0x219   : > { %363 = vadd.xlane.f32.xlu2 %v362_v39 }
 0x21a   : > { %v417_v40 = vpop.xlane.xlu2 %416 }
 0x21b   : > { %v418_v41 = vsub.f32 %v414_v32, %v417_v40  ;;  %v619_v32 = vsel %vm779_vm3, 1.0, %v691_v31 }
 0x21d   : > { %v419_v42 = vmul.f32 1.442695, %v418_v41 }
 0x21f   : > { %650 = vpow2.f32 %v419_v42 }
 0x225   : > { %v651_v43 = vpop.eup %650 }
 0x226   : > { %v421_v44 = vsel %vm355_vm5, %v651_v43, 0.0 }
 0x227   : > { %422 = vadd.xlane.f32.xlu2 %v421_v44 }
 0x28c   : > { %v364_v45 = vpop.xlane.xlu2 %363 }
 0x28d   : > { %652 = vrcp.f32 %v364_v45 }
 0x293   : > { %v653_v46 = vpop.eup %652 }
 0x294   : > { %v366_v47 = vmul.f32 %v653_v46, %v649_v38 }
 0x296   : > { %v367_v48 = vpack.c.bf16 %v366_v47, %v366_v47 }
 0x298   : > { %607 = vmatmul.msk.bf16.vlgmr.msra.gmra.mxu2 %vm355_vm5, %v367_v48 }
 0x29a   : > { %v423_v49 = vpop.xlane.xlu2 %422 }
 0x29b   : > { %654 = vrcp.f32 %v423_v49 }
 0x29c   : > { %656 = vrcp.f32 %v690_v5 }
 0x2a1   : > { %v655_v50 = vpop.eup %654 }
 0x2a2   : > { %v425_v51 = vmul.f32 %v655_v50, %v651_v43  ;;  %v657_v6 = vpop.eup %656 }
 0x2a3   : > { %v495_v7 = vmul.f32 32.0, %v657_v6  ;;  %vm499_vm6 = vweird.f32 %v657_v6 }
 0x2a4   : > { %v426_v52 = vpack.c.bf16 %v425_v51, %v425_v51 }
 0x2a5   : > { %v496_v8 = vsub.f32 1.0, %v495_v7 }
 0x2a7   : > { %v497_v9 = vmul.f32 %v657_v6, %v496_v8 }
 0x2a8   : > { %609 = vmatmul.msk.bf16.vlgmr.msrb.gmra.mxu2 %vm355_vm5, %v426_v52 }
 0x2a9   : > { %v498_v10 = vadd.f32 %v657_v6, %v497_v9 }
 0x2ab   : > { %v500_v11 = vsel %vm499_vm6, %v657_v6, %v498_v10 }
 0x31b   : > { %v386_v55 = vpop.f32.mrf.mxu2 }
 0x323   : > { %v388_v56 = vpop.f32.mrf.mxu2 }
 0x32b   : > { %v444_v57 = vpop.f32.mrf.mxu2 }
 0x32c   : > { %449 = vrot.lane.b32.xlu2 %v444_v57, %s689_s10 }
 0x333   : > { %v446_v58 = vpop.f32.mrf.mxu2 }
 0x386   : > { %v450_v59 = vpop.permute.xlu2 %449 }
 0x387   : > { %v452_v60 = vsel %vm333_vm1, %v386_v55, %v450_v59 }
 0x388   : > { %v453_v61 = vpack.c.bf16 %v452_v60, %v452_v60 }
 0x38a   : > { %618 = vmatmul.msk.bf16.vlgmr.msrb.gmra.mxu0 %vm307_vm0, %v453_v61 }
 0x407   : > { %v486_v63 = vpop.f32.mrf.mxu0 }
 0x408   : > { %v487_v0 = vadd.f32 %v645_v62, %v486_v63 }
 0x40a   : > { %v490_v1 = vadd.f32 %v487_v0, %v766_v2 }
 0x40c   : > { %v491_v3 = vsel %vm307_vm0, %v490_v1, 0.0 }
 0x40d   : > { %492 = vadd.xlane.f32.xlu0 %v491_v3 }
 0x40f   : > { %v488_v4 = vpop.f32.mrf.mxu0 }
 0x480   : > { %v493_v12 = vpop.xlane.xlu0 %492 }
 0x481   : > { %v501_v13 = vmul.f32 %v500_v11, %v493_v12 }
 0x483   : > { %v502_v14 = vsub.f32 %v490_v1, %v501_v13 }
 0x485   : > { %v503_v15 = vmul.f32 %v502_v14, %v502_v14 }
 0x487   : > { %v504_v16 = vsel %vm307_vm0, %v503_v15, 0.0 }
 0x488   : > { %505 = vadd.xlane.f32.xlu2 %v504_v16 }
 0x4fb   : > { %v506_v2 = vpop.xlane.xlu2 %505 }
 0x4fc   : > { %v507_v17 = vmul.f32 %v506_v2, %v500_v11 }
 0x4fe   : > { %v508_v18 = vadd.f32 1e-05, %v507_v17 }
 0x500   : > { %658 = vrsqrt.f32 %v508_v18  ;;  %vm515_vm8 = vweird.f32 %v508_v18 }
 0x506   : > { %v659_v19 = vpop.eup %658 }
 0x507   : > { %v510_v20 = vmul.f32 %v659_v19, %v508_v18  ;;  %vm516_vm7 = vweird.f32 %v659_v19 }
 0x508   : > { %vm517_vm9 = vmor %vm515_vm8, %vm516_vm7 }
 0x509   : > { %v511_v22 = vmul.f32 %v659_v19, %v510_v20 }
 0x50b   : > { %v512_v23 = vmul.f32 0.5, %v511_v22 }
 0x50d   : > { %v513_v24 = vsub.f32 1.5, %v512_v23 }
 0x50f   : > { %v514_v25 = vmul.f32 %v659_v19, %v513_v24 }
 0x511   : > { %v518_v27 = vsel %vm517_vm9, %v659_v19, %v514_v25 }
 0x512   : > { %v519_v29 = vmul.f32 %v518_v27, %v502_v14 }
 0x514   : > { %v524_v30 = vmul.f32 %v646_v26, %v519_v29 }
 0x516   : > { %v529_v33 = vadd.f32 %v647_v28, %v524_v30 }
 0x518   : > { %v535_v34 = vmul.f32 %v619_v32, %v529_v33 }
 0x51a   : > { %536 = vst.msk [vmem:[%s282_s20] sm:$0xff] %vm307_vm0, %v535_v34 }
 0x51b PF: > { %s26_s9 = sadd.s32 1, %s680_s9  }
 0x51c   : > { %p23_p4 = scmp.ge.s32.totalorder %s26_s9, 4  }
 0x51e   :  { %25 = sbr.rel (!%p23_p4) target bundleno = 7 (0x7), region = 78 }

// kernel: _lambda_.21
= control target key start
LH: loop header
LB: loop body
LE: loop exit
PB: predicated region body
PF: predicated region fallthrough
CT: control target
= control target key end

     0   :  { %s992_s30 = smov [#allocation4]   ;;  %s1171_s0 = inlined_call_operand.vmem [shape: s32[2], index: 0, kind: input, shape index: {}]   ;;  %s1172_s1 = inlined_call_operand.vmem [shape: f32[2,16,32], index: 1, kind: input, shape index: {}]   ;;  %s1173_s2 = inlined_call_operand.vmem [shape: bf16[9,32,64], index: 2, kind: input, shape index: {}]   ;;  %s1174_s3 = inlined_call_operand.vmem [shape: f32[1,64], index: 3, kind: input, shape index: {}]   ;;  %s1175_s4 = inlined_call_operand.vmem [shape: bf16[1,64,32], index: 4, kind: input, shape index: {}]   ;;  %s1176_s5 = inlined_call_operand.vmem [shape: f32[1,32], index: 5, kind: input, shape index: {}]   ;;  %s1177_s6 = inlined_call_operand.vmem [shape: f32[1,32], index: 6, kind: input, shape index: {}]   ;;  %s1178_s7 = inlined_call_operand.vmem [shape: f32[1,32], index: 7, kind: input, shape index: {}]   ;;  %s1179_s8 = inlined_call_operand.vmem [shape: f32[2,8,32], index: 8, kind: output, shape index: {}]  }
   0x1   :  { %s14_s29 = sshll.u32 %s1171_s0, 4  ;;  %s15_s29 = int_to_ptr.vmem [resolvable:$true] %s14_s29 }
   0x2   :  { %17 = dma.vmem_to_smem %s15_s29, 16, %s992_s30, [#allocation3] }
   0x3   :  { %986 = dma.done.wait [#allocation3], 16 }
   0x4   :  { %987 = vsyncadd [#allocation3], 4294967280 }
   0x5   :  { %20 = sfence }
   0x6   :  { %s1043_s9 = smov 0  }
   0x7 LB: > { %s1049_s10 = sadd.s32 4294967295, %s990_s9   ;;  %p791_p0 = scmp.ge.s32.totalorder %s990_s9, 1  ;;  %s990_s9 = sphi %s1043_s9, %s26_s9  }
   0x8   : > { %p246_p1 = scmp.lt.s32.totalorder %s990_s9, 3 }
   0xa   : > { %p247_p2 = pnand %p791_p0, %p246_p1 }
   0xb   : > { %p277_p3 = scmp.lt.s32.totalorder (!%p247_p2), %s1049_s10, 1  ;;  %s287_s23 = sld [smem:[#allocation4 + %s1049_s10]] (!%p247_p2) }
   0xc   : > { %250 = sbr.rel (%p247_p2) target bundleno = 607 (0x25f), region = 48 }
  0x11   : > { %v934_v0 = vld [vmem:[%s1173_s2 + $0x28] sm:$0xff]  ;;  %v932_v1 = vld [vmem:[%s1173_s2 + $0x18] sm:$0xff]  ;;  %v933_v4 = vld [vmem:[%s1173_s2 + $0x20] sm:$0xff]  ;;  %s1070_s20 = scalar_select %p277_p3, %s1049_s10, 1  ;;  %vm320_vm0 = vcmask 261120   ;;  %vm623_vm1 = vcmask 523264  }
  0x12   : > { %v930_v2 = vld [vmem:[%s1173_s2 + $0x8] sm:$0xff]  ;;  %v936_v3 = vld [vmem:[%s1173_s2 + $0x38] sm:$0xff]  ;;  %393 = vmatpush.bf16.msra.mxu2 %v934_v0  ;;  %330 = vmatpush.bf16.msra.mxu0 %v932_v1  ;;  %v931_v5 = vld [vmem:[%s1173_s2 + $0x10] sm:$0xff]  ;;  %vm681_vm2 = vcmask 1043456  }
  0x13   : > { %358 = vmatpush.bf16.msra.mxu1 %v930_v2  ;;  %430 = vmatpush.bf16.msra.mxu3 %v936_v3  ;;  %v929_v6 = vld [vmem:[%s1173_s2] sm:$0xff]  ;;  %v935_v7 = vld [vmem:[%s1173_s2 + $0x30] sm:$0xff]  ;;  %s928_s27 = sshll.u32 %s1070_s20, 4  ;;  %v938_v8 = vld [vmem:[%s1173_s2 + $0x48] sm:$0xff]  ;;  %s794_s10 = sshll.u32 %s1070_s20, 3 }
  0x14   : > { %v942_v9 = vld [vmem:[%s1173_s2 + $0x68] sm:$0xff]  ;;  %s281_s13 = scalar_lea.vmem %s1172_s1, %s928_s27  ;;  %v944_v10 = vld [vmem:[%s1173_s2 + $0x78] sm:$0xff]  ;;  %v937_v16 = vld [vmem:[%s1173_s2 + $0x40] sm:$0xff]  ;;  %s285_s30 = scalar_lea.vmem %s1179_s8, %s794_s10 }
  0x15   : > { %v940_v11 = vld [vmem:[%s1173_s2 + $0x58] sm:$0xff]  ;;  %v1097_v12 = vld [vmem:[%s281_s13] sm:$0xff]  ;;  %v1099_v13 = vld [vmem:[%s281_s13 + $0x8] sm:$0xff] }
  0x16   : > { %394 = vmatpush.bf16.msra.mxu2 %v933_v4  ;;  %331 = vmatpush.bf16.msra.mxu0 %v931_v5  ;;  %v295_v14 = vpack.c.bf16 %v1099_v13, %v1097_v12  ;;  %v290_v15 = vpack.c.bf16 %v1097_v12, %v1097_v12  ;;  %v941_v17 = vld [vmem:[%s1173_s2 + $0x60] sm:$0xff]  ;;  %v943_v21 = vld [vmem:[%s1173_s2 + $0x70] sm:$0xff]  ;;  %v946_v26 = vld [vmem:[%s1173_s2 + $0x88] sm:$0xff]  ;;  %v582_v38 = vpack.c.bf16 %v1099_v13, %v1099_v13 }
  0x17   : > { %359 = vmatpush.bf16.msra.mxu1 %v929_v6  ;;  %431 = vmatpush.bf16.msra.mxu3 %v935_v7  ;;  %v939_v22 = vld [vmem:[%s1173_s2 + $0x50] sm:$0xff]  ;;  %v945_v29 = vld [vmem:[%s1173_s2 + $0x80] sm:$0xff]  ;;  %v950_v41 = vld [vmem:[%s1175_s4 + $0x18] sm:$0xff] }
  0x18   : > { %v371_v18 = vrot.slane %v295_v14, 1  ;;  %v302_v19 = vshrl.u32 %v295_v14, 16  ;;  %v304_v20 = vshll.u32 %v295_v14, 16  ;;  %v515_v33 = vrot.slane %v295_v14, 3  ;;  %v949_v44 = vld [vmem:[%s1175_s4 + $0x10] sm:$0xff]  ;;  %v948_v47 = vld [vmem:[%s1175_s4 + $0x8] sm:$0xff] }
  0x19   : > { %v443_v36 = vrot.slane %v295_v14, 2  ;;  %v947_v49 = vld [vmem:[%s1175_s4] sm:$0xff] }
  0x1a   : > { %465 = vmatpush.bf16.msrb.mxu0 %v938_v8  ;;  %537 = vmatpush.bf16.msrb.mxu2 %v942_v9  ;;  %v306_v23 = vrot.slane %v304_v20, 1  ;;  %v406_v24 = vrot.slane %v302_v19, 1  ;;  %v407_v25 = vrot.slane %v304_v20, 2  ;;  %v478_v30 = vrot.slane %v302_v19, 2  ;;  %v962_v2 = vld [vmem:[%s1174_s3] ss:$0 sm:$0xff] }
  0x1b   : > { %574 = vmatpush.bf16.msrb.mxu3 %v944_v10  ;;  %502 = vmatpush.bf16.msrb.mxu1 %v940_v11  ;;  %v479_v31 = vrot.slane %v304_v20, 3  ;;  %v550_v34 = vrot.slane %v302_v19, 3  ;;  %v551_v35 = vrot.slane %v304_v20, 4  ;;  %v682_v10 = vrot.slane %v1097_v12, 4  ;;  %v963_v14 = vld [vmem:[%s1176_s5] ss:$0 sm:$0xff] }
  0x1c   : > { %816 = vmatmul.msk.bf16.vlgmr.msra.gmra.mxu1 %vm320_vm0, %v290_v15  ;;  %829 = vmatmul.msk.bf16.vlgmr.msra.gmra.mxu2 %vm320_vm0, %v371_v18  ;;  %v307_v27 = vor.u32 %v306_v23, %v302_v19  ;;  %v408_v28 = vor.u32 %v407_v25, %v406_v24  ;;  %v683_v11 = vrot.slane %v1099_v13, 4 }
  0x1d   : > { %v480_v32 = vor.u32 %v479_v31, %v478_v30  ;;  %v552_v37 = vor.u32 %v551_v35, %v550_v34 }
  0x1e   : > { %466 = vmatpush.bf16.msrb.mxu0 %v937_v16  ;;  %538 = vmatpush.bf16.msrb.mxu2 %v941_v17  ;;  %v684_v16 = vsel %vm681_vm2, %v682_v10, %v683_v11 }
  0x1f   : > { %575 = vmatpush.bf16.msrb.mxu3 %v943_v21  ;;  %503 = vmatpush.bf16.msrb.mxu1 %v939_v22  ;;  %v993_v21 = vmov 32.0  }
  0x20   : > { %807 = vmatmul.msk.bf16.vlgmr.msra.gmra.mxu0 %vm320_vm0, %v307_v27  ;;  %842 = vmatmul.msk.bf16.vlgmr.msra.gmra.mxu3 %vm320_vm0, %v408_v28  ;;  %966 = vrcp.f32 %v993_v21 }
  0x22   : > { %609 = vmatpush.bf16.msra.mxu0 %v946_v26 }
  0x23   : > { %670 = vmatpush.bf16.msra.mxu1 %v950_v41  ;;  %v728_v41 = vstv %s287_s23 }
  0x26   : > { %610 = vmatpush.bf16.msra.mxu0 %v945_v29  ;;  %v967_v22 = vpop.eup %966 }
  0x27   : > { %671 = vmatpush.bf16.msra.mxu1 %v949_v44  ;;  %v691_v23 = vmul.f32 32.0, %v967_v22  ;;  %vm695_vm3 = vweird.f32 %v967_v22 }
  0x29   : > { %v692_v12 = vsub.f32 1.0, %v691_v23 }
  0x2b   : > { %672 = vmatpush.bf16.msra.mxu1 %v948_v47  ;;  %v693_v13 = vmul.f32 %v967_v22, %v692_v12 }
  0x2c   : > { %868 = vmatmul.msk.bf16.vlgmr.msrb.gmra.mxu1 %vm320_vm0, %v480_v32  ;;  %881 = vmatmul.msk.bf16.vlgmr.msrb.gmra.mxu2 %vm320_vm0, %v515_v33 }
  0x2d   : > { %v694_v24 = vadd.f32 %v967_v22, %v693_v13 }
  0x2f   : > { %673 = vmatpush.bf16.msra.mxu1 %v947_v49  ;;  %v696_v25 = vsel %vm695_vm3, %v967_v22, %v694_v24 }
  0x30   : > { %855 = vmatmul.msk.bf16.vlgmr.msrb.gmra.mxu0 %vm320_vm0, %v443_v36  ;;  %894 = vmatmul.msk.bf16.vlgmr.msrb.gmra.mxu3 %vm320_vm0, %v552_v37  ;;  %v726_v37 = vlaneseq }
  0x40   : > { %907 = vmatmul.msk.bf16.vlgmr.msra.gmra.mxu0 %vm320_vm0, %v582_v38 }
  0x99   : > { %v361_v39 = vpop.f32.mrf.mxu1 }
  0x9d   : > { %v333_v40 = vpop.f32.mrf.mxu0 }
  0x9e   : > { %v362_v50 = vadd.f32 %v361_v39, %v333_v40  ;;  %v727_v40 = vshrl.u32 %v726_v37, 7 }
  0x9f   : > { %v396_v42 = vpop.f32.mrf.mxu2 }
  0xa0   : > { %v400_v53 = vadd.f32 %v396_v42, %v362_v50  ;;  %vm729_vm7 = vcmp.lt.s32.totalorder %v727_v40, %v728_v41 }
  0xa1   : > { %v363_v43 = vpop.f32.mrf.mxu1 }
  0xa2   : > { %v964_v43 = vld [vmem:[%s1177_s6] ss:$0 sm:$0xff] }
  0xa3   : > { %v433_v45 = vpop.f32.mrf.mxu3 }
  0xa4   : > { %v437_v55 = vadd.f32 %v433_v45, %v400_v53  ;;  %v965_v45 = vld [vmem:[%s1178_s7] ss:$0 sm:$0xff] }
  0xa5   : > { %v335_v46 = vpop.f32.mrf.mxu0 }
  0xa7   : > { %v398_v48 = vpop.f32.mrf.mxu2 }
  0xa8   : > { %v994_v48 = vmov 0.0  }
  0xa9   : > { %v505_v51 = vpop.f32.mrf.mxu1  ;;  %v925_v49 = vsel %vm729_vm7, 1.0, %v994_v48 }
  0xab   : > { %v435_v52 = vpop.f32.mrf.mxu3 }
  0xad   : > { %v468_v54 = vpop.f32.mrf.mxu0 }
  0xae   : > { %v472_v57 = vadd.f32 %v468_v54, %v437_v55 }
  0xaf   : > { %v540_v56 = vpop.f32.mrf.mxu2 }
  0xb0   : > { %v509_v60 = vadd.f32 %v505_v51, %v472_v57 }
  0xb1   : > { %v507_v58 = vpop.f32.mrf.mxu1 }
  0xb2   : > { %v544_v63 = vadd.f32 %v540_v56, %v509_v60 }
  0xb3   : > { %v577_v59 = vpop.f32.mrf.mxu3 }
  0xb4   : > { %v581_v1 = vadd.f32 %v577_v59, %v544_v63 }
  0xb5   : > { %v470_v61 = vpop.f32.mrf.mxu0 }
  0xb7   : > { %v542_v62 = vpop.f32.mrf.mxu2 }
  0xbb   : > { %v579_v0 = vpop.f32.mrf.mxu3 }
  0xbd   : > { %v612_v3 = vpop.f32.mrf.mxu0 }
  0xbe   : > { %v616_v4 = vadd.f32 %v612_v3, %v581_v1 }
  0xc0   : > { %v621_v5 = vadd.f32 %v962_v2, %v616_v4 }
  0xc2   : > { %v622_v6 = vmax.f32 %v621_v5, 0.0 }
  0xc4   : > { %624 = vst.msk [vmem:[#allocation2] sm:$0xff] %vm623_vm1, %v622_v6 }
  0xc5   : > { %v614_v7 = vpop.f32.mrf.mxu0 }
  0xcb   : > { %v625_v8 = vld [vmem:[#allocation2] sm:$0xff] }
  0xcc   : > { %v626_v9 = vpack.c.bf16 %v625_v8, %v625_v8 }
  0xce   : > { %924 = vmatmul.msk.bf16.vlgmr.msra.gmra.mxu1 %vm623_vm1, %v626_v9 }
 0x14b   : > { %v675_v15 = vpop.f32.mrf.mxu1 }
 0x14c   : > { %v676_v17 = vadd.f32 %v963_v14, %v675_v15 }
 0x14e   : > { %v686_v18 = vadd.f32 %v684_v16, %v676_v17 }
 0x150   : > { %v687_v19 = vsel %vm320_vm0, %v686_v18, 0.0 }
 0x151   : > { %688 = vadd.xlane.f32.xlu0 %v687_v19 }
 0x153   : > { %v677_v20 = vpop.f32.mrf.mxu1 }
 0x1c4   : > { %v689_v26 = vpop.xlane.xlu0 %688 }
 0x1c5   : > { %v697_v27 = vmul.f32 %v696_v25, %v689_v26 }
 0x1c7   : > { %v698_v28 = vsub.f32 %v686_v18, %v697_v27 }
 0x1c9   : > { %v699_v29 = vmul.f32 %v698_v28, %v698_v28 }
 0x1cb   : > { %v700_v30 = vsel %vm320_vm0, %v699_v29, 0.0 }
 0x1cc   : > { %701 = vadd.xlane.f32.xlu0 %v700_v30 }
 0x23f   : > { %v702_v31 = vpop.xlane.xlu0 %701 }
 0x240   : > { %v703_v32 = vmul.f32 %v702_v31, %v696_v25 }
 0x242   : > { %v704_v33 = vadd.f32 1e-05, %v703_v32 }
 0x244   : > { %968 = vrsqrt.f32 %v704_v33  ;;  %vm711_vm5 = vweird.f32 %v704_v33 }
 0x24a   : > { %v969_v34 = vpop.eup %968 }
 0x24b   : > { %v706_v35 = vmul.f32 %v969_v34, %v704_v33  ;;  %vm712_vm4 = vweird.f32 %v969_v34 }
 0x24c   : > { %vm713_vm6 = vmor %vm711_vm5, %vm712_vm4 }
 0x24d   : > { %v707_v36 = vmul.f32 %v969_v34, %v706_v35 }
 0x24f   : > { %v708_v38 = vmul.f32 0.5, %v707_v36 }
 0x251   : > { %v709_v39 = vsub.f32 1.5, %v708_v38 }
 0x253   : > { %v710_v42 = vmul.f32 %v969_v34, %v709_v39 }
 0x255   : > { %v714_v44 = vsel %vm713_vm6, %v969_v34, %v710_v42 }
 0x256   : > { %v715_v46 = vmul.f32 %v714_v44, %v698_v28 }
 0x258   : > { %v720_v47 = vmul.f32 %v964_v43, %v715_v46 }
 0x25a   : > { %v725_v50 = vadd.f32 %v965_v45, %v720_v47 }
 0x25c   : > { %v732_v51 = vmul.f32 %v925_v49, %v725_v50 }
 0x25e   : > { %733 = vst.msk [vmem:[%s285_s30] sm:$0xff] %vm320_vm0, %v732_v51 }
 0x25f PF: > { %s26_s9 = sadd.s32 1, %s990_s9  }
 0x260   : > { %p23_p4 = scmp.ge.s32.totalorder %s26_s9, 4  }
 0x262   :  { %25 = sbr.rel (!%p23_p4) target bundleno = 7 (0x7), region = 86 }

// kernel: _lambda_.26
= control target key start
LH: loop header
LB: loop body
LE: loop exit
PB: predicated region body
PF: predicated region fallthrough
CT: control target
= control target key end

     0   :  { %vm56_vm0 = vcmask 523264   ;;  %vm76_vm1 = vcmask 7168   ;;  %s152_s1 = inlined_call_operand.vmem [shape: bf16[64,1], index: 1, kind: input, shape index: {}]   ;;  %s153_s2 = inlined_call_operand.<no memory space> [shape: f32[1,1], index: 2, kind: input, shape index: {}]   ;;  %s154_s0 = inlined_call_operand.vmem [shape: f32[16,64], index: 0, kind: input, shape index: {}]   ;;  %s155_s3 = inlined_call_operand.vmem [shape: f32[16,1], index: 3, kind: output, shape index: {}]  }
   0x1   :  { %v103_v0 = vld [vmem:[%s152_s1 + $0x18] sm:$0xff]  ;;  %v8_v1 = vstv %s153_s2  ;;  %v102_v2 = vld [vmem:[%s152_s1 + $0x10] sm:$0xff]  ;;  %v101_v3 = vld [vmem:[%s152_s1 + $0x8] sm:$0xff] }
   0x2   :  { %9 = vst [vmem:[#allocation2] sm:$0x1] %v8_v1  ;;  %64 = vmatpush.bf16.msra.mxu0 %v103_v0  ;;  %v100_v4 = vld [vmem:[%s152_s1] sm:$0xff]  ;;  %v18_v6 = vld [vmem:[%s154_s0 + $0x8] sm:$0xff] }
   0x3   :  { %v17_v5 = vld [vmem:[%s154_s0] sm:$0xff] }
   0x4   :  { %v19_v7 = vpack.c.bf16 %v18_v6, %v17_v5 }
   0x6   :  { %65 = vmatpush.bf16.msra.mxu0 %v102_v2 }
   0x9   :  { %v104_v8 = vld [vmem:[#allocation2] ss:$0 sm:$0xff] }
   0xa   :  { %66 = vmatpush.bf16.msra.mxu0 %v101_v3 }
   0xe   :  { %67 = vmatpush.bf16.msra.mxu0 %v100_v4 }
  0x11   :  { %99 = vmatmul.msk.bf16.vlgmr.msra.gmra.mxu0 %vm56_vm0, %v19_v7 }
  0x8e   :  { %v69_v9 = vpop.f32.mrf.mxu0 }
  0x8f   :  { %v70_v10 = vadd.f32 %v104_v8, %v69_v9 }
  0x91   :  { %v74_v11 = vmax.f32 %v70_v10, 0.0 }
  0x93   :  { %77 = vst.msk [vmem:[%s155_s3] sm:$0xff] %vm76_vm1, %v74_v11 }
  0x96   :  { %v71_v12 = vpop.f32.mrf.mxu0 }
  0x97   :  { %v72_v13 = vadd.f32 %v104_v8, %v71_v12 }
  0x99   :  { %v75_v14 = vmax.f32 %v72_v13, 0.0 }
  0x9b   :  { %78 = vst.msk [vmem:[%s155_s3 + $0x8] sm:$0xff] %vm76_vm1, %v75_v14 }

// kernel: _lambda_.27
= control target key start
LH: loop header
LB: loop body
LE: loop exit
PB: predicated region body
PF: predicated region fallthrough
CT: control target
= control target key end

     0   :  { %s694_s18 = smov 0   ;;  %s783_s0 = inlined_call_operand.vmem [shape: f32[2,34,32], index: 0, kind: input, shape index: {}]   ;;  %s784_s1 = inlined_call_operand.vmem [shape: bf16[3,32,64], index: 1, kind: input, shape index: {}]   ;;  %s785_s2 = inlined_call_operand.vmem [shape: f32[1,64], index: 2, kind: input, shape index: {}]   ;;  %s786_s3 = inlined_call_operand.vmem [shape: f32[1,64], index: 3, kind: input, shape index: {}]   ;;  %s787_s4 = inlined_call_operand.vmem [shape: f32[1,64], index: 4, kind: input, shape index: {}]   ;;  %s788_s5 = inlined_call_operand.vmem [shape: f32[2,32,64], index: 5, kind: output, shape index: {}]  }
   0x1 LB: > { %s575_s19 = sadd.s32 4294967295, %s661_s18   ;;  %p579_p0 = scmp.ge.s32.totalorder %s661_s18, 1  ;;  %s661_s18 = sphi %s694_s18, %s15_s18  }
   0x2   : > { %p187_p1 = scmp.lt.s32.totalorder %s661_s18, 3 }
   0x4   : > { %p188_p2 = pnand %p579_p0, %p187_p1 }
   0x5   : > { %p215_p3 = scmp.lt.s32.totalorder (!%p188_p2), %s575_s19, 1 }
   0x6   : > { %191 = sbr.rel (%p188_p2) target bundleno = 453 (0x1c5), region = 40 }
   0xb   : > { %v625_v0 = vld [vmem:[%s784_s1 + $0x8] sm:$0xff]  ;;  %v624_v2 = vld [vmem:[%s784_s1] sm:$0xff]  ;;  %v627_v3 = vld [vmem:[%s784_s1 + $0x18] sm:$0xff]  ;;  %s790_s19 = smov (!%p215_p3, %s575_s19), 1  ;;  %vm276_vm0 = vcmask 261120   ;;  %vm345_vm1 = vcmask 1046528  }
   0xc   : > { %v629_v1 = vld [vmem:[%s784_s1 + $0x28] sm:$0xff]  ;;  %324 = vmatpush.bf16.msra.mxu1 %v625_v0  ;;  %v628_v4 = vld [vmem:[%s784_s1 + $0x20] sm:$0xff]  ;;  %289 = vmatpush.bf16.msra.mxu0 %v627_v3  ;;  %v626_v5 = vld [vmem:[%s784_s1 + $0x10] sm:$0xff]  ;;  %s632_s7 = smul.u32 40, %s790_s19  ;;  %vm243_vm2 = vsmask.f32 7424 }
   0xd   : > { %375 = vmatpush.bf16.msra.mxu2 %v629_v1  ;;  %630 = vmatpush.bf16.msra.mxu3 %v627_v3  ;;  %v642_v34 = vld [vmem:[%s785_s2] ss:$0 sm:$0xff]  ;;  %vm400_vm3 = vcmask 523264   ;;  %v663_v60 = vmov 64.0   ;;  %s623_s17 = sshll.u32 %s790_s19, 5 }
   0xe   : > { %s219_s10 = scalar_lea.vmem %s783_s0, %s632_s7  ;;  %645 = vrcp.f32 %v663_v60  ;;  %s767_s22 = scalar_lea.vmem %s788_s5, %s623_s17 }
   0xf   : > { %v226_v6 = vld [vmem:[%s219_s10] sm:$0xff]  ;;  %v227_v7 = vld [vmem:[%s219_s10 + $0x8] sm:$0xff]  ;;  %v228_v8 = vld [vmem:[%s219_s10 + $0x10] sm:$0xff] }
  0x10   : > { %325 = vmatpush.bf16.msra.mxu1 %v624_v2  ;;  %290 = vmatpush.bf16.msra.mxu0 %v626_v5  ;;  %v231_v9 = vpack.c.bf16 %v227_v7, %v226_v6  ;;  %v229_v10 = vld [vmem:[%s219_s10 + $0x18] sm:$0xff]  ;;  %v230_v11 = vld [vmem:[%s219_s10 + $0x20] sm:$0x3] }
  0x11   : > { %376 = vmatpush.bf16.msra.mxu2 %v628_v4  ;;  %631 = vmatpush.bf16.msra.mxu3 %v626_v5  ;;  %v232_v12 = vpack.c.bf16 %v229_v10, %v228_v8  ;;  %v237_v13 = vpack.c.bf16 %v230_v11, %v230_v11 }
  0x12   : > { %v346_v14 = vrot.slane %v231_v9, 1  ;;  %v245_v15 = vshrl.u32 %v231_v9, 16  ;;  %v247_v16 = vshll.u32 %v231_v9, 16 }
  0x13   : > { %605 = vmatmul.msk.bf16.vlgmr.msra.gmra.mxu1 %vm276_vm0, %v231_v9  ;;  %v347_v17 = vrot.slane %v232_v12, 1  ;;  %v252_v18 = vshll.u32 %v232_v12, 16  ;;  %v256_v19 = vshrl.u32 %v232_v12, 16  ;;  %v260_v20 = vshll.u32 %v237_v13, 16 }
  0x14   : > { %v249_v21 = vrot.slane %v247_v16, 1  ;;  %v349_v29 = vrot.slane %v237_v13, 1  ;;  %v646_v61 = vpop.eup %645 }
  0x15   : > { %v348_v22 = vsel %vm345_vm1, %v346_v14, %v347_v17  ;;  %v254_v23 = vrot.slane %v252_v18, 1  ;;  %v262_v24 = vrot.slane %v260_v20, 1  ;;  %v414_v62 = vmul.f32 64.0, %v646_v61 }
  0x16   : > { %619 = vmatmul.msk.bf16.vlgmr.msra.gmra.mxu2 %vm276_vm0, %v348_v22  ;;  %v250_v25 = vor.u32 %v249_v21, %v245_v15  ;;  %v350_v30 = vsel %vm345_vm1, %v347_v17, %v349_v29  ;;  %vm418_vm4 = vweird.f32 %v646_v61 }
  0x17   : > { %v258_v26 = vor.u32 %v256_v19, %v254_v23  ;;  %v415_v63 = vsub.f32 1.0, %v414_v62 }
  0x18   : > { %v255_v27 = vsel %vm243_vm2, %v250_v25, %v254_v23 }
  0x19   : > { %595 = vmatmul.msk.bf16.vlgmr.msra.gmra.mxu0 %vm276_vm0, %v255_v27  ;;  %v263_v28 = vsel %vm243_vm2, %v258_v26, %v262_v24  ;;  %v416_v0 = vmul.f32 %v646_v61, %v415_v63 }
  0x1a   : > { %596 = vmatmul.msk.bf16.vlgmr.msra.gmra.mxu3 %vm276_vm0, %v263_v28 }
  0x1b   : > { %v417_v1 = vadd.f32 %v646_v61, %v416_v0 }
  0x1d   : > { %v419_v2 = vsel %vm418_vm4, %v646_v61, %v417_v1 }
  0x23   : > { %606 = vmatmul.msk.bf16.gmra.mxu1 %vm276_vm0, %v232_v12 }
  0x26   : > { %620 = vmatmul.msk.bf16.gmra.mxu2 %vm276_vm0, %v350_v30 }
  0x90   : > { %v327_v31 = vpop.f32.mrf.mxu1 }
  0x96   : > { %v292_v32 = vpop.f32.mrf.mxu0 }
  0x97   : > { %v328_v33 = vadd.f32 %v327_v31, %v292_v32 }
  0x98   : > { %v329_v35 = vpop.f32.mrf.mxu1 }
  0x99   : > { %v378_v36 = vpop.f32.mrf.mxu2 }
  0x9a   : > { %v388_v37 = vadd.f32 %v378_v36, %v328_v33 }
  0x9c   : > { %v396_v38 = vadd.f32 %v642_v34, %v388_v37 }
  0x9d   : > { %v297_v44 = vpop.f32.mrf.mxu3 }
  0x9e   : > { %v401_v39 = vsel %vm400_vm3, %v396_v38, 0.0  ;;  %v294_v40 = vpop.f32.mrf.mxu0 }
  0x9f   : > { %402 = vadd.xlane.f32.xlu0 %v401_v39  ;;  %v330_v41 = vadd.f32 %v329_v35, %v294_v40  ;;  %v643_v40 = vld [vmem:[%s786_s3] ss:$0 sm:$0xff] }
  0xa0   : > { %v332_v45 = vpop.f32.mrf.mxu1 }
  0xa1   : > { %v380_v42 = vpop.f32.mrf.mxu2  ;;  %v333_v47 = vadd.f32 %v332_v45, %v297_v44 }
  0xa2   : > { %v389_v43 = vadd.f32 %v380_v42, %v330_v41 }
  0xa4   : > { %v397_v46 = vadd.f32 %v642_v34, %v389_v43  ;;  %v644_v43 = vld [vmem:[%s787_s4] ss:$0 sm:$0xff] }
  0xa5   : > { %v299_v52 = vpop.f32.mrf.mxu3 }
  0xa6   : > { %v404_v48 = vsel %vm400_vm3, %v397_v46, 0.0 }
  0xa7   : > { %405 = vadd.xlane.f32.xlu0 %v404_v48 }
  0xa8   : > { %v334_v53 = vpop.f32.mrf.mxu1 }
  0xa9   : > { %v383_v49 = vpop.f32.mrf.mxu2  ;;  %v335_v55 = vadd.f32 %v334_v53, %v299_v52 }
  0xaa   : > { %v390_v50 = vadd.f32 %v383_v49, %v333_v47 }
  0xac   : > { %v398_v51 = vadd.f32 %v642_v34, %v390_v50 }
  0xae   : > { %v407_v54 = vsel %vm400_vm3, %v398_v51, 0.0 }
  0xaf   : > { %408 = vadd.xlane.f32.xlu1 %v407_v54 }
  0xb1   : > { %v385_v56 = vpop.f32.mrf.mxu2 }
  0xb2   : > { %v391_v57 = vadd.f32 %v385_v56, %v335_v55 }
  0xb4   : > { %v399_v58 = vadd.f32 %v642_v34, %v391_v57 }
  0xb6   : > { %v410_v59 = vsel %vm400_vm3, %v399_v58, 0.0 }
  0xb7   : > { %411 = vadd.xlane.f32.xlu1 %v410_v59 }
 0x112   : > { %v403_v3 = vpop.xlane.xlu0 %402 }
 0x113   : > { %v420_v4 = vmul.f32 %v419_v2, %v403_v3 }
 0x115   : > { %v424_v5 = vsub.f32 %v396_v38, %v420_v4 }
 0x117   : > { %v428_v6 = vmul.f32 %v424_v5, %v424_v5 }
 0x119   : > { %v432_v7 = vsel %vm400_vm3, %v428_v6, 0.0 }
 0x11a   : > { %433 = vadd.xlane.f32.xlu2 %v432_v7  ;;  %v406_v8 = vpop.xlane.xlu0 %405 }
 0x11b   : > { %v421_v9 = vmul.f32 %v419_v2, %v406_v8 }
 0x11d   : > { %v742_v10 = vsub.f32 %v397_v46, %v421_v9 }
 0x11f   : > { %v429_v11 = vmul.f32 %v742_v10, %v742_v10 }
 0x121   : > { %v435_v12 = vsel %vm400_vm3, %v429_v11, 0.0 }
 0x122   : > { %v409_v13 = vpop.xlane.xlu1 %408  ;;  %436 = vadd.xlane.f32.xlu2 %v435_v12 }
 0x123   : > { %v422_v14 = vmul.f32 %v419_v2, %v409_v13 }
 0x125   : > { %v747_v15 = vsub.f32 %v398_v51, %v422_v14 }
 0x127   : > { %v430_v16 = vmul.f32 %v747_v15, %v747_v15 }
 0x129   : > { %v438_v17 = vsel %vm400_vm3, %v430_v16, 0.0 }
 0x12a   : > { %v412_v18 = vpop.xlane.xlu1 %411  ;;  %439 = vadd.xlane.f32.xlu0 %v438_v17 }
 0x12b   : > { %v423_v19 = vmul.f32 %v419_v2, %v412_v18 }
 0x12d   : > { %v752_v20 = vsub.f32 %v399_v58, %v423_v19 }
 0x12f   : > { %v431_v21 = vmul.f32 %v752_v20, %v752_v20 }
 0x131   : > { %v441_v22 = vsel %vm400_vm3, %v431_v21, 0.0 }
 0x132   : > { %442 = vadd.xlane.f32.xlu1 %v441_v22 }
 0x18d   : > { %v434_v23 = vpop.xlane.xlu2 %433 }
 0x18e   : > { %v444_v24 = vmul.f32 %v434_v23, %v419_v2 }
 0x190   : > { %v448_v25 = vadd.f32 1e-05, %v444_v24 }
 0x192   : > { %647 = vrsqrt.f32 %v448_v25  ;;  %vm458_vm6 = vweird.f32 %v448_v25 }
 0x195   : > { %v437_v26 = vpop.xlane.xlu2 %436 }
 0x196   : > { %v445_v27 = vmul.f32 %v437_v26, %v419_v2 }
 0x198   : > { %v648_v28 = vpop.eup %647  ;;  %v449_v29 = vadd.f32 1e-05, %v445_v27 }
 0x199   : > { %v453_v30 = vmul.f32 %v648_v28, %v448_v25  ;;  %vm459_vm5 = vweird.f32 %v648_v28 }
 0x19a   : > { %649 = vrsqrt.f32 %v449_v29  ;;  %vm460_vm7 = vmor %vm458_vm6, %vm459_vm5  ;;  %vm468_vm9 = vweird.f32 %v449_v29 }
 0x19b   : > { %v454_v31 = vmul.f32 %v648_v28, %v453_v30 }
 0x19d   : > { %v455_v32 = vmul.f32 0.5, %v454_v31  ;;  %v440_v33 = vpop.xlane.xlu0 %439 }
 0x19e   : > { %v446_v34 = vmul.f32 %v440_v33, %v419_v2 }
 0x19f   : > { %v456_v35 = vsub.f32 1.5, %v455_v32 }
 0x1a0   : > { %v650_v36 = vpop.eup %649  ;;  %v450_v37 = vadd.f32 1e-05, %v446_v34 }
 0x1a1   : > { %v457_v38 = vmul.f32 %v648_v28, %v456_v35  ;;  %v463_v39 = vmul.f32 %v650_v36, %v449_v29  ;;  %vm469_vm8 = vweird.f32 %v650_v36 }
 0x1a2   : > { %651 = vrsqrt.f32 %v450_v37  ;;  %vm470_vm10 = vmor %vm468_vm9, %vm469_vm8  ;;  %vm478_vm12 = vweird.f32 %v450_v37 }
 0x1a3   : > { %v461_v41 = vsel %vm460_vm7, %v648_v28, %v457_v38  ;;  %v464_v42 = vmul.f32 %v650_v36, %v463_v39 }
 0x1a4   : > { %v492_v44 = vmul.f32 %v461_v41, %v424_v5 }
 0x1a5   : > { %v465_v45 = vmul.f32 0.5, %v464_v42  ;;  %v443_v46 = vpop.xlane.xlu1 %442 }
 0x1a6   : > { %v500_v47 = vmul.f32 %v643_v40, %v492_v44  ;;  %v447_v48 = vmul.f32 %v443_v46, %v419_v2 }
 0x1a7   : > { %v466_v49 = vsub.f32 1.5, %v465_v45 }
 0x1a8   : > { %v652_v50 = vpop.eup %651  ;;  %v508_v51 = vadd.f32 %v644_v43, %v500_v47  ;;  %v451_v52 = vadd.f32 1e-05, %v447_v48 }
 0x1a9   : > { %v467_v53 = vmul.f32 %v650_v36, %v466_v49  ;;  %v473_v54 = vmul.f32 %v652_v50, %v450_v37  ;;  %vm479_vm11 = vweird.f32 %v652_v50 }
 0x1aa   : > { %v512_v55 = vmax.f32 %v508_v51, 0.0  ;;  %653 = vrsqrt.f32 %v451_v52  ;;  %vm480_vm13 = vmor %vm478_vm12, %vm479_vm11  ;;  %vm488_vm15 = vweird.f32 %v451_v52 }
 0x1ab   : > { %v471_v56 = vsel %vm470_vm10, %v650_v36, %v467_v53  ;;  %v474_v57 = vmul.f32 %v652_v50, %v473_v54 }
 0x1ac   : > { %516 = vst.msk [vmem:[%s767_s22] sm:$0xff] %vm400_vm3, %v512_v55  ;;  %v493_v58 = vmul.f32 %v471_v56, %v742_v10 }
 0x1ad   : > { %v475_v59 = vmul.f32 0.5, %v474_v57 }
 0x1ae   : > { %v501_v60 = vmul.f32 %v643_v40, %v493_v58 }
 0x1af   : > { %v476_v61 = vsub.f32 1.5, %v475_v59 }
 0x1b0   : > { %v654_v62 = vpop.eup %653  ;;  %v509_v63 = vadd.f32 %v644_v43, %v501_v60 }
 0x1b1   : > { %v477_v0 = vmul.f32 %v652_v50, %v476_v61  ;;  %v483_v1 = vmul.f32 %v654_v62, %v451_v52  ;;  %vm489_vm14 = vweird.f32 %v654_v62 }
 0x1b2   : > { %v513_v2 = vmax.f32 %v509_v63, 0.0  ;;  %vm490_vm0 = vmor %vm488_vm15, %vm489_vm14 }
 0x1b3   : > { %v481_v3 = vsel %vm480_vm13, %v652_v50, %v477_v0  ;;  %v484_v4 = vmul.f32 %v654_v62, %v483_v1 }
 0x1b4   : > { %517 = vst.msk [vmem:[%s767_s22 + $0x8] sm:$0xff] %vm400_vm3, %v513_v2  ;;  %v494_v5 = vmul.f32 %v481_v3, %v747_v15 }
 0x1b5   : > { %v485_v6 = vmul.f32 0.5, %v484_v4 }
 0x1b6   : > { %v502_v7 = vmul.f32 %v643_v40, %v494_v5 }
 0x1b7   : > { %v486_v8 = vsub.f32 1.5, %v485_v6 }
 0x1b8   : > { %v510_v9 = vadd.f32 %v644_v43, %v502_v7 }
 0x1b9   : > { %v487_v10 = vmul.f32 %v654_v62, %v486_v8 }
 0x1ba   : > { %v514_v11 = vmax.f32 %v510_v9, 0.0 }
 0x1bb   : > { %v491_v12 = vsel %vm490_vm0, %v654_v62, %v487_v10 }
 0x1bc   : > { %518 = vst.msk [vmem:[%s767_s22 + $0x10] sm:$0xff] %vm400_vm3, %v514_v11  ;;  %v495_v13 = vmul.f32 %v491_v12, %v752_v20 }
 0x1be   : > { %v503_v14 = vmul.f32 %v643_v40, %v495_v13 }
 0x1c0   : > { %v511_v16 = vadd.f32 %v644_v43, %v503_v14 }
 0x1c2   : > { %v515_v17 = vmax.f32 %v511_v16, 0.0 }
 0x1c4   : > { %519 = vst.msk [vmem:[%s767_s22 + $0x18] sm:$0xff] %vm400_vm3, %v515_v17 }
 0x1c5 PF: > { %s15_s18 = sadd.s32 1, %s661_s18  }
 0x1c6   : > { %p12_p4 = scmp.ge.s32.totalorder %s15_s18, 4  }
 0x1c8   :  { %14 = sbr.rel (!%p12_p4) target bundleno = 1 (0x1), region = 72 }

// kernel: _lambda_.31
= control target key start
LH: loop header
LB: loop body
LE: loop exit
PB: predicated region body
PF: predicated region fallthrough
CT: control target
= control target key end

     0   :  { %vm55_vm0 = vcmask 523264   ;;  %vm72_vm1 = vcmask 7168   ;;  %s141_s1 = inlined_call_operand.vmem [shape: bf16[64,1], index: 1, kind: input, shape index: {}]   ;;  %s142_s2 = inlined_call_operand.<no memory space> [shape: f32[1,1], index: 2, kind: input, shape index: {}]   ;;  %s143_s0 = inlined_call_operand.vmem [shape: f32[8,64], index: 0, kind: input, shape index: {}]   ;;  %s144_s3 = inlined_call_operand.vmem [shape: f32[8,1], index: 3, kind: output, shape index: {}]  }
   0x1   :  { %v98_v0 = vld [vmem:[%s141_s1 + $0x18] sm:$0xff]  ;;  %v8_v1 = vstv %s142_s2  ;;  %v97_v2 = vld [vmem:[%s141_s1 + $0x10] sm:$0xff]  ;;  %v96_v3 = vld [vmem:[%s141_s1 + $0x8] sm:$0xff] }
   0x2   :  { %9 = vst [vmem:[#allocation2] sm:$0x1] %v8_v1  ;;  %63 = vmatpush.bf16.msra.mxu0 %v98_v0  ;;  %v95_v4 = vld [vmem:[%s141_s1] sm:$0xff] }
   0x3   :  { %v17_v5 = vld [vmem:[%s143_s0] sm:$0xff] }
   0x4   :  { %v18_v6 = vpack.c.bf16 %v17_v5, %v17_v5 }
   0x6   :  { %64 = vmatpush.bf16.msra.mxu0 %v97_v2 }
   0x9   :  { %v99_v7 = vld [vmem:[#allocation2] ss:$0 sm:$0xff] }
   0xa   :  { %65 = vmatpush.bf16.msra.mxu0 %v96_v3 }
   0xe   :  { %66 = vmatpush.bf16.msra.mxu0 %v95_v4 }
  0x11   :  { %94 = vmatmul.msk.bf16.vlgmr.msra.gmra.mxu0 %vm55_vm0, %v18_v6 }
  0x8e   :  { %v68_v8 = vpop.f32.mrf.mxu0 }
  0x8f   :  { %v69_v9 = vadd.f32 %v99_v7, %v68_v8 }
  0x91   :  { %73 = vst.msk [vmem:[%s144_s3] sm:$0xff] %vm72_vm1, %v69_v9 }
  0x96   :  { %v70_v10 = vpop.f32.mrf.mxu0 }

// kernel: _lambda_.28
= control target key start
LH: loop header
LB: loop body
LE: loop exit
PB: predicated region body
PF: predicated region fallthrough
CT: control target
= control target key end

     0   :  { %s781_s18 = smov 0   ;;  %s888_s0 = inlined_call_operand.vmem [shape: f32[2,34,64], index: 0, kind: input, shape index: {}]   ;;  %s889_s1 = inlined_call_operand.vmem [shape: bf16[3,64,64], index: 1, kind: input, shape index: {}]   ;;  %s890_s2 = inlined_call_operand.vmem [shape: f32[1,64], index: 2, kind: input, shape index: {}]   ;;  %s891_s3 = inlined_call_operand.vmem [shape: f32[1,64], index: 3, kind: input, shape index: {}]   ;;  %s892_s4 = inlined_call_operand.vmem [shape: f32[1,64], index: 4, kind: input, shape index: {}]   ;;  %s893_s5 = inlined_call_operand.vmem [shape: f32[2,32,64], index: 5, kind: output, shape index: {}]  }
   0x1 LB: > { %s622_s19 = sadd.s32 4294967295, %s748_s18   ;;  %p626_p0 = scmp.ge.s32.totalorder %s748_s18, 1  ;;  %s748_s18 = sphi %s781_s18, %s15_s18  }
   0x2   : > { %p187_p1 = scmp.lt.s32.totalorder %s748_s18, 3 }
   0x4   : > { %p188_p2 = pnand %p626_p0, %p187_p1 }
   0x5   : > { %p215_p3 = scmp.lt.s32.totalorder (!%p188_p2), %s622_s19, 1 }
   0x6   : > { %191 = sbr.rel (%p188_p2) target bundleno = 460 (0x1cc), region = 40 }
   0xb   : > { %v710_v0 = vld [vmem:[%s889_s1 + $0x38] sm:$0xff]  ;;  %v709_v3 = vld [vmem:[%s889_s1 + $0x30] sm:$0xff]  ;;  %s895_s19 = smov (!%p215_p3, %s622_s19), 1  ;;  %v708_v6 = vld [vmem:[%s889_s1 + $0x28] sm:$0xff]  ;;  %vm381_vm0 = vcmask 1046528   ;;  %vm296_vm2 = vcmask 523264  }
   0xc   : > { %v706_v1 = vld [vmem:[%s889_s1 + $0x18] sm:$0xff]  ;;  %307 = vmatpush.bf16.msra.mxu0 %v710_v0  ;;  %v705_v4 = vld [vmem:[%s889_s1 + $0x10] sm:$0xff]  ;;  %715 = vmatpush.bf16.msra.mxu3 %v710_v0  ;;  %s719_s7 = smul.u32 40, %s895_s19  ;;  %v704_v7 = vld [vmem:[%s889_s1 + $0x8] sm:$0xff]  ;;  %vm251_vm1 = vsmask.f32 7424 }
   0xd   : > { %v714_v2 = vld [vmem:[%s889_s1 + $0x58] sm:$0xff]  ;;  %354 = vmatpush.bf16.msra.mxu1 %v706_v1  ;;  %v713_v5 = vld [vmem:[%s889_s1 + $0x50] sm:$0xff]  ;;  %v712_v8 = vld [vmem:[%s889_s1 + $0x48] sm:$0xff]  ;;  %s702_s6 = sshll.u32 %s895_s19, 5 }
   0xe   : > { %421 = vmatpush.bf16.msra.mxu2 %v714_v2  ;;  %s219_s16 = scalar_lea.vmem %s888_s0, %s719_s7  ;;  %v707_v17 = vld [vmem:[%s889_s1 + $0x20] sm:$0xff]  ;;  %v750_v2 = vmov 64.0   ;;  %s872_s9 = scalar_lea.vmem %s893_s5, %s702_s6 }
   0xf   : > { %v226_v9 = vld [vmem:[%s219_s16] sm:$0xff]  ;;  %v227_v10 = vld [vmem:[%s219_s16 + $0x8] sm:$0xff]  ;;  %v228_v11 = vld [vmem:[%s219_s16 + $0x10] sm:$0xff]  ;;  %732 = vrcp.f32 %v750_v2 }
  0x10   : > { %308 = vmatpush.bf16.msra.mxu0 %v709_v3  ;;  %716 = vmatpush.bf16.msra.mxu3 %v709_v3  ;;  %v229_v12 = vld [vmem:[%s219_s16 + $0x18] sm:$0xff]  ;;  %v231_v13 = vpack.c.bf16 %v227_v10, %v226_v9  ;;  %v230_v14 = vld [vmem:[%s219_s16 + $0x20] sm:$0x3] }
  0x11   : > { %355 = vmatpush.bf16.msra.mxu1 %v705_v4  ;;  %v232_v15 = vpack.c.bf16 %v229_v12, %v228_v11  ;;  %v241_v16 = vpack.c.bf16 %v230_v14, %v230_v14  ;;  %v703_v18 = vld [vmem:[%s889_s1] sm:$0xff] }
  0x12   : > { %422 = vmatpush.bf16.msra.mxu2 %v713_v5  ;;  %v253_v19 = vshrl.u32 %v231_v13, 16  ;;  %v255_v20 = vshll.u32 %v231_v13, 16  ;;  %v382_v21 = vrot.slane %v231_v13, 1  ;;  %v711_v22 = vld [vmem:[%s889_s1 + $0x40] sm:$0xff] }
  0x13   : > { %v260_v23 = vshll.u32 %v232_v15, 16  ;;  %v383_v24 = vrot.slane %v232_v15, 1  ;;  %v264_v25 = vshrl.u32 %v232_v15, 16  ;;  %v268_v26 = vshll.u32 %v241_v16, 16  ;;  %v729_v40 = vld [vmem:[%s890_s2] ss:$0 sm:$0xff] }
  0x14   : > { %309 = vmatpush.bf16.msra.mxu0 %v708_v6  ;;  %717 = vmatpush.bf16.msra.mxu3 %v708_v6  ;;  %v257_v27 = vrot.slane %v255_v20, 1  ;;  %v385_v35 = vrot.slane %v241_v16, 1 }
  0x15   : > { %356 = vmatpush.bf16.msra.mxu1 %v704_v7  ;;  %v262_v28 = vrot.slane %v260_v23, 1  ;;  %v270_v29 = vrot.slane %v268_v26, 1  ;;  %v384_v31 = vsel %vm381_vm0, %v382_v21, %v383_v24  ;;  %v733_v3 = vpop.eup %732 }
  0x16   : > { %423 = vmatpush.bf16.msra.mxu2 %v712_v8  ;;  %v258_v30 = vor.u32 %v257_v27, %v253_v19  ;;  %v386_v36 = vsel %vm381_vm0, %v383_v24, %v385_v35  ;;  %v461_v4 = vmul.f32 64.0, %v733_v3  ;;  %vm465_vm3 = vweird.f32 %v733_v3 }
  0x17   : > { %v266_v32 = vor.u32 %v264_v25, %v262_v28 }
  0x18   : > { %310 = vmatpush.bf16.msra.mxu0 %v707_v17  ;;  %718 = vmatpush.bf16.msra.mxu3 %v707_v17  ;;  %v263_v33 = vsel %vm251_vm1, %v258_v30, %v262_v28  ;;  %v462_v5 = vsub.f32 1.0, %v461_v4 }
  0x19   : > { %357 = vmatpush.bf16.msra.mxu1 %v703_v18  ;;  %v271_v34 = vsel %vm251_vm1, %v266_v32, %v270_v29 }
  0x1a   : > { %424 = vmatpush.bf16.msra.mxu2 %v711_v22  ;;  %v463_v6 = vmul.f32 %v733_v3, %v462_v5 }
  0x1b   : > { %654 = vmatmul.msk.bf16.vlgmr.msra.gmra.mxu0 %vm296_vm2, %v263_v33  ;;  %655 = vmatmul.msk.bf16.vlgmr.msra.gmra.mxu3 %vm296_vm2, %v271_v34 }
  0x1c   : > { %672 = vmatmul.msk.bf16.vlgmr.msra.gmra.mxu1 %vm296_vm2, %v231_v13  ;;  %v464_v7 = vadd.f32 %v733_v3, %v463_v6 }
  0x1d   : > { %698 = vmatmul.msk.bf16.vlgmr.msra.gmra.mxu2 %vm296_vm2, %v384_v31 }
  0x1e   : > { %v466_v8 = vsel %vm465_vm3, %v733_v3, %v464_v7 }
  0x2c   : > { %673 = vmatmul.msk.bf16.gmra.mxu1 %vm296_vm2, %v232_v15 }
  0x2d   : > { %699 = vmatmul.msk.bf16.gmra.mxu2 %vm296_vm2, %v386_v36 }
  0x98   : > { %v312_v38 = vpop.f32.mrf.mxu0 }
  0x99   : > { %v359_v37 = vpop.f32.mrf.mxu1 }
  0x9a   : > { %v360_v39 = vadd.f32 %v359_v37, %v312_v38 }
  0x9e   : > { %v317_v52 = vpop.f32.mrf.mxu3 }
  0xa0   : > { %v426_v41 = vpop.f32.mrf.mxu2  ;;  %v314_v45 = vpop.f32.mrf.mxu0 }
  0xa1   : > { %v436_v42 = vadd.f32 %v426_v41, %v360_v39  ;;  %v361_v43 = vpop.f32.mrf.mxu1 }
  0xa2   : > { %v362_v47 = vadd.f32 %v361_v43, %v314_v45 }
  0xa3   : > { %v444_v44 = vadd.f32 %v729_v40, %v436_v42 }
  0xa5   : > { %v448_v46 = vsel %vm296_vm2, %v444_v44, 0.0 }
  0xa6   : > { %449 = vadd.xlane.f32.xlu0 %v448_v46  ;;  %v319_v60 = vpop.f32.mrf.mxu3  ;;  %v730_v46 = vld [vmem:[%s891_s3] ss:$0 sm:$0xff] }
  0xa8   : > { %v428_v48 = vpop.f32.mrf.mxu2 }
  0xa9   : > { %v437_v49 = vadd.f32 %v428_v48, %v362_v47  ;;  %v364_v50 = vpop.f32.mrf.mxu1 }
  0xaa   : > { %v365_v53 = vadd.f32 %v364_v50, %v317_v52 }
  0xab   : > { %v445_v51 = vadd.f32 %v729_v40, %v437_v49  ;;  %v731_v49 = vld [vmem:[%s892_s4] ss:$0 sm:$0xff] }
  0xad   : > { %v451_v54 = vsel %vm296_vm2, %v445_v51, 0.0 }
  0xae   : > { %452 = vadd.xlane.f32.xlu0 %v451_v54 }
  0xb0   : > { %v431_v55 = vpop.f32.mrf.mxu2 }
  0xb1   : > { %v438_v56 = vadd.f32 %v431_v55, %v365_v53  ;;  %v366_v58 = vpop.f32.mrf.mxu1 }
  0xb2   : > { %v367_v61 = vadd.f32 %v366_v58, %v319_v60 }
  0xb3   : > { %v446_v57 = vadd.f32 %v729_v40, %v438_v56 }
  0xb5   : > { %v454_v59 = vsel %vm296_vm2, %v446_v57, 0.0 }
  0xb6   : > { %455 = vadd.xlane.f32.xlu1 %v454_v59 }
  0xb8   : > { %v433_v62 = vpop.f32.mrf.mxu2 }
  0xb9   : > { %v439_v63 = vadd.f32 %v433_v62, %v367_v61 }
  0xbb   : > { %v447_v0 = vadd.f32 %v729_v40, %v439_v63 }
  0xbd   : > { %v457_v1 = vsel %vm296_vm2, %v447_v0, 0.0 }
  0xbe   : > { %458 = vadd.xlane.f32.xlu1 %v457_v1 }
 0x119   : > { %v450_v9 = vpop.xlane.xlu0 %449 }
 0x11a   : > { %v467_v10 = vmul.f32 %v466_v8, %v450_v9 }
 0x11c   : > { %v471_v11 = vsub.f32 %v444_v44, %v467_v10 }
 0x11e   : > { %v475_v12 = vmul.f32 %v471_v11, %v471_v11 }
 0x120   : > { %v479_v13 = vsel %vm296_vm2, %v475_v12, 0.0 }
 0x121   : > { %480 = vadd.xlane.f32.xlu2 %v479_v13  ;;  %v453_v14 = vpop.xlane.xlu0 %452 }
 0x122   : > { %v468_v15 = vmul.f32 %v466_v8, %v453_v14 }
 0x124   : > { %v847_v16 = vsub.f32 %v445_v51, %v468_v15 }
 0x126   : > { %v476_v17 = vmul.f32 %v847_v16, %v847_v16 }
 0x128   : > { %v482_v18 = vsel %vm296_vm2, %v476_v17, 0.0 }
 0x129   : > { %v456_v19 = vpop.xlane.xlu1 %455  ;;  %483 = vadd.xlane.f32.xlu2 %v482_v18 }
 0x12a   : > { %v469_v20 = vmul.f32 %v466_v8, %v456_v19 }
 0x12c   : > { %v852_v21 = vsub.f32 %v446_v57, %v469_v20 }
 0x12e   : > { %v477_v22 = vmul.f32 %v852_v21, %v852_v21 }
 0x130   : > { %v485_v23 = vsel %vm296_vm2, %v477_v22, 0.0 }
 0x131   : > { %v459_v24 = vpop.xlane.xlu1 %458  ;;  %486 = vadd.xlane.f32.xlu0 %v485_v23 }
 0x132   : > { %v470_v25 = vmul.f32 %v466_v8, %v459_v24 }
 0x134   : > { %v857_v26 = vsub.f32 %v447_v0, %v470_v25 }
 0x136   : > { %v478_v27 = vmul.f32 %v857_v26, %v857_v26 }
 0x138   : > { %v488_v28 = vsel %vm296_vm2, %v478_v27, 0.0 }
 0x139   : > { %489 = vadd.xlane.f32.xlu1 %v488_v28 }
 0x194   : > { %v481_v29 = vpop.xlane.xlu2 %480 }
 0x195   : > { %v491_v30 = vmul.f32 %v481_v29, %v466_v8 }
 0x197   : > { %v495_v31 = vadd.f32 1e-05, %v491_v30 }
 0x199   : > { %734 = vrsqrt.f32 %v495_v31  ;;  %vm505_vm5 = vweird.f32 %v495_v31 }
 0x19c   : > { %v484_v32 = vpop.xlane.xlu2 %483 }
 0x19d   : > { %v492_v33 = vmul.f32 %v484_v32, %v466_v8 }
 0x19f   : > { %v735_v34 = vpop.eup %734  ;;  %v496_v35 = vadd.f32 1e-05, %v492_v33 }
 0x1a0   : > { %v500_v36 = vmul.f32 %v735_v34, %v495_v31  ;;  %vm506_vm4 = vweird.f32 %v735_v34 }
 0x1a1   : > { %736 = vrsqrt.f32 %v496_v35  ;;  %vm507_vm6 = vmor %vm505_vm5, %vm506_vm4  ;;  %vm515_vm8 = vweird.f32 %v496_v35 }
 0x1a2   : > { %v501_v37 = vmul.f32 %v735_v34, %v500_v36 }
 0x1a4   : > { %v502_v38 = vmul.f32 0.5, %v501_v37  ;;  %v487_v39 = vpop.xlane.xlu0 %486 }
 0x1a5   : > { %v493_v40 = vmul.f32 %v487_v39, %v466_v8 }
 0x1a6   : > { %v503_v41 = vsub.f32 1.5, %v502_v38 }
 0x1a7   : > { %v737_v42 = vpop.eup %736  ;;  %v497_v43 = vadd.f32 1e-05, %v493_v40 }
 0x1a8   : > { %v504_v44 = vmul.f32 %v735_v34, %v503_v41  ;;  %v510_v45 = vmul.f32 %v737_v42, %v496_v35  ;;  %vm516_vm7 = vweird.f32 %v737_v42 }
 0x1a9   : > { %738 = vrsqrt.f32 %v497_v43  ;;  %vm517_vm9 = vmor %vm515_vm8, %vm516_vm7  ;;  %vm525_vm11 = vweird.f32 %v497_v43 }
 0x1aa   : > { %v508_v47 = vsel %vm507_vm6, %v735_v34, %v504_v44  ;;  %v511_v48 = vmul.f32 %v737_v42, %v510_v45 }
 0x1ab   : > { %v539_v50 = vmul.f32 %v508_v47, %v471_v11 }
 0x1ac   : > { %v512_v51 = vmul.f32 0.5, %v511_v48  ;;  %v490_v52 = vpop.xlane.xlu1 %489 }
 0x1ad   : > { %v547_v53 = vmul.f32 %v730_v46, %v539_v50  ;;  %v494_v54 = vmul.f32 %v490_v52, %v466_v8 }
 0x1ae   : > { %v513_v55 = vsub.f32 1.5, %v512_v51 }
 0x1af   : > { %v739_v56 = vpop.eup %738  ;;  %v555_v57 = vadd.f32 %v731_v49, %v547_v53  ;;  %v498_v58 = vadd.f32 1e-05, %v494_v54 }
 0x1b0   : > { %v514_v59 = vmul.f32 %v737_v42, %v513_v55  ;;  %v520_v60 = vmul.f32 %v739_v56, %v497_v43  ;;  %vm526_vm10 = vweird.f32 %v739_v56 }
 0x1b1   : > { %v559_v61 = vmax.f32 %v555_v57, 0.0  ;;  %740 = vrsqrt.f32 %v498_v58  ;;  %vm527_vm12 = vmor %vm525_vm11, %vm526_vm10  ;;  %vm535_vm14 = vweird.f32 %v498_v58 }
 0x1b2   : > { %v518_v62 = vsel %vm517_vm9, %v737_v42, %v514_v59  ;;  %v521_v63 = vmul.f32 %v739_v56, %v520_v60 }
 0x1b3   : > { %563 = vst.msk [vmem:[%s872_s9] sm:$0xff] %vm296_vm2, %v559_v61  ;;  %v540_v0 = vmul.f32 %v518_v62, %v847_v16 }
 0x1b4   : > { %v522_v1 = vmul.f32 0.5, %v521_v63 }
 0x1b5   : > { %v548_v2 = vmul.f32 %v730_v46, %v540_v0 }
 0x1b6   : > { %v523_v3 = vsub.f32 1.5, %v522_v1 }
 0x1b7   : > { %v741_v4 = vpop.eup %740  ;;  %v556_v5 = vadd.f32 %v731_v49, %v548_v2 }
 0x1b8   : > { %v524_v6 = vmul.f32 %v739_v56, %v523_v3  ;;  %v530_v7 = vmul.f32 %v741_v4, %v498_v58  ;;  %vm536_vm13 = vweird.f32 %v741_v4 }
 0x1b9   : > { %v560_v8 = vmax.f32 %v556_v5, 0.0  ;;  %vm537_vm15 = vmor %vm535_vm14, %vm536_vm13 }
 0x1ba   : > { %v528_v9 = vsel %vm527_vm12, %v739_v56, %v524_v6  ;;  %v531_v10 = vmul.f32 %v741_v4, %v530_v7 }
 0x1bb   : > { %564 = vst.msk [vmem:[%s872_s9 + $0x8] sm:$0xff] %vm296_vm2, %v560_v8  ;;  %v541_v11 = vmul.f32 %v528_v9, %v852_v21 }
 0x1bc   : > { %v532_v12 = vmul.f32 0.5, %v531_v10 }
 0x1bd   : > { %v549_v13 = vmul.f32 %v730_v46, %v541_v11 }
 0x1be   : > { %v533_v14 = vsub.f32 1.5, %v532_v12 }
 0x1bf   : > { %v557_v15 = vadd.f32 %v731_v49, %v549_v13 }
 0x1c0   : > { %v534_v16 = vmul.f32 %v741_v4, %v533_v14 }
 0x1c1   : > { %v561_v17 = vmax.f32 %v557_v15, 0.0 }
 0x1c2   : > { %v538_v18 = vsel %vm537_vm15, %v741_v4, %v534_v16 }
 0x1c3   : > { %565 = vst.msk [vmem:[%s872_s9 + $0x10] sm:$0xff] %vm296_vm2, %v561_v17  ;;  %v542_v19 = vmul.f32 %v538_v18, %v857_v26 }
 0x1c5   : > { %v550_v20 = vmul.f32 %v730_v46, %v542_v19 }
 0x1c7   : > { %v558_v22 = vadd.f32 %v731_v49, %v550_v20 }
 0x1c9   : > { %v562_v23 = vmax.f32 %v558_v22, 0.0 }
 0x1cb   : > { %566 = vst.msk [vmem:[%s872_s9 + $0x18] sm:$0xff] %vm296_vm2, %v562_v23 }
 0x1cc PF: > { %s15_s18 = sadd.s32 1, %s748_s18  }
 0x1cd   : > { %p12_p4 = scmp.ge.s32.totalorder %s15_s18, 4  }
 0x1cf   :  { %14 = sbr.rel (!%p12_p4) target bundleno = 1 (0x1), region = 72 }

// kernel: _lambda_.29
= control target key start
LH: loop header
LB: loop body
LE: loop exit
PB: predicated region body
PF: predicated region fallthrough
CT: control target
= control target key end

     0   :  { %vm65_vm0 = vcmask 523264   ;;  %vm107_vm1 = vcmask 7168   ;;  %s248_s1 = inlined_call_operand.vmem [shape: bf16[64,1], index: 1, kind: input, shape index: {}]   ;;  %s249_s2 = inlined_call_operand.<no memory space> [shape: f32[1,1], index: 2, kind: input, shape index: {}]   ;;  %s250_s0 = inlined_call_operand.vmem [shape: f32[64,64], index: 0, kind: input, shape index: {}]   ;;  %s251_s3 = inlined_call_operand.vmem [shape: f32[64,1], index: 3, kind: output, shape index: {}]  }
   0x1   :  { %v143_v0 = vld [vmem:[%s248_s1 + $0x18] sm:$0xff]  ;;  %v8_v1 = vstv %s249_s2  ;;  %v142_v2 = vld [vmem:[%s248_s1 + $0x10] sm:$0xff]  ;;  %v141_v3 = vld [vmem:[%s248_s1 + $0x8] sm:$0xff] }
   0x2   :  { %9 = vst [vmem:[#allocation2] sm:$0x1] %v8_v1  ;;  %82 = vmatpush.bf16.msra.mxu0 %v143_v0  ;;  %144 = vmatpush.bf16.msra.mxu1 %v143_v0  ;;  %v140_v4 = vld [vmem:[%s248_s1] sm:$0xff]  ;;  %v18_v6 = vld [vmem:[%s250_s0 + $0x8] sm:$0xff]  ;;  %v19_v7 = vld [vmem:[%s250_s0 + $0x10] sm:$0xff] }
   0x3   :  { %145 = vmatpush.bf16.msra.mxu2 %v143_v0  ;;  %146 = vmatpush.bf16.msra.mxu3 %v143_v0  ;;  %v17_v5 = vld [vmem:[%s250_s0] sm:$0xff]  ;;  %v20_v8 = vld [vmem:[%s250_s0 + $0x18] sm:$0xff]  ;;  %v22_v10 = vld [vmem:[%s250_s0 + $0x28] sm:$0xff] }
   0x4   :  { %v21_v9 = vld [vmem:[%s250_s0 + $0x20] sm:$0xff]  ;;  %v23_v11 = vld [vmem:[%s250_s0 + $0x30] sm:$0xff]  ;;  %v24_v12 = vld [vmem:[%s250_s0 + $0x38] sm:$0xff]  ;;  %v25_v13 = vpack.c.bf16 %v18_v6, %v17_v5  ;;  %v26_v14 = vpack.c.bf16 %v20_v8, %v19_v7 }
   0x5   :  { %v27_v15 = vpack.c.bf16 %v22_v10, %v21_v9  ;;  %v28_v16 = vpack.c.bf16 %v24_v12, %v23_v11 }
   0x6   :  { %83 = vmatpush.bf16.msra.mxu0 %v142_v2  ;;  %147 = vmatpush.bf16.msra.mxu1 %v142_v2 }
   0x7   :  { %148 = vmatpush.bf16.msra.mxu2 %v142_v2  ;;  %149 = vmatpush.bf16.msra.mxu3 %v142_v2 }
   0x9   :  { %v156_v17 = vld [vmem:[#allocation2] ss:$0 sm:$0xff] }
   0xa   :  { %84 = vmatpush.bf16.msra.mxu0 %v141_v3  ;;  %150 = vmatpush.bf16.msra.mxu1 %v141_v3 }
   0xb   :  { %151 = vmatpush.bf16.msra.mxu2 %v141_v3  ;;  %152 = vmatpush.bf16.msra.mxu3 %v141_v3 }
   0xe   :  { %85 = vmatpush.bf16.msra.mxu0 %v140_v4  ;;  %153 = vmatpush.bf16.msra.mxu1 %v140_v4 }
   0xf   :  { %154 = vmatpush.bf16.msra.mxu2 %v140_v4  ;;  %155 = vmatpush.bf16.msra.mxu3 %v140_v4 }
  0x11   :  { %136 = vmatmul.msk.bf16.vlgmr.msra.gmra.mxu0 %vm65_vm0, %v25_v13  ;;  %137 = vmatmul.msk.bf16.vlgmr.msra.gmra.mxu1 %vm65_vm0, %v26_v14 }
  0x12   :  { %138 = vmatmul.msk.bf16.vlgmr.msra.gmra.mxu2 %vm65_vm0, %v27_v15  ;;  %139 = vmatmul.msk.bf16.vlgmr.msra.gmra.mxu3 %vm65_vm0, %v28_v16 }
  0x8e   :  { %v87_v18 = vpop.f32.mrf.mxu0  ;;  %v92_v19 = vpop.f32.mrf.mxu1 }
  0x8f   :  { %v88_v20 = vadd.f32 %v156_v17, %v87_v18  ;;  %v93_v21 = vadd.f32 %v156_v17, %v92_v19 }
  0x91   :  { %108 = vst.msk [vmem:[%s251_s3] sm:$0xff] %vm107_vm1, %v88_v20 }
  0x92   :  { %110 = vst.msk [vmem:[%s251_s3 + $0x10] sm:$0xff] %vm107_vm1, %v93_v21 }
  0x95   :  { %v97_v22 = vpop.f32.mrf.mxu2  ;;  %v102_v23 = vpop.f32.mrf.mxu3 }
  0x96   :  { %v98_v24 = vadd.f32 %v156_v17, %v97_v22  ;;  %v103_v25 = vadd.f32 %v156_v17, %v102_v23  ;;  %v89_v26 = vpop.f32.mrf.mxu0  ;;  %v94_v27 = vpop.f32.mrf.mxu1 }
  0x97   :  { %v90_v28 = vadd.f32 %v156_v17, %v89_v26  ;;  %v95_v29 = vadd.f32 %v156_v17, %v94_v27 }
  0x98   :  { %112 = vst.msk [vmem:[%s251_s3 + $0x20] sm:$0xff] %vm107_vm1, %v98_v24 }
  0x99   :  { %114 = vst.msk [vmem:[%s251_s3 + $0x30] sm:$0xff] %vm107_vm1, %v103_v25 }
  0x9a   :  { %109 = vst.msk [vmem:[%s251_s3 + $0x8] sm:$0xff] %vm107_vm1, %v90_v28 }
  0x9b   :  { %111 = vst.msk [vmem:[%s251_s3 + $0x18] sm:$0xff] %vm107_vm1, %v95_v29 }
  0x9d   :  { %v99_v30 = vpop.f32.mrf.mxu2  ;;  %v104_v31 = vpop.f32.mrf.mxu3 }
  0x9e   :  { %v100_v32 = vadd.f32 %v156_v17, %v99_v30  ;;  %v105_v33 = vadd.f32 %v156_v17, %v104_v31 }
  0xa0   :  { %113 = vst.msk [vmem:[%s251_s3 + $0x28] sm:$0xff] %vm107_vm1, %v100_v32 }
  0xa1   :  { %115 = vst.msk [vmem:[%s251_s3 + $0x38] sm:$0xff] %vm107_vm1, %v105_v33 }

// kernel: _lambda_.39
= control target key start
LH: loop header
LB: loop body
LE: loop exit
PB: predicated region body
PF: predicated region fallthrough
CT: control target
= control target key end

     0   :  { %v186_v1 = vmov 0   ;;  %vm50_vm0 = vcmask 261120   ;;  %vm148_vm1 = vcmask 130048   ;;  %s301_s1 = inlined_call_operand.vmem [shape: bf16[32,16], index: 1, kind: input, shape index: {}]   ;;  %s302_s3 = inlined_call_operand.vmem [shape: f32[64,1], index: 3, kind: input, shape index: {}]   ;;  %s303_s0 = inlined_call_operand.vmem [shape: f32[64,32], index: 0, kind: input, shape index: {}]   ;;  %s304_s2 = inlined_call_operand.vmem [shape: f32[1,16], index: 2, kind: input, shape index: {}]   ;;  %s305_s4 = inlined_call_operand.vmem [shape: f32[64,16], index: 4, kind: output, shape index: {}]  }
   0x1   :  { %v174_v0 = vld [vmem:[%s301_s1 + $0x8] sm:$0xff]  ;;  %183 = vset.pattern.permute.xlu1 %v186_v1  ;;  %182 = vset.pattern.permute.xlu0 %v186_v1  ;;  %v94_v2 = vld [vmem:[%s302_s3 + $0x10] sm:$0xff]  ;;  %v92_v3 = vld [vmem:[%s302_s3] sm:$0xff] }
   0x2   :  { %112 = vperm.xlu1 %183, %v94_v2   ;;  %102 = vperm.xlu0 %182, %v92_v3   ;;  %v173_v4 = vld [vmem:[%s301_s1] sm:$0xff]  ;;  %v19_v6 = vld [vmem:[%s303_s0 + $0x8] sm:$0xff]  ;;  %v20_v7 = vld [vmem:[%s303_s0 + $0x10] sm:$0xff] }
   0x3   :  { %v18_v5 = vld [vmem:[%s303_s0] sm:$0xff]  ;;  %69 = vmatpush.bf16.msra.mxu0 %v174_v0  ;;  %175 = vmatpush.bf16.msra.mxu1 %v174_v0  ;;  %v21_v8 = vld [vmem:[%s303_s0 + $0x18] sm:$0xff]  ;;  %v23_v10 = vld [vmem:[%s303_s0 + $0x28] sm:$0xff] }
   0x4   :  { %v22_v9 = vld [vmem:[%s303_s0 + $0x20] sm:$0xff]  ;;  %176 = vmatpush.bf16.msra.mxu2 %v174_v0  ;;  %177 = vmatpush.bf16.msra.mxu3 %v174_v0  ;;  %v24_v11 = vld [vmem:[%s303_s0 + $0x30] sm:$0xff]  ;;  %v25_v12 = vld [vmem:[%s303_s0 + $0x38] sm:$0xff]  ;;  %v26_v13 = vpack.c.bf16 %v19_v6, %v18_v5  ;;  %v27_v14 = vpack.c.bf16 %v21_v8, %v20_v7 }
   0x5   :  { %184 = vset.pattern.permute.xlu2 %v186_v1  ;;  %v96_v15 = vld [vmem:[%s302_s3 + $0x20] sm:$0xff]  ;;  %v28_v16 = vpack.c.bf16 %v23_v10, %v22_v9  ;;  %v29_v17 = vpack.c.bf16 %v25_v12, %v24_v11  ;;  %v95_v18 = vld [vmem:[%s302_s3 + $0x18] sm:$0xff]  ;;  %v93_v19 = vld [vmem:[%s302_s3 + $0x8] sm:$0xff] }
   0x6   :  { %122 = vperm.xlu2 %184, %v96_v15   ;;  %v97_v20 = vld [vmem:[%s302_s3 + $0x28] sm:$0xff]  ;;  %v99_v21 = vld [vmem:[%s302_s3 + $0x38] sm:$0xff]  ;;  %v98_v22 = vld [vmem:[%s302_s3 + $0x30] sm:$0xff] }
   0x7   :  { %70 = vmatpush.bf16.msra.mxu0 %v173_v4  ;;  %178 = vmatpush.bf16.msra.mxu1 %v173_v4  ;;  %v185_v25 = vld [vmem:[%s304_s2] ss:$0 sm:$0xff] }
   0x8   :  { %179 = vmatpush.bf16.msra.mxu2 %v173_v4  ;;  %180 = vmatpush.bf16.msra.mxu3 %v173_v4 }
   0xa   :  { %169 = vmatmul.msk.bf16.vlgmr.msra.gmra.mxu0 %vm50_vm0, %v26_v13  ;;  %170 = vmatmul.msk.bf16.vlgmr.msra.gmra.mxu1 %vm50_vm0, %v27_v14 }
   0xb   :  { %171 = vmatmul.msk.bf16.vlgmr.msra.gmra.mxu2 %vm50_vm0, %v28_v16  ;;  %172 = vmatmul.msk.bf16.vlgmr.msra.gmra.mxu3 %vm50_vm0, %v29_v17 }
   0xc   :  { %117 = vperm.xlu1 %183, %v95_v18   ;;  %107 = vperm.xlu0 %182, %v93_v19  }
   0xe   :  { %127 = vperm.xlu2 %184, %v97_v20  }
  0x14   :  { %137 = vperm.xlu1 %183, %v99_v21   ;;  %132 = vperm.xlu0 %182, %v98_v22  }
  0x60   :  { %v123_v34 = vpop.permute.xlu2 %122 }
  0x68   :  { %v128_v53 = vpop.permute.xlu2 %127 }
  0x74   :  { %v103_v23 = vpop.permute.xlu0 %102  ;;  %v113_v24 = vpop.permute.xlu1 %112 }
  0x7e   :  { %v108_v26 = vpop.permute.xlu0 %107  ;;  %v118_v33 = vpop.permute.xlu1 %117 }
  0x86   :  { %v133_v41 = vpop.permute.xlu0 %132  ;;  %v138_v52 = vpop.permute.xlu1 %137 }
  0x87   :  { %v72_v27 = vpop.f32.mrf.mxu0  ;;  %v77_v28 = vpop.f32.mrf.mxu1 }
  0x88   :  { %v73_v29 = vadd.f32 %v185_v25, %v72_v27  ;;  %v78_v30 = vadd.f32 %v185_v25, %v77_v28 }
  0x8a   :  { %v140_v31 = vmul.f32 %v103_v23, %v73_v29  ;;  %v142_v32 = vmul.f32 %v113_v24, %v78_v30 }
  0x8c   :  { %149 = vst.msk [vmem:[%s305_s4] sm:$0xff] %vm148_vm1, %v140_v31 }
  0x8d   :  { %151 = vst.msk [vmem:[%s305_s4 + $0x10] sm:$0xff] %vm148_vm1, %v142_v32 }
  0x8e   :  { %v82_v35 = vpop.f32.mrf.mxu2  ;;  %v87_v36 = vpop.f32.mrf.mxu3 }
  0x8f   :  { %v83_v37 = vadd.f32 %v185_v25, %v82_v35  ;;  %v88_v38 = vadd.f32 %v185_v25, %v87_v36  ;;  %v74_v39 = vpop.f32.mrf.mxu0  ;;  %v79_v40 = vpop.f32.mrf.mxu1 }
  0x90   :  { %v75_v42 = vadd.f32 %v185_v25, %v74_v39  ;;  %v80_v43 = vadd.f32 %v185_v25, %v79_v40 }
  0x91   :  { %v144_v44 = vmul.f32 %v123_v34, %v83_v37  ;;  %v146_v45 = vmul.f32 %v133_v41, %v88_v38 }
  0x92   :  { %v141_v46 = vmul.f32 %v108_v26, %v75_v42  ;;  %v143_v47 = vmul.f32 %v118_v33, %v80_v43 }
  0x93   :  { %153 = vst.msk [vmem:[%s305_s4 + $0x20] sm:$0xff] %vm148_vm1, %v144_v44 }
  0x94   :  { %155 = vst.msk [vmem:[%s305_s4 + $0x30] sm:$0xff] %vm148_vm1, %v146_v45 }
  0x95   :  { %150 = vst.msk [vmem:[%s305_s4 + $0x8] sm:$0xff] %vm148_vm1, %v141_v46 }
  0x96   :  { %152 = vst.msk [vmem:[%s305_s4 + $0x18] sm:$0xff] %vm148_vm1, %v143_v47  ;;  %v84_v48 = vpop.f32.mrf.mxu2  ;;  %v89_v49 = vpop.f32.mrf.mxu3 }
  0x97   :  { %v85_v50 = vadd.f32 %v185_v25, %v84_v48  ;;  %v90_v51 = vadd.f32 %v185_v25, %v89_v49 }
  0x99   :  { %v145_v54 = vmul.f32 %v128_v53, %v85_v50  ;;  %v147_v55 = vmul.f32 %v138_v52, %v90_v51 }
  0x9b   :  { %154 = vst.msk [vmem:[%s305_s4 + $0x28] sm:$0xff] %vm148_vm1, %v145_v54 }
  0x9c   :  { %156 = vst.msk [vmem:[%s305_s4 + $0x38] sm:$0xff] %vm148_vm1, %v147_v55 }

// kernel: _lambda_.35
= control target key start
LH: loop header
LB: loop body
LE: loop exit
PB: predicated region body
PF: predicated region fallthrough
CT: control target
= control target key end

     0   :  { %s1007_s30 = smov [#allocation3]   ;;  %s1276_s0 = inlined_call_operand.vmem [shape: s32[2], index: 0, kind: input, shape index: {}]   ;;  %s1277_s1 = inlined_call_operand.vmem [shape: f32[2,32,32], index: 1, kind: input, shape index: {}]   ;;  %s1278_s2 = inlined_call_operand.vmem [shape: bf16[32,96], index: 2, kind: input, shape index: {}]   ;;  %s1279_s3 = inlined_call_operand.vmem [shape: f32[1,96], index: 3, kind: input, shape index: {}]   ;;  %s1280_s4 = inlined_call_operand.vmem [shape: bf16[32,32], index: 4, kind: input, shape index: {}]   ;;  %s1281_s5 = inlined_call_operand.vmem [shape: f32[1,32], index: 5, kind: input, shape index: {}]   ;;  %s1282_s6 = inlined_call_operand.vmem [shape: f32[1,32], index: 6, kind: input, shape index: {}]   ;;  %s1283_s7 = inlined_call_operand.vmem [shape: f32[1,32], index: 7, kind: input, shape index: {}]   ;;  %s1284_s8 = inlined_call_operand.vmem [shape: f32[2,32,32], index: 8, kind: output, shape index: {}]  }
   0x1   :  { %s14_s29 = sshll.u32 %s1276_s0, 4  ;;  %s15_s29 = int_to_ptr.vmem [resolvable:$true] %s14_s29 }
   0x2   :  { %17 = dma.vmem_to_smem %s15_s29, 16, %s1007_s30, [#allocation2] }
   0x3   :  { %1001 = dma.done.wait [#allocation2], 16 }
   0x4   :  { %1002 = vsyncadd [#allocation2], 4294967280 }
   0x5   :  { %20 = sfence }
   0x6   :  { %s1065_s9 = smov 0  }
   0x7 LB: > { %s1071_s10 = sadd.s32 4294967295, %s1005_s9   ;;  %p862_p0 = scmp.ge.s32.totalorder %s1005_s9, 1  ;;  %s1005_s9 = sphi %s1065_s9, %s26_s9  }
   0x8   : > { %p246_p1 = scmp.lt.s32.totalorder %s1005_s9, 3 }
   0xa   : > { %p247_p2 = pnand %p862_p0, %p246_p1 }
   0xb   : > { %p278_p3 = scmp.lt.s32.totalorder (!%p247_p2), %s1071_s10, 1  ;;  %s1008_s21 = smov (!%p247_p2), 96  }
   0xc   : > { %250 = sbr.rel (%p247_p2) target bundleno = 1810 (0x712), region = 48  ;;  %s1009_s22 = smov (!%p247_p2), 64  }
   0xd   : > { %s1010_s23 = smov (!%p247_p2), 80   ;;  %s1011_s24 = smov (!%p247_p2), 112  }
   0xe   : > { %s289_s25 = sld [smem:[#allocation3 + %s1071_s10]] (!%p247_p2)  ;;  %s1013_s26 = smov (!%p247_p2), 48  }
   0xf   : > { %s1014_s27 = smov (!%p247_p2), 16  }
  0x11   : > { %v904_v0 = vld [vmem:[%s1278_s2 + $0x8] sm:$0xff]  ;;  %v903_v1 = vld [vmem:[%s1278_s2] sm:$0xff]  ;;  %s1083_s14 = scalar_select %p278_p3, %s1071_s10, 1  ;;  %vm316_vm0 = vcmask 261120   ;;  %vm355_vm1 = vcmask 130048   ;;  %v342_v25 = vlaneseq }
  0x12   : > { %329 = vmatpush.bf16.msra.mxu0 %v904_v0  ;;  %907 = vmatpush.bf16.msra.mxu1 %v904_v0  ;;  %v939_v10 = vld [vmem:[%s1279_s3] ss:$0 sm:$0xff]  ;;  %v1012_v31 = vmov -1e+09  }
  0x13   : > { %s901_s15 = sshll.u32 %s1083_s14, 5  ;;  %v343_v27 = vand.u32 127, %v342_v25 }
  0x14   : > { %s282_s18 = scalar_lea.vmem %s1277_s1, %s901_s15  ;;  %v1130_v28 = vstv %s289_s25  ;;  %s1248_s20 = scalar_lea.vmem %s1284_s8, %s901_s15 }
  0x15   : > { %v1091_v2 = vld [vmem:[%s282_s18] sm:$0xff]  ;;  %v1093_v3 = vld [vmem:[%s282_s18 + $0x8] sm:$0xff]  ;;  %v1095_v4 = vld [vmem:[%s282_s18 + $0x10] sm:$0xff]  ;;  %vm345_vm2 = vcmp.lt.s32.totalorder %v343_v27, %v1130_v28 }
  0x16   : > { %330 = vmatpush.bf16.msra.mxu0 %v903_v1  ;;  %908 = vmatpush.bf16.msra.mxu1 %v903_v1  ;;  %v294_v5 = vpack.c.bf16 %v1093_v3, %v1091_v2  ;;  %v1099_v6 = vld [vmem:[%s282_s18 + $0x18] sm:$0xff]  ;;  %v1133_v32 = vsel %vm345_vm2, 0.0, %v1012_v31 }
  0x17   : > { %v295_v7 = vpack.c.bf16 %v1099_v6, %v1095_v4 }
  0x19   : > { %875 = vmatmul.msk.bf16.vlgmr.msra.gmra.mxu0 %vm316_vm0, %v294_v5  ;;  %876 = vmatmul.msk.bf16.vlgmr.msra.gmra.mxu1 %vm316_vm0, %v295_v7 }
  0x96   : > { %v337_v8 = vpop.f32.mrf.mxu1  ;;  %v332_v9 = vpop.f32.mrf.mxu0 }
  0x97   : > { %v338_v12 = vadd.f32 %v939_v10, %v337_v8  ;;  %v333_v16 = vadd.f32 %v939_v10, %v332_v9 }
  0x9e   : > { %v339_v11 = vpop.f32.mrf.mxu1  ;;  %v334_v15 = vpop.f32.mrf.mxu0 }
  0x9f   : > { %v340_v13 = vadd.f32 %v939_v10, %v339_v11  ;;  %v335_v17 = vadd.f32 %v939_v10, %v334_v15 }
  0xa1   : > { %v1108_v14 = vpack.c.bf16 %v340_v13, %v338_v12  ;;  %v1111_v18 = vpack.c.bf16 %v335_v17, %v333_v16 }
  0xa3   : > { %353 = vrot.lane.b32.xlu0 %v1108_v14, %s1008_s21 }
  0xab   : > { %351 = vrot.lane.b32.xlu0 %v1111_v18, %s1008_s21 }
  0xb3   : > { %443 = vrot.lane.b32.xlu0 %v1108_v14, %s1009_s22 }
  0xbb   : > { %476 = vrot.lane.b32.xlu0 %v1111_v18, %s1010_s23 }
  0xc3   : > { %472 = vrot.lane.b32.xlu0 %v1111_v18, %s1011_s24 }
  0xcb   : > { %474 = vrot.lane.b32.xlu0 %v1108_v14, %s1011_s24 }
 0x115   : > { %v354_v19 = vpop.permute.xlu0 %353 }
 0x116   : > { %v366_v20 = vsel %vm355_vm1, %v354_v19, 0 }
 0x117   : > { %374 = vmatpush.bf16.xpose.msrb.mxu1 %v366_v20 }
 0x11d   : > { %v352_v21 = vpop.permute.xlu0 %351 }
 0x11e   : > { %v363_v22 = vsel %vm355_vm1, %v352_v21, 0 }
 0x11f   : > { %375 = vmatpush.bf16.xpose.msrb.mxu1 %v363_v22 }
 0x125   : > { %v444_v23 = vpop.permute.xlu0 %443 }
 0x126   : > { %877 = vmatmul.msk.bf16.vlgmr.msrb.gmra.mxu1 %vm355_vm1, %v1111_v18  ;;  %459 = vmatpush.bf16.msra.mxu2 %v444_v23 }
 0x127   : > { %909 = vmatpush.bf16.msra.mxu3 %v444_v23 }
 0x12d   : > { %v477_v59 = vpop.permute.xlu0 %476 }
 0x12e   : > { %v487_v60 = vsel %vm355_vm1, %v477_v59, 0 }
 0x135   : > { %v473_v61 = vpop.permute.xlu0 %472 }
 0x136   : > { %878 = vmatmul.msk.bf16.gmra.mxu1 %vm355_vm1, %v1108_v14 }
 0x13d   : > { %v475_v62 = vpop.permute.xlu0 %474 }
 0x1a3   : > { %v1126_v24 = vpop.f32.mrf.mxu1 }
 0x1a4   : > { %v387_v15 = vmul.f32 0.25, %v1126_v24 }
 0x1a6   : > { %v391_v21 = vadd.f32 %v387_v15, %v1133_v32 }
 0x1a8   : > { %v395_v23 = vsel %vm316_vm0, %v391_v21, -inf }
 0x1ab   : > { %v379_v26 = vpop.f32.mrf.mxu1 }
 0x1ac   : > { %v388_v8 = vmul.f32 0.25, %v379_v26 }
 0x1ae   : > { %v392_v12 = vadd.f32 %v388_v8, %v1133_v32 }
 0x1b0   : > { %v398_v16 = vsel %vm316_vm0, %v392_v12, -inf }
 0x1b3   : > { %v382_v29 = vpop.f32.mrf.mxu1 }
 0x1b4   : > { %v389_v30 = vmul.f32 0.25, %v382_v29 }
 0x1b6   : > { %v393_v33 = vadd.f32 %v389_v30, %v1133_v32 }
 0x1b8   : > { %v401_v34 = vsel %vm316_vm0, %v393_v33, -inf }
 0x1b9   : > { %402 = vmax.xlane.f32.xlu1 %v401_v34 }
 0x1bb   : > { %v384_v35 = vpop.f32.mrf.mxu1 }
 0x1bc   : > { %v390_v36 = vmul.f32 0.25, %v384_v35 }
 0x1be   : > { %v394_v37 = vadd.f32 %v390_v36, %v1133_v32 }
 0x1c0   : > { %v404_v38 = vsel %vm316_vm0, %v394_v37, -inf }
 0x1c1   : > { %405 = vmax.xlane.f32.xlu1 %v404_v38 }
 0x1da   : > { %441 = vrot.lane.b32.xlu1 %v1111_v18, %s1009_s22 }
 0x22c   : > { %v403_v39 = vpop.xlane.xlu1 %402 }
 0x22d   : > { %v409_v40 = vsub.f32 %v393_v33, %v403_v39 }
 0x22f   : > { %v415_v41 = vmul.f32 1.442695, %v409_v40 }
 0x231   : > { %943 = vpow2.f32 %v415_v41 }
 0x234   : > { %v406_v42 = vpop.xlane.xlu1 %405 }
 0x235   : > { %v410_v43 = vsub.f32 %v394_v37, %v406_v42 }
 0x237   : > { %v944_v44 = vpop.eup %943  ;;  %v417_v45 = vmul.f32 1.442695, %v410_v43 }
 0x238   : > { %v425_v46 = vsel %vm316_vm0, %v944_v44, 0.0 }
 0x239   : > { %945 = vpow2.f32 %v417_v45  ;;  %426 = vadd.xlane.f32.xlu2 %v425_v46 }
 0x23f   : > { %v946_v47 = vpop.eup %945 }
 0x240   : > { %v428_v48 = vsel %vm316_vm0, %v946_v47, 0.0 }
 0x241   : > { %429 = vadd.xlane.f32.xlu2 %v428_v48 }
 0x24c   : > { %v442_v49 = vpop.permute.xlu1 %441 }
 0x24d   : > { %460 = vmatpush.bf16.msra.mxu2 %v442_v49  ;;  %910 = vmatpush.bf16.msra.mxu3 %v442_v49 }
 0x259   : > { %478 = vrot.lane.b32.xlu2 %v1108_v14, %s1010_s23 }
 0x2ac   : > { %v427_v50 = vpop.xlane.xlu2 %426 }
 0x2ad   : > { %947 = vrcp.f32 %v427_v50 }
 0x2b3   : > { %v948_v52 = vpop.eup %947 }
 0x2b4   : > { %v430_v51 = vpop.xlane.xlu2 %429  ;;  %v437_v55 = vmul.f32 %v948_v52, %v944_v44 }
 0x2b5   : > { %949 = vrcp.f32 %v430_v51 }
 0x2bb   : > { %v950_v53 = vpop.eup %949 }
 0x2bc   : > { %v479_v54 = vpop.permute.xlu2 %478  ;;  %v438_v56 = vmul.f32 %v950_v53, %v946_v47 }
 0x2bd   : > { %v490_v57 = vsel %vm355_vm1, %v479_v54, 0 }
 0x2be   : > { %498 = vmatpush.bf16.xpose.msrb.mxu3 %v490_v57  ;;  %v440_v58 = vpack.c.bf16 %v438_v56, %v437_v55 }
 0x2c0   : > { %880 = vmatmul.msk.bf16.vlgmr.msra.gmra.mxu3 %vm316_vm0, %v440_v58 }
 0x2c6   : > { %499 = vmatpush.bf16.xpose.msrb.mxu3 %v487_v60 }
 0x2d0   : > { %881 = vmatmul.msk.bf16.vlgmr.msrb.gmra.mxu3 %vm355_vm1, %v473_v61 }
 0x2e0   : > { %882 = vmatmul.msk.bf16.gmra.mxu3 %vm355_vm1, %v475_v62 }
 0x343   : > { %v1150_v63 = vpop.f32.mrf.mxu3 }
 0x34b   : > { %v1152_v0 = vpop.f32.mrf.mxu3 }
 0x353   : > { %v501_v1 = vpop.f32.mrf.mxu3 }
 0x354   : > { %v511_v5 = vmul.f32 0.25, %v501_v1 }
 0x356   : > { %v515_v7 = vadd.f32 %v511_v5, %v1133_v32 }
 0x358   : > { %v519_v9 = vsel %vm316_vm0, %v515_v7, -inf }
 0x359   : > { %520 = vmax.xlane.f32.xlu2 %v519_v9 }
 0x35b   : > { %v503_v10 = vpop.f32.mrf.mxu3 }
 0x35c   : > { %v512_v11 = vmul.f32 0.25, %v503_v10 }
 0x35e   : > { %v516_v13 = vadd.f32 %v512_v11, %v1133_v32 }
 0x360   : > { %v522_v17 = vsel %vm316_vm0, %v516_v13, -inf }
 0x361   : > { %399 = vmax.xlane.f32.xlu2 %v398_v16  ;;  %523 = vmax.xlane.f32.xlu1 %v522_v17 }
 0x363   : > { %v506_v19 = vpop.f32.mrf.mxu3 }
 0x364   : > { %v513_v20 = vmul.f32 0.25, %v506_v19 }
 0x366   : > { %v517_v22 = vadd.f32 %v513_v20, %v1133_v32 }
 0x368   : > { %v525_v26 = vsel %vm316_vm0, %v517_v22, -inf }
 0x369   : > { %396 = vmax.xlane.f32.xlu1 %v395_v23  ;;  %526 = vmax.xlane.f32.xlu0 %v525_v26 }
 0x36b   : > { %v508_v27 = vpop.f32.mrf.mxu3 }
 0x36c   : > { %v514_v24 = vmul.f32 0.25, %v508_v27 }
 0x36e   : > { %v518_v29 = vadd.f32 %v514_v24, %v1133_v32 }
 0x370   : > { %v528_v30 = vsel %vm316_vm0, %v518_v29, -inf }
 0x371   : > { %529 = vmax.xlane.f32.xlu2 %v528_v30 }
 0x389   : > { %567 = vrot.lane.b32.xlu2 %v1108_v14, %s1013_s26 }
 0x3cc   : > { %v521_v31 = vpop.xlane.xlu2 %520 }
 0x3cd   : > { %v531_v33 = vsub.f32 %v515_v7, %v521_v31 }
 0x3cf   : > { %v535_v34 = vmul.f32 1.442695, %v531_v33 }
 0x3d1   : > { %951 = vpow2.f32 %v535_v34 }
 0x3d4   : > { %v524_v35 = vpop.xlane.xlu1 %523  ;;  %v400_v32 = vpop.xlane.xlu2 %399 }
 0x3d5   : > { %v532_v36 = vsub.f32 %v516_v13, %v524_v35  ;;  %v408_v57 = vsub.f32 %v392_v12, %v400_v32  ;;  %v906_v35 = vld [vmem:[%s1280_s4 + $0x8] sm:$0xff] }
 0x3d6   : > { %650 = vmatpush.bf16.msrb.mxu2 %v906_v35 }
 0x3d7   : > { %v952_v37 = vpop.eup %951  ;;  %v537_v38 = vmul.f32 1.442695, %v532_v36  ;;  %v413_v58 = vmul.f32 1.442695, %v408_v57  ;;  %v905_v36 = vld [vmem:[%s1280_s4] sm:$0xff] }
 0x3d8   : > { %v543_v39 = vsel %vm316_vm0, %v952_v37, 0.0 }
 0x3d9   : > { %544 = vadd.xlane.f32.xlu0 %v543_v39  ;;  %953 = vpow2.f32 %v537_v38 }
 0x3da   : > { %651 = vmatpush.bf16.msrb.mxu2 %v905_v36 }
 0x3dc   : > { %v527_v40 = vpop.xlane.xlu0 %526  ;;  %v397_v45 = vpop.xlane.xlu1 %396 }
 0x3dd   : > { %v533_v41 = vsub.f32 %v517_v22, %v527_v40  ;;  %v407_v49 = vsub.f32 %v391_v21, %v397_v45 }
 0x3df   : > { %v539_v42 = vmul.f32 1.442695, %v533_v41  ;;  %v954_v43 = vpop.eup %953  ;;  %v411_v51 = vmul.f32 1.442695, %v407_v49  ;;  %v940_v49 = vld [vmem:[%s1281_s5] ss:$0 sm:$0xff] }
 0x3e0   : > { %v546_v44 = vsel %vm316_vm0, %v954_v43, 0.0 }
 0x3e1   : > { %955 = vpow2.f32 %v539_v42  ;;  %547 = vadd.xlane.f32.xlu1 %v546_v44 }
 0x3e4   : > { %v530_v14 = vpop.xlane.xlu2 %529 }
 0x3e5   : > { %v534_v46 = vsub.f32 %v518_v29, %v530_v14 }
 0x3e7   : > { %v541_v47 = vmul.f32 1.442695, %v534_v46  ;;  %v956_v48 = vpop.eup %955 }
 0x3e8   : > { %v549_v50 = vsel %vm316_vm0, %v956_v48, 0.0 }
 0x3e9   : > { %957 = vpow2.f32 %v541_v47  ;;  %550 = vadd.xlane.f32.xlu1 %v549_v50 }
 0x3ea   : > { %959 = vpow2.f32 %v411_v51 }
 0x3eb   : > { %961 = vpow2.f32 %v413_v58 }
 0x3ec   : > { %v568_v52 = vpop.permute.xlu2 %567 }
 0x3ed   : > { %565 = vrot.lane.b32.xlu0 %v1111_v18, %s1013_s26  ;;  %583 = vmatpush.bf16.msrb.mxu0 %v568_v52 }
 0x3ef   : > { %v958_v53 = vpop.eup %957 }
 0x3f0   : > { %v552_v54 = vsel %vm316_vm0, %v958_v53, 0.0  ;;  %v960_v55 = vpop.eup %959 }
 0x3f1   : > { %553 = vadd.xlane.f32.xlu1 %v552_v54  ;;  %v419_v56 = vsel %vm316_vm0, %v960_v55, 0.0  ;;  %v962_v59 = vpop.eup %961 }
 0x3f2   : > { %v422_v60 = vsel %vm316_vm0, %v962_v59, 0.0 }
 0x3f9   : > { %420 = vadd.xlane.f32.xlu1 %v419_v56 }
 0x417   : > { %423 = vadd.xlane.f32.xlu0 %v422_v60 }
 0x44c   : > { %v545_v61 = vpop.xlane.xlu0 %544 }
 0x44d   : > { %963 = vrcp.f32 %v545_v61 }
 0x453   : > { %v964_v62 = vpop.eup %963 }
 0x454   : > { %v548_v18 = vpop.xlane.xlu1 %547  ;;  %v559_v8 = vmul.f32 %v964_v62, %v952_v37  ;;  %v1015_v62 = vmov 32.0  }
 0x455   : > { %965 = vrcp.f32 %v548_v18 }
 0x45b   : > { %v966_v1 = vpop.eup %965 }
 0x45c   : > { %v560_v5 = vmul.f32 %v966_v1, %v954_v43  ;;  %v551_v7 = vpop.xlane.xlu1 %550 }
 0x45d   : > { %967 = vrcp.f32 %v551_v7 }
 0x45e   : > { %v563_v10 = vpack.c.bf16 %v560_v5, %v559_v8 }
 0x45f   : > { %v566_v9 = vpop.permute.xlu0 %565 }
 0x460   : > { %584 = vmatpush.bf16.msrb.mxu0 %v566_v9 }
 0x463   : > { %883 = vmatmul.msk.bf16.vlgmr.msrb.gmra.mxu0 %vm316_vm0, %v563_v10  ;;  %v968_v12 = vpop.eup %967 }
 0x464   : > { %v554_v11 = vpop.xlane.xlu1 %553  ;;  %v561_v16 = vmul.f32 %v968_v12, %v956_v48 }
 0x465   : > { %969 = vrcp.f32 %v554_v11 }
 0x46b   : > { %v970_v13 = vpop.eup %969 }
 0x46c   : > { %v562_v15 = vmul.f32 %v970_v13, %v958_v53  ;;  %v421_v19 = vpop.xlane.xlu1 %420 }
 0x46d   : > { %971 = vrcp.f32 %v421_v19 }
 0x46e   : > { %v564_v17 = vpack.c.bf16 %v562_v15, %v561_v16 }
 0x473   : > { %884 = vmatmul.msk.bf16.gmra.mxu0 %vm316_vm0, %v564_v17  ;;  %v972_v21 = vpop.eup %971 }
 0x474   : > { %v435_v23 = vmul.f32 %v972_v21, %v960_v55 }
 0x48a   : > { %v424_v20 = vpop.xlane.xlu0 %423 }
 0x48b   : > { %973 = vrcp.f32 %v424_v20 }
 0x48c   : > { %975 = vrcp.f32 %v1015_v62 }
 0x491   : > { %v974_v22 = vpop.eup %973 }
 0x492   : > { %v436_v26 = vmul.f32 %v974_v22, %v962_v59 }
 0x494   : > { %v439_v27 = vpack.c.bf16 %v436_v26, %v435_v23 }
 0x496   : > { %879 = vmatmul.msk.bf16.vlgmr.msra.gmra.mxu2 %vm316_vm0, %v439_v27 }
 0x4e0   : > { %v586_v24 = vpop.f32.mrf.mxu0 }
 0x4e8   : > { %v588_v29 = vpop.f32.mrf.mxu0 }
 0x4e9   : > { %v929_v30 = vpack.i.bf16 %v588_v29, %v586_v24 }
 0x4eb   : > { %930 = vrot.lane.b32.xlu2 %v929_v30, %s1014_s27 }
 0x4f0   : > { %v591_v31 = vpop.f32.mrf.mxu0 }
 0x4f8   : > { %v593_v33 = vpop.f32.mrf.mxu0 }
 0x4f9   : > { %v934_v34 = vpack.i.bf16 %v593_v33, %v591_v31 }
 0x4fb   : > { %935 = vrot.lane.b32.xlu1 %v934_v34, %s1014_s27 }
 0x519   : > { %v462_v37 = vpop.f32.mrf.mxu2 }
 0x521   : > { %v464_v40 = vpop.f32.mrf.mxu2 }
 0x545   : > { %v931_v38 = vpop.permute.xlu2 %930 }
 0x546   : > { %v933_v39 = vunpack.i.h.bf16 %v931_v38  ;;  %v932_v32 = vunpack.i.l.bf16 %v931_v38 }
 0x548   : > { %v613_v41 = vsel %vm355_vm1, %v464_v40, %v933_v39  ;;  %v612_v42 = vsel %vm355_vm1, %v462_v37, %v932_v32 }
 0x549   : > { %v616_v43 = vpack.c.bf16 %v613_v41, %v612_v42 }
 0x54b   : > { %893 = vmatmul.msk.bf16.vlgmr.msrb.gmra.mxu2 %vm316_vm0, %v616_v43 }
 0x56d   : > { %v936_v44 = vpop.permute.xlu1 %935 }
 0x56e   : > { %v938_v14 = vunpack.i.h.bf16 %v936_v44  ;;  %v937_v45 = vunpack.i.l.bf16 %v936_v44  ;;  %v1226_v44 = vshrl.u32 %v342_v25, 7 }
 0x570   : > { %v614_v46 = vsel %vm355_vm1, %v1150_v63, %v937_v45  ;;  %v615_v47 = vsel %vm355_vm1, %v1152_v0, %v938_v14  ;;  %vm783_vm7 = vcmp.lt.s32.totalorder %v1226_v44, %v1130_v28 }
 0x571   : > { %v617_v48 = vpack.c.bf16 %v615_v47, %v614_v46  ;;  %v1231_v46 = vld [vmem:[%s1282_s6] ss:$0 sm:$0xff] }
 0x573   : > { %894 = vmatmul.msk.bf16.gmra.mxu2 %vm316_vm0, %v617_v48 }
 0x5ce   : > { %v653_v50 = vpop.f32.mrf.mxu2 }
 0x5cf   : > { %v654_v51 = vadd.f32 %v940_v49, %v653_v50 }
 0x5d1   : > { %v663_v52 = vadd.f32 %v654_v51, %v1091_v2 }
 0x5d3   : > { %v667_v53 = vsel %vm316_vm0, %v663_v52, 0.0 }
 0x5d4   : > { %668 = vadd.xlane.f32.xlu2 %v667_v53 }
 0x5d6   : > { %v655_v54 = vpop.f32.mrf.mxu2 }
 0x5d7   : > { %v656_v55 = vadd.f32 %v940_v49, %v655_v54 }
 0x5d9   : > { %v664_v63 = vadd.f32 %v656_v55, %v1093_v3  ;;  %v976_v3 = vpop.eup %975 }
 0x5da   : > { %v680_v1 = vmul.f32 32.0, %v976_v3  ;;  %vm684_vm3 = vweird.f32 %v976_v3 }
 0x5db   : > { %v670_v0 = vsel %vm316_vm0, %v664_v63, 0.0 }
 0x5dc   : > { %671 = vadd.xlane.f32.xlu1 %v670_v0  ;;  %v681_v5 = vsub.f32 1.0, %v680_v1 }
 0x5de   : > { %v682_v7 = vmul.f32 %v976_v3, %v681_v5 }
 0x5e0   : > { %v683_v8 = vadd.f32 %v976_v3, %v682_v7 }
 0x5e2   : > { %v1205_v9 = vsel %vm684_vm3, %v976_v3, %v683_v8 }
 0x5f6   : > { %v658_v56 = vpop.f32.mrf.mxu2 }
 0x5f7   : > { %v659_v57 = vadd.f32 %v940_v49, %v658_v56 }
 0x5f9   : > { %v665_v58 = vadd.f32 %v659_v57, %v1095_v4 }
 0x5fb   : > { %v673_v59 = vsel %vm316_vm0, %v665_v58, 0.0 }
 0x5fc   : > { %674 = vadd.xlane.f32.xlu0 %v673_v59 }
 0x5fe   : > { %v660_v60 = vpop.f32.mrf.mxu2 }
 0x5ff   : > { %v661_v61 = vadd.f32 %v940_v49, %v660_v60  ;;  %v1236_v49 = vld [vmem:[%s1283_s7] ss:$0 sm:$0xff] }
 0x601   : > { %v666_v2 = vadd.f32 %v661_v61, %v1099_v6 }
 0x603   : > { %v676_v18 = vsel %vm316_vm0, %v666_v2, 0.0 }
 0x604   : > { %677 = vadd.xlane.f32.xlu0 %v676_v18 }
 0x647   : > { %v669_v4 = vpop.xlane.xlu2 %668 }
 0x648   : > { %v686_v10 = vmul.f32 %v1205_v9, %v669_v4 }
 0x64a   : > { %v690_v11 = vsub.f32 %v663_v52, %v686_v10  ;;  %v1016_v52 = vmov 0.0  }
 0x64b   : > { %v895_v53 = vsel %vm783_vm7, 1.0, %v1016_v52 }
 0x64c   : > { %v694_v12 = vmul.f32 %v690_v11, %v690_v11 }
 0x64e   : > { %v698_v6 = vsel %vm316_vm0, %v694_v12, 0.0 }
 0x64f   : > { %699 = vadd.xlane.f32.xlu2 %v698_v6  ;;  %v672_v13 = vpop.xlane.xlu1 %671 }
 0x650   : > { %v687_v15 = vmul.f32 %v1205_v9, %v672_v13  ;;  %v781_v13 = vadd.s32 16, %v1226_v44 }
 0x652   : > { %v691_v16 = vsub.f32 %v664_v63, %v687_v15  ;;  %v780_v63 = vadd.s32 8, %v1226_v44  ;;  %vm785_vm15 = vcmp.lt.s32.totalorder %v781_v13, %v1130_v28 }
 0x654   : > { %v695_v17 = vmul.f32 %v691_v16, %v691_v16  ;;  %vm784_vm11 = vcmp.lt.s32.totalorder %v780_v63, %v1130_v28 }
 0x655   : > { %v896_v60 = vsel %vm784_vm11, 1.0, %v1016_v52 }
 0x656   : > { %v701_v19 = vsel %vm316_vm0, %v695_v17, 0.0 }
 0x657   : > { %702 = vadd.xlane.f32.xlu0 %v701_v19 }
 0x66f   : > { %v675_v20 = vpop.xlane.xlu0 %674 }
 0x670   : > { %v688_v21 = vmul.f32 %v1205_v9, %v675_v20 }
 0x672   : > { %v1212_v22 = vsub.f32 %v665_v58, %v688_v21 }
 0x674   : > { %v696_v23 = vmul.f32 %v1212_v22, %v1212_v22 }
 0x676   : > { %v704_v26 = vsel %vm316_vm0, %v696_v23, 0.0  ;;  %v897_v23 = vsel %vm785_vm15, 1.0, %v1016_v52 }
 0x677   : > { %705 = vadd.xlane.f32.xlu2 %v704_v26  ;;  %v678_v27 = vpop.xlane.xlu0 %677 }
 0x678   : > { %v689_v24 = vmul.f32 %v1205_v9, %v678_v27 }
 0x67a   : > { %v1218_v29 = vsub.f32 %v666_v2, %v689_v24  ;;  %v782_v24 = vadd.s32 24, %v1226_v44 }
 0x67c   : > { %v697_v30 = vmul.f32 %v1218_v29, %v1218_v29 }
 0x67e   : > { %v707_v31 = vsel %vm316_vm0, %v697_v30, 0.0 }
 0x67f   : > { %708 = vadd.xlane.f32.xlu0 %v707_v31 }
 0x6c2   : > { %v700_v33 = vpop.xlane.xlu2 %699 }
 0x6c3   : > { %v710_v34 = vmul.f32 %v700_v33, %v1205_v9 }
 0x6c5   : > { %v714_v35 = vadd.f32 1e-05, %v710_v34 }
 0x6c7   : > { %977 = vrsqrt.f32 %v714_v35  ;;  %vm724_vm5 = vweird.f32 %v714_v35 }
 0x6ca   : > { %v703_v36 = vpop.xlane.xlu0 %702 }
 0x6cb   : > { %v711_v37 = vmul.f32 %v703_v36, %v1205_v9 }
 0x6cd   : > { %v978_v38 = vpop.eup %977  ;;  %v715_v39 = vadd.f32 1e-05, %v711_v37 }
 0x6ce   : > { %v719_v32 = vmul.f32 %v978_v38, %v714_v35  ;;  %vm725_vm4 = vweird.f32 %v978_v38 }
 0x6cf   : > { %979 = vrsqrt.f32 %v715_v39  ;;  %vm726_vm6 = vmor %vm724_vm5, %vm725_vm4  ;;  %vm734_vm9 = vweird.f32 %v715_v39  ;;  %vm786_vm4 = vcmp.lt.s32.totalorder %v782_v24, %v1130_v28 }
 0x6d0   : > { %v720_v40 = vmul.f32 %v978_v38, %v719_v32  ;;  %v898_v35 = vsel %vm786_vm4, 1.0, %v1016_v52 }
 0x6d2   : > { %v721_v41 = vmul.f32 0.5, %v720_v40 }
 0x6d4   : > { %v722_v42 = vsub.f32 1.5, %v721_v41 }
 0x6d5   : > { %v980_v43 = vpop.eup %979 }
 0x6d6   : > { %v723_v14 = vmul.f32 %v978_v38, %v722_v42  ;;  %v729_v45 = vmul.f32 %v980_v43, %v715_v39  ;;  %vm735_vm8 = vweird.f32 %v980_v43 }
 0x6d7   : > { %vm736_vm10 = vmor %vm734_vm9, %vm735_vm8 }
 0x6d8   : > { %v727_v47 = vsel %vm726_vm6, %v978_v38, %v723_v14  ;;  %v730_v48 = vmul.f32 %v980_v43, %v729_v45 }
 0x6d9   : > { %v758_v25 = vmul.f32 %v727_v47, %v690_v11 }
 0x6da   : > { %v731_v50 = vmul.f32 0.5, %v730_v48 }
 0x6db   : > { %v766_v51 = vmul.f32 %v1231_v46, %v758_v25 }
 0x6dc   : > { %v732_v54 = vsub.f32 1.5, %v731_v50 }
 0x6dd   : > { %v774_v55 = vadd.f32 %v1236_v49, %v766_v51 }
 0x6de   : > { %v733_v0 = vmul.f32 %v980_v43, %v732_v54 }
 0x6df   : > { %v795_v56 = vmul.f32 %v895_v53, %v774_v55 }
 0x6e0   : > { %v737_v57 = vsel %vm736_vm10, %v980_v43, %v733_v0 }
 0x6e1   : > { %799 = vst.msk [vmem:[%s1248_s20] sm:$0xff] %vm316_vm0, %v795_v56  ;;  %v759_v58 = vmul.f32 %v737_v57, %v691_v16 }
 0x6e3   : > { %v767_v59 = vmul.f32 %v1231_v46, %v759_v58 }
 0x6e5   : > { %v775_v61 = vadd.f32 %v1236_v49, %v767_v59 }
 0x6e7   : > { %v796_v2 = vmul.f32 %v896_v60, %v775_v61 }
 0x6e9   : > { %800 = vst.msk [vmem:[%s1248_s20 + $0x8] sm:$0xff] %vm316_vm0, %v796_v2 }
 0x6ea   : > { %v706_v18 = vpop.xlane.xlu2 %705 }
 0x6eb   : > { %v712_v62 = vmul.f32 %v706_v18, %v1205_v9 }
 0x6ed   : > { %v716_v3 = vadd.f32 1e-05, %v712_v62 }
 0x6ef   : > { %981 = vrsqrt.f32 %v716_v3  ;;  %vm744_vm13 = vweird.f32 %v716_v3 }
 0x6f2   : > { %v709_v1 = vpop.xlane.xlu0 %708 }
 0x6f3   : > { %v713_v5 = vmul.f32 %v709_v1, %v1205_v9 }
 0x6f5   : > { %v982_v7 = vpop.eup %981  ;;  %v717_v8 = vadd.f32 1e-05, %v713_v5 }
 0x6f6   : > { %v739_v4 = vmul.f32 %v982_v7, %v716_v3  ;;  %vm745_vm12 = vweird.f32 %v982_v7 }
 0x6f7   : > { %983 = vrsqrt.f32 %v717_v8  ;;  %vm746_vm14 = vmor %vm744_vm13, %vm745_vm12  ;;  %vm754_vm2 = vweird.f32 %v717_v8 }
 0x6f8   : > { %v740_v10 = vmul.f32 %v982_v7, %v739_v4 }
 0x6fa   : > { %v741_v11 = vmul.f32 0.5, %v740_v10 }
 0x6fc   : > { %v742_v12 = vsub.f32 1.5, %v741_v11 }
 0x6fd   : > { %v984_v6 = vpop.eup %983 }
 0x6fe   : > { %v743_v15 = vmul.f32 %v982_v7, %v742_v12  ;;  %v749_v16 = vmul.f32 %v984_v6, %v717_v8  ;;  %vm755_vm1 = vweird.f32 %v984_v6 }
 0x6ff   : > { %vm756_vm3 = vmor %vm754_vm2, %vm755_vm1 }
 0x700   : > { %v747_v17 = vsel %vm746_vm14, %v982_v7, %v743_v15  ;;  %v750_v19 = vmul.f32 %v984_v6, %v749_v16 }
 0x701   : > { %v760_v9 = vmul.f32 %v747_v17, %v1212_v22 }
 0x702   : > { %v751_v20 = vmul.f32 0.5, %v750_v19 }
 0x703   : > { %v768_v21 = vmul.f32 %v1231_v46, %v760_v9 }
 0x704   : > { %v752_v26 = vsub.f32 1.5, %v751_v20 }
 0x705   : > { %v776_v27 = vadd.f32 %v1236_v49, %v768_v21 }
 0x706   : > { %v753_v30 = vmul.f32 %v984_v6, %v752_v26 }
 0x707   : > { %v797_v31 = vmul.f32 %v897_v23, %v776_v27 }
 0x708   : > { %v757_v33 = vsel %vm756_vm3, %v984_v6, %v753_v30 }
 0x709   : > { %801 = vst.msk [vmem:[%s1248_s20 + $0x10] sm:$0xff] %vm316_vm0, %v797_v31  ;;  %v761_v22 = vmul.f32 %v757_v33, %v1218_v29 }
 0x70b   : > { %v769_v34 = vmul.f32 %v1231_v46, %v761_v22 }
 0x70d   : > { %v777_v36 = vadd.f32 %v1236_v49, %v769_v34 }
 0x70f   : > { %v798_v37 = vmul.f32 %v898_v35, %v777_v36 }
 0x711   : > { %802 = vst.msk [vmem:[%s1248_s20 + $0x18] sm:$0xff] %vm316_vm0, %v798_v37 }
 0x712 PF: > { %s26_s9 = sadd.s32 1, %s1005_s9  }
 0x713   : > { %p23_p4 = scmp.ge.s32.totalorder %s26_s9, 4  }
 0x715   :  { %25 = sbr.rel (!%p23_p4) target bundleno = 7 (0x7), region = 78 }

// kernel: _lambda_.36
= control target key start
LH: loop header
LB: loop body
LE: loop exit
PB: predicated region body
PF: predicated region fallthrough
CT: control target
= control target key end

     0   :  { %s1312_s30 = smov [#allocation4]   ;;  %s1638_s0 = inlined_call_operand.vmem [shape: s32[2], index: 0, kind: input, shape index: {}]   ;;  %s1639_s1 = inlined_call_operand.vmem [shape: f32[2,40,32], index: 1, kind: input, shape index: {}]   ;;  %s1640_s2 = inlined_call_operand.vmem [shape: bf16[9,32,64], index: 2, kind: input, shape index: {}]   ;;  %s1641_s3 = inlined_call_operand.vmem [shape: f32[1,64], index: 3, kind: input, shape index: {}]   ;;  %s1642_s4 = inlined_call_operand.vmem [shape: bf16[1,64,32], index: 4, kind: input, shape index: {}]   ;;  %s1643_s5 = inlined_call_operand.vmem [shape: f32[1,32], index: 5, kind: input, shape index: {}]   ;;  %s1644_s6 = inlined_call_operand.vmem [shape: f32[1,32], index: 6, kind: input, shape index: {}]   ;;  %s1645_s7 = inlined_call_operand.vmem [shape: f32[1,32], index: 7, kind: input, shape index: {}]   ;;  %s1646_s8 = inlined_call_operand.vmem [shape: f32[2,32,32], index: 8, kind: output, shape index: {}]  }
   0x1   :  { %s14_s29 = sshll.u32 %s1638_s0, 4  ;;  %s15_s29 = int_to_ptr.vmem [resolvable:$true] %s14_s29 }
   0x2   :  { %17 = dma.vmem_to_smem %s15_s29, 16, %s1312_s30, [#allocation3] }
   0x3   :  { %1306 = dma.done.wait [#allocation3], 16 }
   0x4   :  { %1307 = vsyncadd [#allocation3], 4294967280 }
   0x5   :  { %20 = sfence }
   0x6   :  { %s1363_s9 = smov 0  }
   0x7 LB: > { %s1369_s10 = sadd.s32 4294967295, %s1310_s9   ;;  %p1087_p0 = scmp.ge.s32.totalorder %s1310_s9, 1  ;;  %s1310_s9 = sphi %s1363_s9, %s26_s9  }
   0x8   : > { %p246_p1 = scmp.lt.s32.totalorder %s1310_s9, 3 }
   0xa   : > { %p247_p2 = pnand %p1087_p0, %p246_p1 }
   0xb   : > { %p278_p3 = scmp.lt.s32.totalorder (!%p247_p2), %s1369_s10, 1 }
   0xc   : > { %250 = sbr.rel (%p247_p2) target bundleno = 666 (0x29a), region = 48 }
  0x11   : > { %v1239_v0 = vld [vmem:[%s1640_s2 + $0x8] sm:$0xff]  ;;  %v1241_v1 = vld [vmem:[%s1640_s2 + $0x18] sm:$0xff]  ;;  %v1238_v2 = vld [vmem:[%s1640_s2] sm:$0xff]  ;;  %s1384_s16 = scalar_select %p278_p3, %s1369_s10, 1  ;;  %vm340_vm0 = vcmask 261120   ;;  %vm521_vm4 = vcmask 1045504  }
  0x12   : > { %1262 = vmatpush.bf16.msra.mxu3 %v1239_v0  ;;  %1260 = vmatpush.bf16.msra.mxu2 %v1241_v1  ;;  %v1240_v3 = vld [vmem:[%s1640_s2 + $0x10] sm:$0xff]  ;;  %v1243_v4 = vld [vmem:[%s1640_s2 + $0x28] sm:$0xff]  ;;  %v1245_v5 = vld [vmem:[%s1640_s2 + $0x38] sm:$0xff]  ;;  %vm307_vm1 = vsmask.f32 7424  ;;  %vm409_vm5 = vcmask 1046528  }
  0x13   : > { %353 = vmatpush.bf16.msra.mxu0 %v1241_v1  ;;  %388 = vmatpush.bf16.msra.mxu1 %v1239_v0  ;;  %s1264_s23 = smul.u32 40, %s1384_s16  ;;  %v1247_v6 = vld [vmem:[%s1640_s2 + $0x48] sm:$0xff]  ;;  %v1249_v7 = vld [vmem:[%s1640_s2 + $0x58] sm:$0xff]  ;;  %v1244_v8 = vld [vmem:[%s1640_s2 + $0x30] sm:$0xff]  ;;  %vm573_vm2 = vsmask.f32 5376 }
  0x14   : > { %v1242_v15 = vld [vmem:[%s1640_s2 + $0x20] sm:$0xff]  ;;  %v1253_v19 = vld [vmem:[%s1640_s2 + $0x78] sm:$0xff]  ;;  %v1248_v22 = vld [vmem:[%s1640_s2 + $0x50] sm:$0xff]  ;;  %vm461_vm3 = vsmask.f32 6400  ;;  %vm631_vm7 = vcmask 1044480  }
  0x15   : > { %s282_s30 = scalar_lea.vmem %s1639_s1, %s1264_s23  ;;  %v1246_v18 = vld [vmem:[%s1640_s2 + $0x40] sm:$0xff]  ;;  %v1255_v30 = vld [vmem:[%s1640_s2 + $0x88] sm:$0xff]  ;;  %v1252_v43 = vld [vmem:[%s1640_s2 + $0x70] sm:$0xff]  ;;  %vm683_vm6 = vsmask.f32 4352  ;;  %vm796_vm8 = vcmask 523264  }
  0x16   : > { %1263 = vmatpush.bf16.msra.mxu3 %v1238_v2  ;;  %1261 = vmatpush.bf16.msra.mxu2 %v1240_v3  ;;  %v1408_v9 = vld [vmem:[%s282_s30] sm:$0xff]  ;;  %v1410_v10 = vld [vmem:[%s282_s30 + $0x8] sm:$0xff]  ;;  %v1412_v11 = vld [vmem:[%s282_s30 + $0x10] sm:$0xff]  ;;  %vm873_vm9 = vcmask 1043456   ;;  %s289_s23 = sld [smem:[#allocation4 + %s1369_s10]]  ;;  %s1237_s27 = sshll.u32 %s1384_s16, 5 }
  0x17   : > { %354 = vmatpush.bf16.msra.mxu0 %v1240_v3  ;;  %389 = vmatpush.bf16.msra.mxu1 %v1238_v2  ;;  %v1414_v12 = vld [vmem:[%s282_s30 + $0x18] sm:$0xff]  ;;  %v1416_v13 = vld [vmem:[%s282_s30 + $0x20] sm:$0xff]  ;;  %v1420_v14 = vpack.c.bf16 %v1410_v10, %v1408_v9  ;;  %v1251_v35 = vld [vmem:[%s1640_s2 + $0x68] sm:$0xff]  ;;  %s1611_s30 = scalar_lea.vmem %s1646_s8, %s1237_s27 }
  0x18   : > { %v1427_v16 = vpack.c.bf16 %v1414_v12, %v1412_v11  ;;  %v1431_v17 = vpack.c.bf16 %v1416_v13, %v1416_v13  ;;  %v1250_v45 = vld [vmem:[%s1640_s2 + $0x60] sm:$0xff] }
  0x19   : > { %v1440_v20 = vshrl.u32 %v1420_v14, 16  ;;  %v1443_v21 = vshll.u32 %v1420_v14, 16  ;;  %v522_v51 = vrot.slane %v1420_v14, 2  ;;  %v410_v53 = vrot.slane %v1420_v14, 1  ;;  %v1254_v55 = vld [vmem:[%s1640_s2 + $0x80] sm:$0xff] }
  0x1a   : > { %439 = vmatpush.bf16.msrb.mxu2 %v1243_v4  ;;  %499 = vmatpush.bf16.msrb.mxu3 %v1245_v5  ;;  %v1453_v23 = vshll.u32 %v1427_v16, 16  ;;  %v1456_v24 = vshrl.u32 %v1427_v16, 16  ;;  %v1459_v25 = vshll.u32 %v1431_v17, 16  ;;  %v523_v52 = vrot.slane %v1427_v16, 2 }
  0x1b   : > { %551 = vmatpush.bf16.msrb.mxu0 %v1247_v6  ;;  %609 = vmatpush.bf16.msrb.mxu1 %v1249_v7  ;;  %v313_v26 = vrot.slane %v1443_v21, 1  ;;  %v462_v32 = vrot.slane %v1440_v20, 1  ;;  %v463_v33 = vrot.slane %v1443_v21, 2  ;;  %v574_v38 = vrot.slane %v1440_v20, 2 }
  0x1c   : > { %1113 = vmatmul.msk.bf16.vlgmr.msra.gmra.mxu1 %vm340_vm0, %v1420_v14  ;;  %1114 = vmatmul.msk.bf16.vlgmr.msra.gmra.mxu3 %vm340_vm0, %v1427_v16  ;;  %v318_v27 = vrot.slane %v1453_v23, 1  ;;  %v326_v28 = vrot.slane %v1459_v25, 1  ;;  %v465_v34 = vrot.slane %v1456_v24, 1  ;;  %v466_v37 = vrot.slane %v1453_v23, 2 }
  0x1d   : > { %v314_v29 = vor.u32 %v313_v26, %v1440_v20  ;;  %v575_v39 = vrot.slane %v1443_v21, 3  ;;  %v577_v41 = vrot.slane %v1456_v24, 2  ;;  %v578_v42 = vrot.slane %v1453_v23, 3 }
  0x1e   : > { %500 = vmatpush.bf16.msrb.mxu3 %v1244_v8  ;;  %440 = vmatpush.bf16.msrb.mxu2 %v1242_v15  ;;  %v322_v31 = vor.u32 %v1456_v24, %v318_v27  ;;  %v464_v46 = vor.u32 %v463_v33, %v462_v32  ;;  %v467_v47 = vor.u32 %v466_v37, %v465_v34  ;;  %v411_v54 = vrot.slane %v1427_v16, 1 }
  0x1f   : > { %552 = vmatpush.bf16.msrb.mxu0 %v1246_v18  ;;  %610 = vmatpush.bf16.msrb.mxu1 %v1248_v22  ;;  %v319_v36 = vsel %vm307_vm1, %v314_v29, %v318_v27  ;;  %v576_v44 = vor.u32 %v575_v39, %v574_v38  ;;  %v579_v48 = vor.u32 %v578_v42, %v577_v41  ;;  %v469_v56 = vshrl.u32 %v1431_v17, 16 }
  0x20   : > { %v327_v40 = vsel %vm307_vm1, %v322_v31, %v326_v28  ;;  %1103 = vmatmul.msk.bf16.vlgmr.msra.gmra.mxu0 %vm340_vm0, %v319_v36  ;;  %v468_v50 = vsel %vm461_vm3, %v464_v46, %v467_v47  ;;  %v524_v57 = vsel %vm521_vm4, %v522_v51, %v523_v52  ;;  %v412_v58 = vsel %vm409_vm5, %v410_v53, %v411_v54 }
  0x21   : > { %1104 = vmatmul.msk.bf16.vlgmr.msra.gmra.mxu2 %vm340_vm0, %v327_v40  ;;  %v580_v49 = vsel %vm573_vm2, %v576_v44, %v579_v48  ;;  %v581_v59 = vrot.slane %v469_v56, 2  ;;  %v582_v60 = vrot.slane %v1459_v25, 3  ;;  %v471_v61 = vrot.slane %v469_v56, 1 }
  0x22   : > { %719 = vmatpush.bf16.msra.mxu3 %v1253_v19  ;;  %661 = vmatpush.bf16.msra.mxu2 %v1251_v35  ;;  %v472_v62 = vrot.slane %v1459_v25, 2  ;;  %v525_v3 = vrot.slane %v1431_v17, 2  ;;  %v413_v4 = vrot.slane %v1431_v17, 1  ;;  %v684_v7 = vrot.slane %v1440_v20, 3 }
  0x23   : > { %767 = vmatpush.bf16.msra.mxu0 %v1255_v30  ;;  %v583_v63 = vor.u32 %v582_v60, %v581_v59  ;;  %v685_v8 = vrot.slane %v1443_v21, 4  ;;  %v687_v15 = vrot.slane %v1456_v24, 3  ;;  %v688_v18 = vrot.slane %v1453_v23, 4 }
  0x24   : > { %v473_v0 = vor.u32 %v472_v62, %v471_v61  ;;  %v526_v5 = vsel %vm521_vm4, %v523_v52, %v525_v3  ;;  %v414_v6 = vsel %vm409_vm5, %v411_v54, %v413_v4  ;;  %v632_v27 = vrot.slane %v1420_v14, 3 }
  0x25   : > { %v584_v1 = vsel %vm573_vm2, %v579_v48, %v583_v63  ;;  %v686_v19 = vor.u32 %v685_v8, %v684_v7  ;;  %v689_v22 = vor.u32 %v688_v18, %v687_v15  ;;  %v633_v20 = vrot.slane %v1427_v16, 3  ;;  %v1276_v8 = vld [vmem:[%s1641_s3] ss:$0 sm:$0xff] }
  0x26   : > { %720 = vmatpush.bf16.msra.mxu3 %v1252_v43  ;;  %662 = vmatpush.bf16.msra.mxu2 %v1250_v45  ;;  %v474_v2 = vsel %vm461_vm3, %v467_v47, %v473_v0  ;;  %v736_v21 = vpack.c.bf16 %v1412_v11, %v1410_v10  ;;  %v691_v23 = vrot.slane %v469_v56, 3  ;;  %v692_v28 = vrot.slane %v1459_v25, 4  ;;  %v1258_v45 = vld [vmem:[%s1642_s4 + $0x10] sm:$0xff] }
  0x27   : > { %768 = vmatpush.bf16.msra.mxu0 %v1254_v55  ;;  %v690_v26 = vsel %vm683_vm6, %v686_v19, %v689_v22  ;;  %v634_v24 = vsel %vm631_vm7, %v632_v27, %v633_v20  ;;  %v635_v14 = vrot.slane %v1431_v17, 3  ;;  %v737_v16 = vpack.c.bf16 %v1416_v13, %v1414_v12  ;;  %v1259_v17 = vld [vmem:[%s1642_s4 + $0x18] sm:$0xff] }
  0x28   : > { %v693_v29 = vor.u32 %v692_v28, %v691_v23  ;;  %853 = vmatpush.bf16.msra.mxu1 %v1259_v17 }
  0x29   : > { %v636_v31 = vsel %vm631_vm7, %v633_v20, %v635_v14 }
  0x2a   : > { %v694_v30 = vsel %vm683_vm6, %v689_v22, %v693_v29 }
  0x2c   : > { %1169 = vmatmul.msk.bf16.vlgmr.msrb.gmra.mxu1 %vm340_vm0, %v580_v49  ;;  %1141 = vmatmul.msk.bf16.vlgmr.msrb.gmra.mxu3 %vm340_vm0, %v468_v50  ;;  %v1257_v50 = vld [vmem:[%s1642_s4 + $0x8] sm:$0xff] }
  0x2d   : > { %854 = vmatpush.bf16.msra.mxu1 %v1258_v45 }
  0x30   : > { %1155 = vmatmul.msk.bf16.vlgmr.msrb.gmra.mxu0 %vm340_vm0, %v524_v57  ;;  %v1256_v57 = vld [vmem:[%s1642_s4] sm:$0xff] }
  0x31   : > { %1127 = vmatmul.msk.bf16.vlgmr.msrb.gmra.mxu2 %vm340_vm0, %v412_v58  ;;  %855 = vmatpush.bf16.msra.mxu1 %v1257_v50 }
  0x35   : > { %856 = vmatpush.bf16.msra.mxu1 %v1256_v57 }
  0x3c   : > { %1170 = vmatmul.msk.bf16.gmra.mxu1 %vm340_vm0, %v584_v1  ;;  %1142 = vmatmul.msk.bf16.gmra.mxu3 %vm340_vm0, %v474_v2 }
  0x40   : > { %1156 = vmatmul.msk.bf16.gmra.mxu0 %vm340_vm0, %v526_v5 }
  0x41   : > { %1128 = vmatmul.msk.bf16.gmra.mxu2 %vm340_vm0, %v414_v6 }
  0x4c   : > { %1197 = vmatmul.msk.bf16.vlgmr.msra.gmra.mxu3 %vm340_vm0, %v690_v26 }
  0x50   : > { %1211 = vmatmul.msk.bf16.vlgmr.msra.gmra.mxu0 %vm340_vm0, %v736_v21 }
  0x51   : > { %1183 = vmatmul.msk.bf16.vlgmr.msra.gmra.mxu2 %vm340_vm0, %v634_v24 }
  0x5c   : > { %1198 = vmatmul.msk.bf16.gmra.mxu3 %vm340_vm0, %v694_v30 }
  0x60   : > { %1212 = vmatmul.msk.bf16.gmra.mxu0 %vm340_vm0, %v737_v16 }
  0x61   : > { %1184 = vmatmul.msk.bf16.gmra.mxu2 %vm340_vm0, %v636_v31 }
  0x99   : > { %v391_v42 = vpop.f32.mrf.mxu1 }
  0x9d   : > { %v356_v25 = vpop.f32.mrf.mxu0 }
  0x9e   : > { %v392_v49 = vadd.f32 %v391_v42, %v356_v25 }
  0x9f   : > { %v396_v32 = vpop.f32.mrf.mxu3 }
  0xa1   : > { %v393_v47 = vpop.f32.mrf.mxu1 }
  0xa4   : > { %v361_v33 = vpop.f32.mrf.mxu2 }
  0xa5   : > { %v358_v35 = vpop.f32.mrf.mxu0  ;;  %v397_v3 = vadd.f32 %v396_v32, %v361_v33 }
  0xa6   : > { %v394_v58 = vadd.f32 %v393_v47, %v358_v35 }
  0xa7   : > { %v398_v34 = vpop.f32.mrf.mxu3 }
  0xa9   : > { %v612_v54 = vpop.f32.mrf.mxu1 }
  0xac   : > { %v363_v36 = vpop.f32.mrf.mxu2 }
  0xad   : > { %v554_v38 = vpop.f32.mrf.mxu0  ;;  %v399_v21 = vadd.f32 %v398_v34, %v363_v36 }
  0xaf   : > { %v502_v37 = vpop.f32.mrf.mxu3 }
  0xb1   : > { %v614_v1 = vpop.f32.mrf.mxu1 }
  0xb4   : > { %v442_v39 = vpop.f32.mrf.mxu2 }
  0xb5   : > { %v556_v41 = vpop.f32.mrf.mxu0  ;;  %v452_v52 = vadd.f32 %v442_v39, %v392_v49 }
  0xb7   : > { %v504_v40 = vpop.f32.mrf.mxu3  ;;  %v512_v55 = vadd.f32 %v502_v37, %v452_v52 }
  0xb9   : > { %v564_v59 = vadd.f32 %v554_v38, %v512_v55  ;;  %v617_v28 = vpop.f32.mrf.mxu1 }
  0xbb   : > { %v622_v63 = vadd.f32 %v612_v54, %v564_v59  ;;  %v875_v59 = vrot.slane %v1410_v10, 4 }
  0xbc   : > { %v444_v43 = vpop.f32.mrf.mxu2 }
  0xbd   : > { %v559_v46 = vpop.f32.mrf.mxu0  ;;  %v453_v60 = vadd.f32 %v444_v43, %v394_v58  ;;  %v874_v58 = vrot.slane %v1408_v9, 4 }
  0xbf   : > { %v507_v44 = vpop.f32.mrf.mxu3  ;;  %v513_v0 = vadd.f32 %v504_v40, %v453_v60  ;;  %v1277_v60 = vld [vmem:[%s1643_s5] ss:$0 sm:$0xff] }
  0xc1   : > { %v565_v5 = vadd.f32 %v556_v41, %v513_v0  ;;  %v619_v34 = vpop.f32.mrf.mxu1 }
  0xc3   : > { %v623_v19 = vadd.f32 %v614_v1, %v565_v5  ;;  %v877_v1 = vrot.slane %v1412_v11, 4  ;;  %v879_v5 = vrot.slane %v1414_v12, 4  ;;  %v881_v11 = vrot.slane %v1416_v13, 4 }
  0xc4   : > { %v447_v48 = vpop.f32.mrf.mxu2 }
  0xc5   : > { %v561_v53 = vpop.f32.mrf.mxu0  ;;  %v454_v6 = vadd.f32 %v447_v48, %v397_v3  ;;  %v878_v9 = vsel %vm873_vm9, %v875_v59, %v877_v1 }
  0xc7   : > { %v509_v51 = vpop.f32.mrf.mxu3  ;;  %v514_v22 = vadd.f32 %v507_v44, %v454_v6 }
  0xc9   : > { %v566_v29 = vadd.f32 %v559_v46, %v514_v22 }
  0xcb   : > { %v624_v31 = vadd.f32 %v617_v28, %v566_v29 }
  0xcc   : > { %v449_v56 = vpop.f32.mrf.mxu2 }
  0xcd   : > { %v770_v62 = vpop.f32.mrf.mxu0  ;;  %v455_v30 = vadd.f32 %v449_v56, %v399_v21  ;;  %v1313_v21 = vmov 32.0  }
  0xce   : > { %1280 = vrcp.f32 %v1313_v21 }
  0xcf   : > { %v722_v61 = vpop.f32.mrf.mxu3  ;;  %v515_v32 = vadd.f32 %v509_v51, %v455_v30 }
  0xd1   : > { %v567_v39 = vadd.f32 %v561_v53, %v515_v32 }
  0xd3   : > { %v625_v41 = vadd.f32 %v619_v34, %v567_v39 }
  0xd4   : > { %v664_v2 = vpop.f32.mrf.mxu2 }
  0xd5   : > { %v674_v4 = vadd.f32 %v664_v2, %v622_v63  ;;  %v772_v27 = vpop.f32.mrf.mxu0 }
  0xd7   : > { %v732_v7 = vadd.f32 %v722_v61, %v674_v4  ;;  %v724_v18 = vpop.f32.mrf.mxu3 }
  0xd9   : > { %v780_v15 = vadd.f32 %v770_v62, %v732_v7  ;;  %v876_v62 = vsel %vm873_vm9, %v874_v58, %v875_v59 }
  0xdb   : > { %v788_v26 = vadd.f32 %v1276_v8, %v780_v15 }
  0xdc   : > { %v666_v20 = vpop.f32.mrf.mxu2 }
  0xdd   : > { %v792_v24 = vmax.f32 %v788_v26, 0.0  ;;  %v675_v23 = vadd.f32 %v666_v20, %v623_v19  ;;  %v775_v17 = vpop.f32.mrf.mxu0  ;;  %v882_v26 = vsel %vm873_vm9, %v879_v5, %v881_v11 }
  0xdf   : > { %v733_v14 = vadd.f32 %v724_v18, %v675_v23  ;;  %797 = vst.msk [vmem:[#allocation2] sm:$0xff] %vm796_vm8, %v792_v24  ;;  %v727_v33 = vpop.f32.mrf.mxu3  ;;  %v1281_v24 = vpop.eup %1280 }
  0xe0   : > { %v904_v23 = vmul.f32 32.0, %v1281_v24  ;;  %vm908_vm10 = vweird.f32 %v1281_v24 }
  0xe1   : > { %v781_v16 = vadd.f32 %v772_v27, %v733_v14 }
  0xe2   : > { %v905_v28 = vsub.f32 1.0, %v904_v23 }
  0xe3   : > { %v789_v25 = vadd.f32 %v1276_v8, %v781_v16 }
  0xe4   : > { %v669_v35 = vpop.f32.mrf.mxu2  ;;  %v906_v29 = vmul.f32 %v1281_v24, %v905_v28 }
  0xe5   : > { %v793_v37 = vmax.f32 %v789_v25, 0.0  ;;  %v676_v38 = vadd.f32 %v669_v35, %v624_v31  ;;  %v777_v51 = vpop.f32.mrf.mxu0 }
  0xe6   : > { %v801_v47 = vld [vmem:[#allocation2] sm:$0xff]  ;;  %v907_v30 = vadd.f32 %v1281_v24, %v906_v29 }
  0xe7   : > { %v734_v40 = vadd.f32 %v727_v33, %v676_v38  ;;  %798 = vst.msk [vmem:[#allocation2 + $0x8] sm:$0xff] %vm796_vm8, %v793_v37  ;;  %v729_v46 = vpop.f32.mrf.mxu3 }
  0xe8   : > { %v909_v13 = vsel %vm908_vm10, %v1281_v24, %v907_v30 }
  0xe9   : > { %v782_v36 = vadd.f32 %v775_v17, %v734_v40 }
  0xeb   : > { %v790_v42 = vadd.f32 %v1276_v8, %v782_v36 }
  0xec   : > { %v671_v43 = vpop.f32.mrf.mxu2 }
  0xed   : > { %v794_v44 = vmax.f32 %v790_v42, 0.0  ;;  %v677_v45 = vadd.f32 %v671_v43, %v625_v41 }
  0xee   : > { %v802_v48 = vld [vmem:[#allocation2 + $0x8] sm:$0xff] }
  0xef   : > { %v735_v49 = vadd.f32 %v729_v46, %v677_v45  ;;  %799 = vst.msk [vmem:[#allocation2 + $0x10] sm:$0xff] %vm796_vm8, %v794_v44  ;;  %v805_v50 = vpack.c.bf16 %v802_v48, %v801_v47 }
  0xf1   : > { %v783_v52 = vadd.f32 %v777_v51, %v735_v49  ;;  %1229 = vmatmul.msk.bf16.vlgmr.msra.gmra.mxu1 %vm796_vm8, %v805_v50 }
  0xf3   : > { %v791_v53 = vadd.f32 %v1276_v8, %v783_v52  ;;  %v880_v8 = vsel %vm873_vm9, %v877_v1, %v879_v5 }
  0xf5   : > { %v795_v54 = vmax.f32 %v791_v53, 0.0 }
  0xf6   : > { %v803_v55 = vld [vmem:[#allocation2 + $0x10] sm:$0xff] }
  0xf7   : > { %800 = vst.msk [vmem:[#allocation2 + $0x18] sm:$0xff] %vm796_vm8, %v795_v54 }
  0xfe   : > { %v804_v56 = vld [vmem:[#allocation2 + $0x18] sm:$0xff] }
  0xff   : > { %v806_v57 = vpack.c.bf16 %v804_v56, %v803_v55  ;;  %v1002_v56 = vlaneseq }
 0x101   : > { %1230 = vmatmul.msk.bf16.gmra.mxu1 %vm796_vm8, %v806_v57 }
 0x16e   : > { %v858_v61 = vpop.f32.mrf.mxu1 }
 0x16f   : > { %v859_v63 = vadd.f32 %v1277_v60, %v858_v61 }
 0x171   : > { %v887_v0 = vadd.f32 %v876_v62, %v859_v63  ;;  %v1588_v62 = vshrl.u32 %v1002_v56, 7 }
 0x173   : > { %v891_v2 = vsel %vm340_vm0, %v887_v0, 0.0 }
 0x174   : > { %892 = vadd.xlane.f32.xlu0 %v891_v2 }
 0x176   : > { %v860_v3 = vpop.f32.mrf.mxu1 }
 0x177   : > { %v861_v4 = vadd.f32 %v1277_v60, %v860_v3  ;;  %v1595_v3 = vld [vmem:[%s1644_s6] ss:$0 sm:$0xff] }
 0x179   : > { %v888_v10 = vadd.f32 %v878_v9, %v861_v4 }
 0x17b   : > { %v894_v6 = vsel %vm340_vm0, %v888_v10, 0.0 }
 0x17c   : > { %895 = vadd.xlane.f32.xlu0 %v894_v6 }
 0x17e   : > { %v863_v7 = vpop.f32.mrf.mxu1 }
 0x17f   : > { %v864_v15 = vadd.f32 %v1277_v60, %v863_v7 }
 0x181   : > { %v889_v18 = vadd.f32 %v880_v8, %v864_v15 }
 0x183   : > { %v897_v19 = vsel %vm340_vm0, %v889_v18, 0.0 }
 0x184   : > { %898 = vadd.xlane.f32.xlu1 %v897_v19 }
 0x186   : > { %v865_v22 = vpop.f32.mrf.mxu1 }
 0x187   : > { %v866_v27 = vadd.f32 %v1277_v60, %v865_v22 }
 0x189   : > { %v890_v20 = vadd.f32 %v882_v26, %v866_v27  ;;  %v1004_v27 = vadd.s32 8, %v1588_v62 }
 0x18b   : > { %v900_v12 = vsel %vm340_vm0, %v890_v20, 0.0 }
 0x18c   : > { %901 = vadd.xlane.f32.xlu1 %v900_v12 }
 0x1e7   : > { %v893_v14 = vpop.xlane.xlu0 %892 }
 0x1e8   : > { %v910_v16 = vmul.f32 %v909_v13, %v893_v14 }
 0x1ea   : > { %v914_v31 = vsub.f32 %v887_v0, %v910_v16  ;;  %v1590_v0 = vstv %s289_s23 }
 0x1eb   : > { %vm1008_vm14 = vcmp.lt.s32.totalorder %v1588_v62, %v1590_v0  ;;  %vm1009_vm3 = vcmp.lt.s32.totalorder %v1004_v27, %v1590_v0 }
 0x1ec   : > { %v918_v32 = vmul.f32 %v914_v31, %v914_v31 }
 0x1ee   : > { %v922_v25 = vsel %vm340_vm0, %v918_v32, 0.0 }
 0x1ef   : > { %923 = vadd.xlane.f32.xlu2 %v922_v25  ;;  %v896_v33 = vpop.xlane.xlu0 %895  ;;  %v1005_v25 = vadd.s32 16, %v1588_v62 }
 0x1f0   : > { %v911_v35 = vmul.f32 %v909_v13, %v896_v33 }
 0x1f1   : > { %vm1010_vm7 = vcmp.lt.s32.totalorder %v1005_v25, %v1590_v0 }
 0x1f2   : > { %v1572_v37 = vsub.f32 %v888_v10, %v911_v35  ;;  %v1600_v10 = vld [vmem:[%s1645_s7] ss:$0 sm:$0xff] }
 0x1f4   : > { %v919_v38 = vmul.f32 %v1572_v37, %v1572_v37 }
 0x1f6   : > { %v925_v17 = vsel %vm340_vm0, %v919_v38, 0.0 }
 0x1f7   : > { %v899_v39 = vpop.xlane.xlu1 %898  ;;  %926 = vadd.xlane.f32.xlu2 %v925_v17 }
 0x1f8   : > { %v912_v40 = vmul.f32 %v909_v13, %v899_v39 }
 0x1fa   : > { %v1577_v34 = vsub.f32 %v889_v18, %v912_v40  ;;  %v1314_v18 = vmov 0.0  }
 0x1fb   : > { %v1231_v11 = vsel %vm1008_vm14, 1.0, %v1314_v18  ;;  %v1232_v14 = vsel %vm1009_vm3, 1.0, %v1314_v18 }
 0x1fc   : > { %v920_v36 = vmul.f32 %v1577_v34, %v1577_v34 }
 0x1fe   : > { %v928_v41 = vsel %vm340_vm0, %v920_v36, 0.0 }
 0x1ff   : > { %v902_v42 = vpop.xlane.xlu1 %901  ;;  %929 = vadd.xlane.f32.xlu0 %v928_v41  ;;  %v1233_v41 = vsel %vm1010_vm7, 1.0, %v1314_v18 }
 0x200   : > { %v913_v43 = vmul.f32 %v909_v13, %v902_v42 }
 0x202   : > { %v1582_v44 = vsub.f32 %v890_v20, %v913_v43 }
 0x204   : > { %v921_v45 = vmul.f32 %v1582_v44, %v1582_v44 }
 0x206   : > { %v931_v46 = vsel %vm340_vm0, %v921_v45, 0.0  ;;  %v1006_v45 = vadd.s32 24, %v1588_v62 }
 0x207   : > { %932 = vadd.xlane.f32.xlu1 %v931_v46 }
 0x262   : > { %v924_v47 = vpop.xlane.xlu2 %923 }
 0x263   : > { %v934_v48 = vmul.f32 %v924_v47, %v909_v13 }
 0x265   : > { %v938_v49 = vadd.f32 1e-05, %v934_v48 }
 0x267   : > { %1282 = vrsqrt.f32 %v938_v49  ;;  %vm948_vm12 = vweird.f32 %v938_v49 }
 0x26a   : > { %v927_v50 = vpop.xlane.xlu2 %926 }
 0x26b   : > { %v935_v51 = vmul.f32 %v927_v50, %v909_v13 }
 0x26d   : > { %v1283_v52 = vpop.eup %1282  ;;  %v939_v53 = vadd.f32 1e-05, %v935_v51 }
 0x26e   : > { %v943_v54 = vmul.f32 %v1283_v52, %v938_v49  ;;  %vm949_vm11 = vweird.f32 %v1283_v52 }
 0x26f   : > { %1284 = vrsqrt.f32 %v939_v53  ;;  %vm950_vm13 = vmor %vm948_vm12, %vm949_vm11  ;;  %vm958_vm1 = vweird.f32 %v939_v53  ;;  %vm1011_vm11 = vcmp.lt.s32.totalorder %v1006_v45, %v1590_v0 }
 0x270   : > { %v944_v55 = vmul.f32 %v1283_v52, %v943_v54  ;;  %v1234_v50 = vsel %vm1011_vm11, 1.0, %v1314_v18 }
 0x272   : > { %v945_v57 = vmul.f32 0.5, %v944_v55  ;;  %v930_v58 = vpop.xlane.xlu0 %929 }
 0x273   : > { %v936_v59 = vmul.f32 %v930_v58, %v909_v13 }
 0x274   : > { %v946_v60 = vsub.f32 1.5, %v945_v57 }
 0x275   : > { %v1285_v61 = vpop.eup %1284  ;;  %v940_v63 = vadd.f32 1e-05, %v936_v59 }
 0x276   : > { %v947_v1 = vmul.f32 %v1283_v52, %v946_v60  ;;  %v953_v2 = vmul.f32 %v1285_v61, %v939_v53  ;;  %vm959_vm15 = vweird.f32 %v1285_v61 }
 0x277   : > { %1286 = vrsqrt.f32 %v940_v63  ;;  %vm960_vm2 = vmor %vm958_vm1, %vm959_vm15  ;;  %vm968_vm5 = vweird.f32 %v940_v63 }
 0x278   : > { %v951_v9 = vsel %vm950_vm13, %v1283_v52, %v947_v1  ;;  %v954_v4 = vmul.f32 %v1285_v61, %v953_v2 }
 0x279   : > { %v982_v5 = vmul.f32 %v951_v9, %v914_v31 }
 0x27a   : > { %v955_v6 = vmul.f32 0.5, %v954_v4  ;;  %v933_v7 = vpop.xlane.xlu1 %932 }
 0x27b   : > { %v990_v8 = vmul.f32 %v1595_v3, %v982_v5  ;;  %v937_v15 = vmul.f32 %v933_v7, %v909_v13 }
 0x27c   : > { %v956_v19 = vsub.f32 1.5, %v955_v6 }
 0x27d   : > { %v1287_v22 = vpop.eup %1286  ;;  %v998_v26 = vadd.f32 %v1600_v10, %v990_v8  ;;  %v941_v20 = vadd.f32 1e-05, %v937_v15 }
 0x27e   : > { %v957_v12 = vmul.f32 %v1285_v61, %v956_v19  ;;  %v963_v21 = vmul.f32 %v1287_v22, %v940_v63  ;;  %vm969_vm4 = vweird.f32 %v1287_v22 }
 0x27f   : > { %v1020_v24 = vmul.f32 %v1231_v11, %v998_v26  ;;  %1288 = vrsqrt.f32 %v941_v20  ;;  %vm970_vm6 = vmor %vm968_vm5, %vm969_vm4  ;;  %vm978_vm9 = vweird.f32 %v941_v20 }
 0x280   : > { %v961_v23 = vsel %vm960_vm2, %v1285_v61, %v957_v12  ;;  %v964_v28 = vmul.f32 %v1287_v22, %v963_v21 }
 0x281   : > { %1024 = vst.msk [vmem:[%s1611_s30] sm:$0xff] %vm340_vm0, %v1020_v24  ;;  %v983_v29 = vmul.f32 %v961_v23, %v1572_v37 }
 0x282   : > { %v965_v30 = vmul.f32 0.5, %v964_v28 }
 0x283   : > { %v991_v13 = vmul.f32 %v1595_v3, %v983_v29 }
 0x284   : > { %v966_v16 = vsub.f32 1.5, %v965_v30 }
 0x285   : > { %v1289_v31 = vpop.eup %1288  ;;  %v999_v32 = vadd.f32 %v1600_v10, %v991_v13 }
 0x286   : > { %v967_v33 = vmul.f32 %v1287_v22, %v966_v16  ;;  %v973_v35 = vmul.f32 %v1289_v31, %v941_v20  ;;  %vm979_vm8 = vweird.f32 %v1289_v31 }
 0x287   : > { %v1021_v38 = vmul.f32 %v1232_v14, %v999_v32  ;;  %vm980_vm10 = vmor %vm978_vm9, %vm979_vm8 }
 0x288   : > { %v971_v17 = vsel %vm970_vm6, %v1287_v22, %v967_v33  ;;  %v974_v39 = vmul.f32 %v1289_v31, %v973_v35 }
 0x289   : > { %1025 = vst.msk [vmem:[%s1611_s30 + $0x8] sm:$0xff] %vm340_vm0, %v1021_v38  ;;  %v984_v37 = vmul.f32 %v971_v17, %v1577_v34 }
 0x28a   : > { %v975_v40 = vmul.f32 0.5, %v974_v39 }
 0x28b   : > { %v992_v36 = vmul.f32 %v1595_v3, %v984_v37 }
 0x28c   : > { %v976_v42 = vsub.f32 1.5, %v975_v40 }
 0x28d   : > { %v1000_v43 = vadd.f32 %v1600_v10, %v992_v36 }
 0x28e   : > { %v977_v46 = vmul.f32 %v1289_v31, %v976_v42 }
 0x28f   : > { %v1022_v47 = vmul.f32 %v1233_v41, %v1000_v43 }
 0x290   : > { %v981_v48 = vsel %vm980_vm10, %v1289_v31, %v977_v46 }
 0x291   : > { %1026 = vst.msk [vmem:[%s1611_s30 + $0x10] sm:$0xff] %vm340_vm0, %v1022_v47  ;;  %v985_v34 = vmul.f32 %v981_v48, %v1582_v44 }
 0x293   : > { %v993_v49 = vmul.f32 %v1595_v3, %v985_v34 }
 0x295   : > { %v1001_v51 = vadd.f32 %v1600_v10, %v993_v49 }
 0x297   : > { %v1023_v52 = vmul.f32 %v1234_v50, %v1001_v51 }
 0x299   : > { %1027 = vst.msk [vmem:[%s1611_s30 + $0x18] sm:$0xff] %vm340_vm0, %v1023_v52 }
 0x29a PF: > { %s26_s9 = sadd.s32 1, %s1310_s9  }
 0x29b   : > { %p23_p4 = scmp.ge.s32.totalorder %s26_s9, 4  }
 0x29d   :  { %25 = sbr.rel (!%p23_p4) target bundleno = 7 (0x7), region = 86 }

</bundles_post_ra>
